<compile_context>
chip_gen: v7x
topology: tpu7x:2x2x1
jax: 0.10.0
libtpu: 0.0.40
codegen_flags: <defaults>
</compile_context>

<pallas_src>
import functools

import numpy as np
import jax
import jax.numpy as jnp
from jax import lax
from jax.experimental import pallas as pl
from jax.experimental.pallas import tpu as pltpu


CPAD = 128          # channel width padded to one lane tile (real width is 80)
FC_PAD = 128        # hidden / class dims padded for lane-dense MXU stores
REAL_C = 80         # real per-branch channel count (hard-coded 80 in the module)


# ----------------------------- Pallas kernels ------------------------------

def _stem_kernel(*refs, nb, H, W):
    """3x3 conv (pad=1, dil=1) of the raw input against the concatenated conv0
    weights of all branches.  One image per grid step; 9 shifted-tap dots."""
    x_ref, w_ref, b_ref = refs[0], refs[1], refs[2]
    o_refs = refs[3:3 + nb]
    xp_ref = refs[3 + nb]

    # zero-padded bf16 halo copy of the input image
    xp_ref[...] = jnp.zeros_like(xp_ref)
    xp_ref[1:1 + H, 1:1 + W, :] = x_ref[0].astype(jnp.bfloat16)

    acc = jnp.zeros((H * W, nb * CPAD), jnp.float32)
    for t in range(9):
        ky, kx = t // 3, t % 3
        tap = xp_ref[ky:ky + H, kx:kx + W, :].reshape(H * W, CPAD)
        acc = acc + jnp.dot(tap, w_ref[t], preferred_element_type=jnp.float32)
    acc = acc + b_ref[...]
    for i in range(nb):
        o_refs[i][0] = acc[:, i * CPAD:(i + 1) * CPAD].reshape(H, W, CPAD)


def _resblock_kernel(y_ref, w1_ref, b1_ref, w2_ref, b2_ref, o_ref, xp_ref,
                     *, d, H, W):
    """Fused ResidualBlock: dilated 3x3 conv + bias + ReLU, 1x1 conv + bias,
    residual add.  3x3 conv = 9 shifted dots off a zero-padded VMEM halo."""
    y = y_ref[0]                                         # (H, W, CPAD) f32

    xp_ref[...] = jnp.zeros_like(xp_ref)
    xp_ref[d:d + H, d:d + W, :] = y.astype(jnp.bfloat16)

    acc = jnp.zeros((H * W, CPAD), jnp.float32)
    for t in range(9):
        ky, kx = t // 3, t % 3
        tap = xp_ref[ky * d:ky * d + H, kx * d:kx * d + W, :].reshape(H * W, CPAD)
        acc = acc + jnp.dot(tap, w1_ref[t], preferred_element_type=jnp.float32)
    h = jnp.maximum(acc + b1_ref[...], 0.0).astype(jnp.bfloat16)   # ReLU in f32, cast for MXU

    out = jnp.dot(h, w2_ref[...], preferred_element_type=jnp.float32) + b2_ref[...]
    o_ref[0] = (out + y.reshape(H * W, CPAD)).reshape(H, W, CPAD)  # residual add in f32


def _pool_mlp_kernel(*refs, nb, inv_hw):
    """Global average pool over H*W per branch + fused 3-layer MLP."""
    f_refs = refs[:nb]
    w1_ref, b1_ref, w2_ref, b2_ref, w3_ref, b3_ref, o_ref = refs[nb:nb + 7]
    pooled = jnp.concatenate(
        [jnp.sum(f[...], axis=1) * inv_hw for f in f_refs], axis=-1)   # (B, nb*CPAD)
    h1 = jnp.maximum(jnp.dot(pooled, w1_ref[...],
                             preferred_element_type=jnp.float32) + b1_ref[...], 0.0)
    h2 = jnp.maximum(jnp.dot(h1, w2_ref[...],
                             preferred_element_type=jnp.float32) + b2_ref[...], 0.0)
    o_ref[...] = jnp.dot(h2, w3_ref[...],
                         preferred_element_type=jnp.float32) + b3_ref[...]


# ----------------------------- pallas_call wrappers -------------------------

_VMEM = pl.BlockSpec(memory_space=pltpu.MemorySpace.VMEM)
_CONV_PARAMS = pltpu.CompilerParams(dimension_semantics=("parallel",),
                                    vmem_limit_bytes=32 * 1024 * 1024)


def pallas_stem(x_pad, w_taps, bias, nb):
    B, H, W, _ = x_pad.shape
    img = lambda b: (b, 0, 0, 0)
    out_shape = tuple(jax.ShapeDtypeStruct((B, H, W, CPAD), jnp.float32)
                      for _ in range(nb))
    out_specs = tuple(pl.BlockSpec((1, H, W, CPAD), img) for _ in range(nb))
    return pl.pallas_call(
        functools.partial(_stem_kernel, nb=nb, H=H, W=W),
        out_shape=out_shape,
        grid=(B,),
        in_specs=[pl.BlockSpec((1, H, W, CPAD), img),
                  pl.BlockSpec(w_taps.shape, lambda b: (0, 0, 0)),
                  pl.BlockSpec(bias.shape, lambda b: (0, 0))],
        out_specs=out_specs,
        scratch_shapes=[pltpu.VMEM((H + 2, W + 2, CPAD), jnp.bfloat16)],
        compiler_params=_CONV_PARAMS,
    )(x_pad, w_taps, bias)


def pallas_resblock(y, w1_taps, b1, w2, b2, d):
    B, H, W, _ = y.shape
    img = lambda b: (b, 0, 0, 0)
    return pl.pallas_call(
        functools.partial(_resblock_kernel, d=d, H=H, W=W),
        out_shape=jax.ShapeDtypeStruct((B, H, W, CPAD), jnp.float32),
        grid=(B,),
        in_specs=[pl.BlockSpec((1, H, W, CPAD), img),
                  pl.BlockSpec((9, CPAD, CPAD), lambda b: (0, 0, 0)),
                  pl.BlockSpec((1, CPAD), lambda b: (0, 0)),
                  pl.BlockSpec((CPAD, CPAD), lambda b: (0, 0)),
                  pl.BlockSpec((1, CPAD), lambda b: (0, 0))],
        out_specs=pl.BlockSpec((1, H, W, CPAD), img),
        scratch_shapes=[pltpu.VMEM((H + 2 * d, W + 2 * d, CPAD), jnp.bfloat16)],
        compiler_params=_CONV_PARAMS,
    )(y, w1_taps, b1, w2, b2)


def pallas_pool_mlp(branch_feats, w1, b1, w2, b2, w3, b3):
    nb = len(branch_feats)
    B, HW, _ = branch_feats[0].shape
    return pl.pallas_call(
        functools.partial(_pool_mlp_kernel, nb=nb, inv_hw=1.0 / float(HW)),
        out_shape=jax.ShapeDtypeStruct((B, FC_PAD), jnp.float32),
        in_specs=[_VMEM] * (nb + 6),
        out_specs=_VMEM,
        compiler_params=pltpu.CompilerParams(vmem_limit_bytes=32 * 1024 * 1024),
    )(*branch_feats, w1, b1, w2, b2, w3, b3)


# ----------------------------- weight preparation ---------------------------

def conv3x3_taps(w, cin_pad, cout_pad):
    """torch (Cout, Cin, 3, 3) -> (9, cin_pad, cout_pad) bf16, tap index = ky*3+kx."""
    cout, cin = w.shape[0], w.shape[1]
    taps = jnp.transpose(w, (2, 3, 1, 0)).reshape(9, cin, cout)
    taps = jnp.pad(taps, ((0, 0), (0, cin_pad - cin), (0, cout_pad - cout)))
    return taps.astype(jnp.bfloat16)


def conv1x1_mat(w, cpad):
    """torch (Cout, Cin, 1, 1) -> (cpad, cpad) bf16."""
    cout, cin = w.shape[0], w.shape[1]
    m = jnp.transpose(w[:, :, 0, 0], (1, 0))
    return jnp.pad(m, ((0, cpad - cin), (0, cpad - cout))).astype(jnp.bfloat16)


def pad_bias(b, n):
    return jnp.pad(b, (0, n - b.shape[0])).reshape(1, n).astype(jnp.float32)


def init_params(key, input_channels, num_branches, num_layers_per_branch,
                dilation_base, hidden_dim1, hidden_dim2, num_classes):
    def nrm(k, shape, fan_in):
        return jax.random.normal(k, shape, jnp.float32) / jnp.sqrt(float(fan_in))

    keys = iter(jax.random.split(key, 256))
    params = {'branches': []}
    for bi in range(num_branches):
        bp = {'conv0_w': nrm(next(keys), (80, 3, 3, 3), 3 * 9),
              'conv0_b': nrm(next(keys), (80,), 1.0),
              'layers': []}
        cin = input_channels
        for li in range(num_layers_per_branch):
            d = dilation_base[bi] ** li
            bp['layers'].append({
                'dilation': d,
                'conv1_w': nrm(next(keys), (80, cin, 3, 3), cin * 9),
                'conv1_b': nrm(next(keys), (80,), 1.0),
                'conv2_w': nrm(next(keys), (80, 80, 1, 1), 80),
                'conv2_b': nrm(next(keys), (80,), 1.0),
            })
            cin = 80
        params['branches'].append(bp)
    in_dim = num_branches * 80
    params['fc1_w'] = nrm(next(keys), (hidden_dim1, in_dim), in_dim)
    params['fc1_b'] = nrm(next(keys), (hidden_dim1,), 1.0)
    params['fc2_w'] = nrm(next(keys), (hidden_dim2, hidden_dim1), hidden_dim1)
    params['fc2_b'] = nrm(next(keys), (hidden_dim2,), 1.0)
    params['fc3_w'] = nrm(next(keys), (num_classes, hidden_dim2), hidden_dim2)
    params['fc3_b'] = nrm(next(keys), (num_classes,), 1.0)
    return params


# ------------------------------ forward pass --------------------------------

def cnn_bigru_forward(x_nchw, params):
    """Pallas forward.  x_nchw: (B, 3, H, W) float32 -> (B, num_classes)."""
    x = jnp.transpose(x_nchw, (0, 2, 3, 1)).astype(jnp.float32)      # NHWC
    B, H, W, cin = x.shape
    nb = len(params['branches'])

    # pad input channels to the lane-tile width (zeros; weights padded to match)
    x_pad = jnp.pad(x, ((0, 0), (0, 0), (0, 0), (0, CPAD - cin)))

    # hoisted stem: one conv against the concatenated conv0 weights of all branches
    stem_w = jnp.concatenate(
        [conv3x3_taps(bp['conv0_w'], CPAD, CPAD) for bp in params['branches']], axis=-1)
    stem_b = jnp.concatenate(
        [pad_bias(bp['conv0_b'], CPAD) for bp in params['branches']], axis=-1)
    ys = list(pallas_stem(x_pad, stem_w, stem_b, nb))                # nb x (B,H,W,CPAD)

    feats = []
    for bi, bp in enumerate(params['branches']):
        y = ys[bi]
        for lp in bp['layers']:
            y = pallas_resblock(y,
                                conv3x3_taps(lp['conv1_w'], CPAD, CPAD),
                                pad_bias(lp['conv1_b'], CPAD),
                                conv1x1_mat(lp['conv2_w'], CPAD),
                                pad_bias(lp['conv2_b'], CPAD),
                                int(lp['dilation']))
        feats.append(y.reshape(B, H * W, CPAD))

    # classifier weights re-laid-out for the padded per-branch channel chunks
    h1 = params['fc1_b'].shape[0]
    h2 = params['fc2_b'].shape[0]
    nc = params['fc3_b'].shape[0]
    w1p = jnp.zeros((nb * CPAD, FC_PAD), jnp.float32)
    for bi in range(nb):
        w1p = w1p.at[bi * CPAD:bi * CPAD + REAL_C, :h1].set(
            params['fc1_w'][:, bi * REAL_C:(bi + 1) * REAL_C].T)
    w2p = jnp.zeros((FC_PAD, FC_PAD), jnp.float32).at[:h1, :h2].set(params['fc2_w'].T)
    w3p = jnp.zeros((FC_PAD, FC_PAD), jnp.float32).at[:h2, :nc].set(params['fc3_w'].T)

    logits_pad = pallas_pool_mlp(feats,
                                 w1p, pad_bias(params['fc1_b'], FC_PAD),
                                 w2p, pad_bias(params['fc2_b'], FC_PAD),
                                 w3p, pad_bias(params['fc3_b'], FC_PAD))
    return logits_pad[:, :nc]


# ----------------------------- pure-JAX reference ---------------------------

def ref_forward(x, params):
    dn = ('NCHW', 'OIHW', 'NCHW')

    def conv(x, w, b, d):
        y = lax.conv_general_dilated(x, w, window_strides=(1, 1),
                                     padding=((d, d), (d, d)),
                                     rhs_dilation=(d, d),
                                     dimension_numbers=dn,
                                     precision=lax.Precision.HIGHEST)
        return y + b.reshape(1, -1, 1, 1)

    outs = []
    for bp in params['branches']:
        y = conv(x, bp['conv0_w'], bp['conv0_b'], 1)
        for lp in bp['layers']:
            d = lp['dilation']
            h = jax.nn.relu(conv(y, lp['conv1_w'], lp['conv1_b'], d))
            h = lax.conv_general_dilated(h, lp['conv2_w'], (1, 1), 'VALID',
                                         dimension_numbers=dn,
                                         precision=lax.Precision.HIGHEST)
            h = h + lp['conv2_b'].reshape(1, -1, 1, 1)
            y = h + y
        outs.append(y)
    feat = jnp.concatenate(outs, axis=1)
    pooled = jnp.mean(feat, axis=(2, 3))
    h1 = jax.nn.relu(pooled @ params['fc1_w'].T + params['fc1_b'])
    h2 = jax.nn.relu(h1 @ params['fc2_w'].T + params['fc2_b'])
    return h2 @ params['fc3_w'].T + params['fc3_b']


# ---------------------------------- main ------------------------------------

if __name__ == "__main__":
    key = jax.random.PRNGKey(0)
    kx, kp = jax.random.split(key)

    # Input has 3 channels because TCNBranch hard-codes nn.Conv2d(3, 80, ...).
    B, C, H, W = 2, 3, 16, 16
    x = jax.random.normal(kx, (B, C, H, W), jnp.float32)

    params = init_params(
        kp,
        input_channels=80,            # residual blocks operate on the 80-ch stem output
        num_branches=2,
        num_layers_per_branch=2,
        dilation_base=[1, 2],
        hidden_dim1=32,
        hidden_dim2=32,
        num_classes=5,
    )

    out = cnn_bigru_forward(x, params)
    out = jax.block_until_ready(out)

    ref = ref_forward(x, params)
    assert out.shape == ref.shape == (B, 5)
    # Conv matmul operands run in bf16 on the MXU (f32 accumulation) while the
    # reference is full f32 HIGHEST, hence the 5e-2 tolerance (documented gap).
    np.testing.assert_allclose(np.asarray(out), np.asarray(ref), rtol=5e-2, atol=5e-2)

    print("KERNEL_OK")
</pallas_src>

<mosaic_0001>
module attributes {stable_mosaic.version = 11 : i64} {
  func.func @_stem_kernel(%arg0: i32, %arg1: memref<1x16x16x128xf32, #tpu.memory_space<vmem>>, %arg2: memref<9x128x256xbf16, #tpu.memory_space<vmem>>, %arg3: memref<1x256xf32, #tpu.memory_space<vmem>>, %arg4: memref<1x16x16x128xf32, #tpu.memory_space<vmem>>, %arg5: memref<1x16x16x128xf32, #tpu.memory_space<vmem>>, %arg6: memref<18x18x128xbf16, #tpu.memory_space<vmem>>) attributes {dimension_semantics = [#tpu.dimension_semantics<parallel>], iteration_bounds = array<i64: 2>, scalar_prefetch = 0 : i64, scratch_operands = 1 : i64, tpu.core_type = #tpu.core_type<tc>, window_params = [{transform_indices = @transform_0, window_bounds = array<i64: 1, 16, 16, 128>}, {pipeline_mode = #tpu.pipeline_mode<synchronous>, transform_indices = @transform_1, window_bounds = array<i64: 9, 128, 256>}, {pipeline_mode = #tpu.pipeline_mode<synchronous>, transform_indices = @transform_2, window_bounds = array<i64: 1, 256>}, {transform_indices = @transform_3, window_bounds = array<i64: 1, 16, 16, 128>}, {transform_indices = @transform_4, window_bounds = array<i64: 1, 16, 16, 128>}]} {
    %cst = arith.constant 0.000000e+00 : bf16
    %0 = vector.broadcast %cst : bf16 to vector<18x18x128xbf16>
    %c0 = arith.constant 0 : index
    %c0_0 = arith.constant 0 : index
    %c0_1 = arith.constant 0 : index
    %1 = vector.load %arg6[%c0, %c0_0, %c0_1] : memref<18x18x128xbf16, #tpu.memory_space<vmem>>, vector<18x18x128xbf16>
    tpu.vector_store %arg6[%c0, %c0_0, %c0_1], %0 {strides = array<i32>} : memref<18x18x128xbf16, #tpu.memory_space<vmem>>, vector<18x18x128xbf16>,
    %c0_2 = arith.constant 0 : index
    %c0_3 = arith.constant 0 : index
    %c0_4 = arith.constant 0 : index
    %c0_5 = arith.constant 0 : index
    %2 = vector.load %arg1[%c0_2, %c0_3, %c0_4, %c0_5] : memref<1x16x16x128xf32, #tpu.memory_space<vmem>>, vector<1x16x16x128xf32>
    %3 = vector.shape_cast %2 : vector<1x16x16x128xf32> to vector<16x16x128xf32>
    %4 = arith.truncf %3 : vector<16x16x128xf32> to vector<16x16x128xbf16>
    %c1 = arith.constant 1 : index
    %c1_6 = arith.constant 1 : index
    %c0_7 = arith.constant 0 : index
    %5 = vector.load %arg6[%c1, %c1_6, %c0_7] : memref<18x18x128xbf16, #tpu.memory_space<vmem>>, vector<16x16x128xbf16>
    tpu.vector_store %arg6[%c1, %c1_6, %c0_7], %4 {strides = array<i32>} : memref<18x18x128xbf16, #tpu.memory_space<vmem>>, vector<16x16x128xbf16>,
    %cst_8 = arith.constant 0.000000e+00 : f32
    %6 = vector.broadcast %cst_8 : f32 to vector<256x256xf32>
    %c0_9 = arith.constant 0 : index
    %c0_10 = arith.constant 0 : index
    %c0_11 = arith.constant 0 : index
    %7 = vector.load %arg6[%c0_9, %c0_10, %c0_11] : memref<18x18x128xbf16, #tpu.memory_space<vmem>>, vector<16x16x128xbf16>
    %8 = vector.shape_cast %7 : vector<16x16x128xbf16> to vector<256x128xbf16>
    %c0_12 = arith.constant 0 : index
    %c0_13 = arith.constant 0 : index
    %c0_14 = arith.constant 0 : index
    %9 = vector.load %arg2[%c0_12, %c0_13, %c0_14] : memref<9x128x256xbf16, #tpu.memory_space<vmem>>, vector<1x128x256xbf16>
    %10 = vector.shape_cast %9 : vector<1x128x256xbf16> to vector<128x256xbf16>
    %cst_15 = arith.constant dense<0.000000e+00> : vector<256x256xf32>
    %11 = tpu.matmul %8, %10, %cst_15 {dimension_numbers = #tpu.dot_dimension_numbers<[1], [0], [0], [1], [0, 0, 1, 1], [], []>} : vector<256x128xbf16>, vector<128x256xbf16>, vector<256x256xf32> -> vector<256x256xf32>
    %12 = arith.addf %6, %11 : vector<256x256xf32>
    %c0_16 = arith.constant 0 : index
    %c1_17 = arith.constant 1 : index
    %c0_18 = arith.constant 0 : index
    %13 = vector.load %arg6[%c0_16, %c1_17, %c0_18] : memref<18x18x128xbf16, #tpu.memory_space<vmem>>, vector<16x16x128xbf16>
    %14 = vector.shape_cast %13 : vector<16x16x128xbf16> to vector<256x128xbf16>
    %c1_19 = arith.constant 1 : index
    %c0_20 = arith.constant 0 : index
    %c0_21 = arith.constant 0 : index
    %15 = vector.load %arg2[%c1_19, %c0_20, %c0_21] : memref<9x128x256xbf16, #tpu.memory_space<vmem>>, vector<1x128x256xbf16>
    %16 = vector.shape_cast %15 : vector<1x128x256xbf16> to vector<128x256xbf16>
    %cst_22 = arith.constant dense<0.000000e+00> : vector<256x256xf32>
    %17 = tpu.matmul %14, %16, %cst_22 {dimension_numbers = #tpu.dot_dimension_numbers<[1], [0], [0], [1], [0, 0, 1, 1], [], []>} : vector<256x128xbf16>, vector<128x256xbf16>, vector<256x256xf32> -> vector<256x256xf32>
    %18 = arith.addf %12, %17 : vector<256x256xf32>
    %c0_23 = arith.constant 0 : index
    %c2 = arith.constant 2 : index
    %c0_24 = arith.constant 0 : index
    %19 = vector.load %arg6[%c0_23, %c2, %c0_24] : memref<18x18x128xbf16, #tpu.memory_space<vmem>>, vector<16x16x128xbf16>
    %20 = vector.shape_cast %19 : vector<16x16x128xbf16> to vector<256x128xbf16>
    %c2_25 = arith.constant 2 : index
    %c0_26 = arith.constant 0 : index
    %c0_27 = arith.constant 0 : index
    %21 = vector.load %arg2[%c2_25, %c0_26, %c0_27] : memref<9x128x256xbf16, #tpu.memory_space<vmem>>, vector<1x128x256xbf16>
    %22 = vector.shape_cast %21 : vector<1x128x256xbf16> to vector<128x256xbf16>
    %cst_28 = arith.constant dense<0.000000e+00> : vector<256x256xf32>
    %23 = tpu.matmul %20, %22, %cst_28 {dimension_numbers = #tpu.dot_dimension_numbers<[1], [0], [0], [1], [0, 0, 1, 1], [], []>} : vector<256x128xbf16>, vector<128x256xbf16>, vector<256x256xf32> -> vector<256x256xf32>
    %24 = arith.addf %18, %23 : vector<256x256xf32>
    %c1_29 = arith.constant 1 : index
    %c0_30 = arith.constant 0 : index
    %c0_31 = arith.constant 0 : index
    %25 = vector.load %arg6[%c1_29, %c0_30, %c0_31] : memref<18x18x128xbf16, #tpu.memory_space<vmem>>, vector<16x16x128xbf16>
    %26 = vector.shape_cast %25 : vector<16x16x128xbf16> to vector<256x128xbf16>
    %c3 = arith.constant 3 : index
    %c0_32 = arith.constant 0 : index
    %c0_33 = arith.constant 0 : index
    %27 = vector.load %arg2[%c3, %c0_32, %c0_33] : memref<9x128x256xbf16, #tpu.memory_space<vmem>>, vector<1x128x256xbf16>
    %28 = vector.shape_cast %27 : vector<1x128x256xbf16> to vector<128x256xbf16>
    %cst_34 = arith.constant dense<0.000000e+00> : vector<256x256xf32>
    %29 = tpu.matmul %26, %28, %cst_34 {dimension_numbers = #tpu.dot_dimension_numbers<[1], [0], [0], [1], [0, 0, 1, 1], [], []>} : vector<256x128xbf16>, vector<128x256xbf16>, vector<256x256xf32> -> vector<256x256xf32>
    %30 = arith.addf %24, %29 : vector<256x256xf32>
    %c1_35 = arith.constant 1 : index
    %c1_36 = arith.constant 1 : index
    %c0_37 = arith.constant 0 : index
    %31 = vector.load %arg6[%c1_35, %c1_36, %c0_37] : memref<18x18x128xbf16, #tpu.memory_space<vmem>>, vector<16x16x128xbf16>
    %32 = vector.shape_cast %31 : vector<16x16x128xbf16> to vector<256x128xbf16>
    %c4 = arith.constant 4 : index
    %c0_38 = arith.constant 0 : index
    %c0_39 = arith.constant 0 : index
    %33 = vector.load %arg2[%c4, %c0_38, %c0_39] : memref<9x128x256xbf16, #tpu.memory_space<vmem>>, vector<1x128x256xbf16>
    %34 = vector.shape_cast %33 : vector<1x128x256xbf16> to vector<128x256xbf16>
    %cst_40 = arith.constant dense<0.000000e+00> : vector<256x256xf32>
    %35 = tpu.matmul %32, %34, %cst_40 {dimension_numbers = #tpu.dot_dimension_numbers<[1], [0], [0], [1], [0, 0, 1, 1], [], []>} : vector<256x128xbf16>, vector<128x256xbf16>, vector<256x256xf32> -> vector<256x256xf32>
    %36 = arith.addf %30, %35 : vector<256x256xf32>
    %c1_41 = arith.constant 1 : index
    %c2_42 = arith.constant 2 : index
    %c0_43 = arith.constant 0 : index
    %37 = vector.load %arg6[%c1_41, %c2_42, %c0_43] : memref<18x18x128xbf16, #tpu.memory_space<vmem>>, vector<16x16x128xbf16>
    %38 = vector.shape_cast %37 : vector<16x16x128xbf16> to vector<256x128xbf16>
    %c5 = arith.constant 5 : index
    %c0_44 = arith.constant 0 : index
    %c0_45 = arith.constant 0 : index
    %39 = vector.load %arg2[%c5, %c0_44, %c0_45] : memref<9x128x256xbf16, #tpu.memory_space<vmem>>, vector<1x128x256xbf16>
    %40 = vector.shape_cast %39 : vector<1x128x256xbf16> to vector<128x256xbf16>
    %cst_46 = arith.constant dense<0.000000e+00> : vector<256x256xf32>
    %41 = tpu.matmul %38, %40, %cst_46 {dimension_numbers = #tpu.dot_dimension_numbers<[1], [0], [0], [1], [0, 0, 1, 1], [], []>} : vector<256x128xbf16>, vector<128x256xbf16>, vector<256x256xf32> -> vector<256x256xf32>
    %42 = arith.addf %36, %41 : vector<256x256xf32>
    %c2_47 = arith.constant 2 : index
    %c0_48 = arith.constant 0 : index
    %c0_49 = arith.constant 0 : index
    %43 = vector.load %arg6[%c2_47, %c0_48, %c0_49] : memref<18x18x128xbf16, #tpu.memory_space<vmem>>, vector<16x16x128xbf16>
    %44 = vector.shape_cast %43 : vector<16x16x128xbf16> to vector<256x128xbf16>
    %c6 = arith.constant 6 : index
    %c0_50 = arith.constant 0 : index
    %c0_51 = arith.constant 0 : index
    %45 = vector.load %arg2[%c6, %c0_50, %c0_51] : memref<9x128x256xbf16, #tpu.memory_space<vmem>>, vector<1x128x256xbf16>
    %46 = vector.shape_cast %45 : vector<1x128x256xbf16> to vector<128x256xbf16>
    %cst_52 = arith.constant dense<0.000000e+00> : vector<256x256xf32>
    %47 = tpu.matmul %44, %46, %cst_52 {dimension_numbers = #tpu.dot_dimension_numbers<[1], [0], [0], [1], [0, 0, 1, 1], [], []>} : vector<256x128xbf16>, vector<128x256xbf16>, vector<256x256xf32> -> vector<256x256xf32>
    %48 = arith.addf %42, %47 : vector<256x256xf32>
    %c2_53 = arith.constant 2 : index
    %c1_54 = arith.constant 1 : index
    %c0_55 = arith.constant 0 : index
    %49 = vector.load %arg6[%c2_53, %c1_54, %c0_55] : memref<18x18x128xbf16, #tpu.memory_space<vmem>>, vector<16x16x128xbf16>
    %50 = vector.shape_cast %49 : vector<16x16x128xbf16> to vector<256x128xbf16>
    %c7 = arith.constant 7 : index
    %c0_56 = arith.constant 0 : index
    %c0_57 = arith.constant 0 : index
    %51 = vector.load %arg2[%c7, %c0_56, %c0_57] : memref<9x128x256xbf16, #tpu.memory_space<vmem>>, vector<1x128x256xbf16>
    %52 = vector.shape_cast %51 : vector<1x128x256xbf16> to vector<128x256xbf16>
    %cst_58 = arith.constant dense<0.000000e+00> : vector<256x256xf32>
    %53 = tpu.matmul %50, %52, %cst_58 {dimension_numbers = #tpu.dot_dimension_numbers<[1], [0], [0], [1], [0, 0, 1, 1], [], []>} : vector<256x128xbf16>, vector<128x256xbf16>, vector<256x256xf32> -> vector<256x256xf32>
    %54 = arith.addf %48, %53 : vector<256x256xf32>
    %c2_59 = arith.constant 2 : index
    %c2_60 = arith.constant 2 : index
    %c0_61 = arith.constant 0 : index
    %55 = vector.load %arg6[%c2_59, %c2_60, %c0_61] : memref<18x18x128xbf16, #tpu.memory_space<vmem>>, vector<16x16x128xbf16>
    %56 = vector.shape_cast %55 : vector<16x16x128xbf16> to vector<256x128xbf16>
    %c8 = arith.constant 8 : index
    %c0_62 = arith.constant 0 : index
    %c0_63 = arith.constant 0 : index
    %57 = vector.load %arg2[%c8, %c0_62, %c0_63] : memref<9x128x256xbf16, #tpu.memory_space<vmem>>, vector<1x128x256xbf16>
    %58 = vector.shape_cast %57 : vector<1x128x256xbf16> to vector<128x256xbf16>
    %cst_64 = arith.constant dense<0.000000e+00> : vector<256x256xf32>
    %59 = tpu.matmul %56, %58, %cst_64 {dimension_numbers = #tpu.dot_dimension_numbers<[1], [0], [0], [1], [0, 0, 1, 1], [], []>} : vector<256x128xbf16>, vector<128x256xbf16>, vector<256x256xf32> -> vector<256x256xf32>
    %60 = arith.addf %54, %59 : vector<256x256xf32>
    %c0_65 = arith.constant 0 : index
    %c0_66 = arith.constant 0 : index
    %61 = vector.load %arg3[%c0_65, %c0_66] : memref<1x256xf32, #tpu.memory_space<vmem>>, vector<1x256xf32>
    %62 = vector.broadcast %61 : vector<1x256xf32> to vector<256x256xf32>
    %63 = arith.addf %60, %62 : vector<256x256xf32>
    %64 = vector.extract_strided_slice %63 {offsets = [0, 0], sizes = [256, 128], strides = [1, 1]} : vector<256x256xf32> to vector<256x128xf32>
    %65 = vector.shape_cast %64 : vector<256x128xf32> to vector<16x16x128xf32>
    %c0_67 = arith.constant 0 : index
    %c0_68 = arith.constant 0 : index
    %c0_69 = arith.constant 0 : index
    %c0_70 = arith.constant 0 : index
    %66 = vector.load %arg4[%c0_67, %c0_68, %c0_69, %c0_70] : memref<1x16x16x128xf32, #tpu.memory_space<vmem>>, vector<1x16x16x128xf32>
    %67 = vector.shape_cast %66 : vector<1x16x16x128xf32> to vector<16x16x128xf32>
    %68 = vector.shape_cast %65 : vector<16x16x128xf32> to vector<1x16x16x128xf32>
    tpu.vector_store %arg4[%c0_67, %c0_68, %c0_69, %c0_70], %68 {strides = array<i32>} : memref<1x16x16x128xf32, #tpu.memory_space<vmem>>, vector<1x16x16x128xf32>,
    %69 = vector.extract_strided_slice %63 {offsets = [0, 128], sizes = [256, 128], strides = [1, 1]} : vector<256x256xf32> to vector<256x128xf32>
    %70 = vector.shape_cast %69 : vector<256x128xf32> to vector<16x16x128xf32>
    %c0_71 = arith.constant 0 : index
    %c0_72 = arith.constant 0 : index
    %c0_73 = arith.constant 0 : index
    %c0_74 = arith.constant 0 : index
    %71 = vector.load %arg5[%c0_71, %c0_72, %c0_73, %c0_74] : memref<1x16x16x128xf32, #tpu.memory_space<vmem>>, vector<1x16x16x128xf32>
    %72 = vector.shape_cast %71 : vector<1x16x16x128xf32> to vector<16x16x128xf32>
    %73 = vector.shape_cast %70 : vector<16x16x128xf32> to vector<1x16x16x128xf32>
    tpu.vector_store %arg5[%c0_71, %c0_72, %c0_73, %c0_74], %73 {strides = array<i32>} : memref<1x16x16x128xf32, #tpu.memory_space<vmem>>, vector<1x16x16x128xf32>,
    return
  }
  func.func @transform_0(%arg0: i32) -> (i32, i32, i32, i32) {
    %c0_i32 = arith.constant 0 : i32
    %c0_i32_0 = arith.constant 0 : i32
    %c0_i32_1 = arith.constant 0 : i32
    %c0_i32_2 = arith.constant 0 : i32
    return %arg0, %c0_i32, %c0_i32_0, %c0_i32_1 : i32, i32, i32, i32
  }
  func.func @transform_1(%arg0: i32) -> (i32, i32, i32) {
    %c0_i32 = arith.constant 0 : i32
    %c0_i32_0 = arith.constant 0 : i32
    %c0_i32_1 = arith.constant 0 : i32
    %c0_i32_2 = arith.constant 0 : i32
    return %c0_i32, %c0_i32_0, %c0_i32_1 : i32, i32, i32
  }
  func.func @transform_2(%arg0: i32) -> (i32, i32) {
    %c0_i32 = arith.constant 0 : i32
    %c0_i32_0 = arith.constant 0 : i32
    %c0_i32_1 = arith.constant 0 : i32
    return %c0_i32, %c0_i32_0 : i32, i32
  }
  func.func @transform_3(%arg0: i32) -> (i32, i32, i32, i32) {
    %c0_i32 = arith.constant 0 : i32
    %c0_i32_0 = arith.constant 0 : i32
    %c0_i32_1 = arith.constant 0 : i32
    %c0_i32_2 = arith.constant 0 : i32
    return %arg0, %c0_i32, %c0_i32_0, %c0_i32_1 : i32, i32, i32, i32
  }
  func.func @transform_4(%arg0: i32) -> (i32, i32, i32, i32) {
    %c0_i32 = arith.constant 0 : i32
    %c0_i32_0 = arith.constant 0 : i32
    %c0_i32_1 = arith.constant 0 : i32
    %c0_i32_2 = arith.constant 0 : i32
    return %arg0, %c0_i32, %c0_i32_0, %c0_i32_1 : i32, i32, i32, i32
  }
}

</mosaic_0001>

<bundles_post_ra>
// kernel: tpu_custom_call.1
= control target key start
LH: loop header
LB: loop body
LE: loop exit
PB: predicated region body
PF: predicated region fallthrough
CT: control target
= control target key end

     0   :  { %10 = vsyncpa [#allocation4], 0  ;;  %s10019_s0 = inlined_call_operand.hbm [shape: f32[2,16,16,128], index: 0, kind: input, shape index: {}]   ;;  %s10020_s1 = inlined_call_operand.hbm [shape: bf16[9,128,256], index: 1, kind: input, shape index: {}]   ;;  %s10021_s2 = inlined_call_operand.vmem [shape: f32[1,256], index: 2, kind: input, shape index: {}]   ;;  %s10022_s3 = inlined_call_operand.hbm [shape: f32[2,16,16,128], index: 3, kind: output, shape index: {0}]   ;;  %s10023_s4 = inlined_call_operand.hbm [shape: f32[2,16,16,128], index: 4, kind: output, shape index: {1}]  }
   0x1   :  { %12 = vsyncpa [#allocation4 + $0x1], 0 }
   0x2   :  { %13 = vsyncpa [#allocation7], 0 }
   0x3   :  { %14 = vsyncpa [#allocation5], 0 }
   0x4   :  { %16 = vsyncpa [#allocation5 + $0x1], 0 }
   0x5   :  { %17 = vsyncpa [#allocation10], 0 }
   0x6   :  { %19 = vsyncpa [#allocation10 + $0x1], 0  ;;  %s8331_s15 = smov 0   ;;  %s8333_s16 = smov 0  }
   0x7   :  { %s8335_s17 = smov 0   ;;  %s8337_s18 = smov 0  }
   0x8 LB: > { %s8352_s19 = sadd.s32 4294967295, %s8295_s18   ;;  %s6764_s20 = sadd.s32 4294967294, %s8295_s18   ;;  %s8295_s18 = sphi %s8337_s18, %s10053_s18   ;;  %s8291_s17 = sphi %s8335_s17, %s10052_s17   ;;  %s8287_s16 = sphi %s8333_s16, %s10051_s16   ;;  %s8283_s15 = sphi %s8331_s15, %s10050_s15  }
   0x9   : > { %p45_p0 = scmp.ne.s32.totalorder %s8287_s16, %s8283_s15  ;;  %p10024_p1 = scmp.eq.s32.totalorder %s8352_s19, 0 }
   0xa   : > { %p117_p3 = scmp.eq.s32.totalorder %s6764_s20, 1  ;;  %p6765_p5 = scmp.ge.s32.totalorder %s8295_s18, 1 }
   0xb   : > { %p8361_p4 = por %p10024_p1, %p45_p0  ;;  %p150_p7 = scmp.lt.s32.totalorder %s8295_s18, 3 }
   0xc   : > { %p8366_p6 = por %p117_p3, %p45_p0  ;;  %s8297_s24 = smov [#allocation6]  }
   0xd   : > { %s10027_s21 = scalar_select %p8361_p4, 1, 0 }
   0xe   : > { %s10028_s22 = scalar_select %p8366_p6, 1, 0 }
   0xf   : > { %p8371_p8 = pnand %p6765_p5, %p150_p7  ;;  %s162_s25 = sshll.u32 %s8297_s24, 4  ;;  %s8375_s25 = int_to_ptr.vmem [resolvable:$true] %s162_s25 }
  0x10   : > { %s8387_s27 = sadd.s32 1, %s8295_s18   ;;  %s32_s28 = sadd.s32 1, %s8291_s17 }
  0x11   : > { %s10029_s23 = scalar_select %p8371_p8, 1, 0 }
  0x12   : > { %p7725_p9 = pneg %p8371_p8  ;;  %s29_s29 = ssub.s32 %s8295_s18, %s8387_s27 }
  0x13   : > { %s8135_s6 = scalar_lea.hbm %s10020_s1, 18432 }
  0x14   : > { %p8382_p11 = pnand %p7725_p9, %p10024_p1  ;;  %p8136_p12 = scmp.ne.s32.totalorder %s10020_s1, %s8135_s6 }
  0x15   : > { %p8142_p5 = scmp.lt.u32.totalorder %s8135_s6, %s10020_s1 }
  0x16   : > { %p8137_p13 = pneg %p8382_p11 }
  0x18   : > { %p8138_p0 = pnand %p8137_p13, %p8136_p12 }
  0x1a   : > { %p8139_p3 = pneg %p8138_p0 }
  0x1c   : > { %p8144_p7 = pnand %p8142_p5, %p8139_p3 }
  0x1e   : > { %8147 = shalt.err (!%p8144_p7)
}
  0x1f   : > { %s8148_s11 = scalar_lea.vmem %s8375_s25, 18432  ;;  %p8156_p2 = scmp.lt.s32.totalorder %s8375_s25, %s8375_s25 }
  0x20   : > { %p8149_p9 = scmp.ne.s32.totalorder %s8375_s25, %s8148_s11  ;;  %p8157_p6 = scmp.lt.s32.totalorder %s8148_s11, %s8148_s11 }
  0x22   : > { %p8151_p10 = pnand %p8149_p9, %p8137_p13  ;;  %p8158_p4 = por %p8157_p6, %p8156_p2 }
  0x24   : > { %p8152_p1 = pneg %p8151_p10 }
  0x26   : > { %p8159_p8 = pnand %p8158_p4, %p8152_p1 }
  0x28   : > { %8162 = shalt.err (!%p8159_p8)
}
  0x29   : > { %s8298_s12 = smov 128   ;;  %s8299_s13 = smov 8  }
  0x2a   : > { %7728 = dma.hbm_to_vmem [thread:$0]  (!%p8382_p11), %s10020_s1, 18432, %s8375_s25, [#allocation7], %s8298_s12, %s8298_s12, %s8299_s13  }
  0x2b   : > { %p30_p1 = scmp.eq.s32.totalorder %s29_s29, 0  ;;  %p39_p2 = scmp.ne.s32.totalorder %s8291_s17, %s8287_s16 }
  0x2c   : > { %p40_p4 = scmp.eq.s32.totalorder %s8295_s18, 0  ;;  %p7741_p6 = scmp.lt.s32.totalorder %s8295_s18, 2 }
  0x2d   : > { %s8421_s24 = scalar_select %p30_p1, %s8291_s17, %s32_s28  }
  0x2e   : > { %p41_p8 = por %p40_p4, %p39_p2  ;;  %p10031_p10 = scmp.eq.s32.totalorder %s8352_s19, 1 }
  0x2f   : > { %s179_s26 = sand.u32 1, %s8291_s17   ;;  %s7152_s5 = sshll.u32 %s8295_s18, 12 }
  0x30   : > { %p8425_p12 = por %p10031_p10, %p39_p2  ;;  %s6768_s6 = sshll.u32 %s179_s26, 8 }
  0x31   : > { %s8434_s9 = scalar_lea.hbm %s10019_s0, %s7152_s5  ;;  %s183_s25 = scalar_lea.vmem [#allocation3], %s6768_s6 }
  0x32   : > { %s190_s28 = sshll.u32 %s183_s25, 4  ;;  %p8436_p11 = pnand %p7741_p6, %p41_p8  ;;  %s8440_s28 = int_to_ptr.vmem [resolvable:$true] %s190_s28 }
  0x33   : > { %s8442_s10 = scalar_lea.sflag [#allocation4], %s179_s26  ;;  %s8163_s11 = scalar_lea.hbm %s8434_s9, 4096 }
  0x34   : > { %p8164_p13 = scmp.ne.s32.totalorder %s8434_s9, %s8163_s11  ;;  %p8165_p0 = pneg %p8436_p11 }
  0x35   : > { %s8168_s5 = scalar_lea.hbm %s10019_s0, 8192  ;;  %p8169_p7 = scmp.lt.u32.totalorder %s8434_s9, %s10019_s0 }
  0x36   : > { %p8166_p3 = pnand %p8165_p0, %p8164_p13  ;;  %p8170_p9 = scmp.lt.u32.totalorder %s8168_s5, %s8163_s11 }
  0x37   : > { %p8172_p2 = scmp.lt.u32.totalorder %s8163_s11, %s8434_s9 }
  0x38   : > { %p8167_p5 = pneg %p8166_p3  ;;  %p8171_p1 = por %p8170_p9, %p8169_p7 }
  0x3a   : > { %p8173_p4 = por %p8172_p2, %p8171_p1 }
  0x3c   : > { %p8174_p6 = pnand %p8173_p4, %p8167_p5 }
  0x3e   : > { %8177 = shalt.err (!%p8174_p6)
}
  0x3f   : > { %s8178_s26 = scalar_lea.vmem %s8440_s28, 4096  ;;  %s8300_s8 = smov [#allocation3]  }
  0x40   : > { %p8179_p8 = scmp.ne.s32.totalorder %s8440_s28, %s8178_s26  ;;  %s8183_s25 = sshll.u32 %s8300_s8, 4  ;;  %s8184_s25 = int_to_ptr.vmem [resolvable:$false] %s8183_s25 }
  0x41   : > { %s8185_s14 = scalar_lea.vmem %s8184_s25, 8192  ;;  %p8186_p3 = scmp.lt.s32.totalorder %s8440_s28, %s8184_s25 }
  0x42   : > { %p8181_p10 = pnand %p8179_p8, %p8165_p0  ;;  %p8187_p7 = scmp.lt.s32.totalorder %s8185_s14, %s8178_s26 }
  0x44   : > { %p8182_p13 = pneg %p8181_p10  ;;  %p8188_p9 = por %p8187_p7, %p8186_p3 }
  0x46   : > { %p8189_p1 = pnand %p8188_p9, %p8182_p13 }
  0x48   : > { %8192 = shalt.err (!%p8189_p1)
}
  0x49   : > { %7732 = dma.hbm_to_vmem [thread:$0]  (!%p8436_p11), %s8434_s9, 4096, %s8440_s28, %s8442_s10, %s8298_s12, %s8298_s12, %s8299_s13  }
  0x4a   : > { %p10034_p0 = scmp.ne.s32.totalorder %s10029_s23, 0 }
  0x4b   : > { %s8476_s11 = sand.u32 (!%p10034_p0), 1, %s8287_s16   ;;  %p10035_p5 = scmp.ne.s32.totalorder (!%p10034_p0), %s10027_s21, 0 }
  0x4c   : > { %202 = sbr.rel (%p10034_p0) target bundleno = 1012 (0x3f4), region = 32  ;;  %s8479_s20 = sshll.u32 (!%p10034_p0), %s8476_s11, 8 }
  0x4d   : > { %s205_s29 = scalar_lea.sflag (!%p10034_p0), [#allocation4], %s8476_s11  ;;  %s8483_s5 = scalar_lea.vmem (!%p10034_p0), [#allocation3], %s8479_s20 }
  0x53   : > { %8266 = dma.done.wait (%p10035_p5), %s205_s29, 4096  }
  0x54   : > { %8268 = vsyncadd (%p10035_p5), %s205_s29, 4294963200  ;;  %p10036_p11 = scmp.eq.s32.totalorder %s8352_s19, 0 }
  0x56   : > { %8270 = dma.done.wait (%p10036_p11), [#allocation7], 18432   ;;  %p10037_p2 = pmov %p10036_p11 }
  0x57   : > { %v8301_v0 = vmov 0   ;;  %v7782_v1 = vld [vmem:[#allocation6 + $0x84] ss:$8 sps:$4 sm:$0xff]   ;;  %v7786_v3 = vld [vmem:[#allocation6 + $0x80] ss:$8 sps:$4 sm:$0xff]   ;;  %vm749_vm5 = vcmask 1043456  }
  0x58   : > { %8272 = vsyncadd (%p10037_p2), [#allocation7], 4294948864  ;;  %1510 = vmatprep.mubr.bf16.mxu1 %v8301_v0  ;;  %243 = vst [vmem:[#allocation2] sm:$0xf] %v8301_v0  ;;  %3728 = vmatprep.mubr.bf16.mxu0 %v8301_v0  ;;  %v7784_v2 = vld [vmem:[#allocation6 + $0x204] ss:$8 sps:$4 sm:$0xff]  }
  0x59   : > { %244 = vst [vmem:[#allocation2 + $0x4] sm:$0xf] %v8301_v0  ;;  %245 = vst [vmem:[#allocation2 + $0x8] sm:$0x1] %v8301_v0  ;;  %1478 = vmatprep.subr.bf16.mxu1 %v7782_v1  ;;  %v7787_v4 = vld [vmem:[#allocation6 + $0x200] ss:$8 sps:$4 sm:$0xff]   ;;  %3696 = vmatprep.subr.bf16.mxu0 %v7784_v2 }
  0x5a   : > { %246 = vst [vmem:[#allocation2 + $0xc] sm:$0xf] %v8301_v0  ;;  %247 = vst [vmem:[#allocation2 + $0x10] sm:$0xf] %v8301_v0  ;;  %v7788_v5 = vld [vmem:[#allocation6 + $0x94] ss:$8 sps:$4 sm:$0xff]   ;;  %1479 = vmatpush1.bf16.msra.mxu1 %v7786_v3  ;;  %3697 = vmatpush1.bf16.msra.mxu0 %v7787_v4 }
  0x5b   : > { %248 = vst [vmem:[#allocation2 + $0x14] sm:$0x1] %v8301_v0  ;;  %249 = vst [vmem:[#allocation2 + $0x18] sm:$0xf] %v8301_v0  ;;  %v7790_v6 = vld [vmem:[#allocation6 + $0x214] ss:$8 sps:$4 sm:$0xff]   ;;  %1480 = vmatprep.subr.bf16.mxu1 %v7788_v5 }
  0x5c   : > { %250 = vst [vmem:[#allocation2 + $0x1c] sm:$0xf] %v8301_v0  ;;  %251 = vst [vmem:[#allocation2 + $0x20] sm:$0x1] %v8301_v0  ;;  %v7792_v7 = vld [vmem:[#allocation6 + $0x90] ss:$8 sps:$4 sm:$0xff]   ;;  %3698 = vmatprep.subr.bf16.mxu0 %v7790_v6 }
  0x5d   : > { %252 = vst [vmem:[#allocation2 + $0x24] sm:$0xf] %v8301_v0  ;;  %253 = vst [vmem:[#allocation2 + $0x28] sm:$0xf] %v8301_v0  ;;  %v7793_v8 = vld [vmem:[#allocation6 + $0x210] ss:$8 sps:$4 sm:$0xff]  }
  0x5e   : > { %254 = vst [vmem:[#allocation2 + $0x2c] sm:$0x1] %v8301_v0  ;;  %255 = vst [vmem:[#allocation2 + $0x30] sm:$0xf] %v8301_v0  ;;  %v7794_v9 = vld [vmem:[#allocation6 + $0xa4] ss:$8 sps:$4 sm:$0xff]   ;;  %1481 = vmatpush1.bf16.msra.mxu1 %v7792_v7  ;;  %3699 = vmatpush1.bf16.msra.mxu0 %v7793_v8 }
  0x5f   : > { %256 = vst [vmem:[#allocation2 + $0x34] sm:$0xf] %v8301_v0  ;;  %257 = vst [vmem:[#allocation2 + $0x38] sm:$0x1] %v8301_v0  ;;  %v7796_v10 = vld [vmem:[#allocation6 + $0x224] ss:$8 sps:$4 sm:$0xff]   ;;  %1482 = vmatprep.subr.bf16.mxu1 %v7794_v9 }
  0x60   : > { %258 = vst [vmem:[#allocation2 + $0x3c] sm:$0xf] %v8301_v0  ;;  %259 = vst [vmem:[#allocation2 + $0x40] sm:$0xf] %v8301_v0  ;;  %v7798_v11 = vld [vmem:[#allocation6 + $0xa0] ss:$8 sps:$4 sm:$0xff]   ;;  %3700 = vmatprep.subr.bf16.mxu0 %v7796_v10 }
  0x61   : > { %260 = vst [vmem:[#allocation2 + $0x44] sm:$0x1] %v8301_v0  ;;  %261 = vst [vmem:[#allocation2 + $0x48] sm:$0xf] %v8301_v0  ;;  %v7799_v12 = vld [vmem:[#allocation6 + $0x220] ss:$8 sps:$4 sm:$0xff]  }
  0x62   : > { %262 = vst [vmem:[#allocation2 + $0x4c] sm:$0xf] %v8301_v0  ;;  %263 = vst [vmem:[#allocation2 + $0x50] sm:$0x1] %v8301_v0  ;;  %v7800_v13 = vld [vmem:[#allocation6 + $0xb4] ss:$8 sps:$4 sm:$0xff]   ;;  %1483 = vmatpush1.bf16.msra.mxu1 %v7798_v11  ;;  %3701 = vmatpush1.bf16.msra.mxu0 %v7799_v12 }
  0x63   : > { %264 = vst [vmem:[#allocation2 + $0x54] sm:$0xf] %v8301_v0  ;;  %265 = vst [vmem:[#allocation2 + $0x58] sm:$0xf] %v8301_v0  ;;  %v7802_v14 = vld [vmem:[#allocation6 + $0x234] ss:$8 sps:$4 sm:$0xff]   ;;  %1484 = vmatprep.subr.bf16.mxu1 %v7800_v13 }
  0x64   : > { %266 = vst [vmem:[#allocation2 + $0x5c] sm:$0x1] %v8301_v0  ;;  %267 = vst [vmem:[#allocation2 + $0x60] sm:$0xf] %v8301_v0  ;;  %v7804_v15 = vld [vmem:[#allocation6 + $0xb0] ss:$8 sps:$4 sm:$0xff]   ;;  %3702 = vmatprep.subr.bf16.mxu0 %v7802_v14 }
  0x65   : > { %268 = vst [vmem:[#allocation2 + $0x64] sm:$0xf] %v8301_v0  ;;  %269 = vst [vmem:[#allocation2 + $0x68] sm:$0x1] %v8301_v0  ;;  %v7805_v16 = vld [vmem:[#allocation6 + $0x230] ss:$8 sps:$4 sm:$0xff]  }
  0x66   : > { %270 = vst [vmem:[#allocation2 + $0x6c] sm:$0xf] %v8301_v0  ;;  %271 = vst [vmem:[#allocation2 + $0x70] sm:$0xf] %v8301_v0  ;;  %v7806_v17 = vld [vmem:[#allocation6 + $0xc4] ss:$8 sps:$4 sm:$0xff]   ;;  %1485 = vmatpush1.bf16.msra.mxu1 %v7804_v15  ;;  %3703 = vmatpush1.bf16.msra.mxu0 %v7805_v16 }
  0x67   : > { %272 = vst [vmem:[#allocation2 + $0x74] sm:$0x1] %v8301_v0  ;;  %273 = vst [vmem:[#allocation2 + $0x78] sm:$0xf] %v8301_v0  ;;  %v7808_v18 = vld [vmem:[#allocation6 + $0x244] ss:$8 sps:$4 sm:$0xff]   ;;  %1486 = vmatprep.subr.bf16.mxu1 %v7806_v17 }
  0x68   : > { %274 = vst [vmem:[#allocation2 + $0x7c] sm:$0xf] %v8301_v0  ;;  %275 = vst [vmem:[#allocation2 + $0x80] sm:$0x1] %v8301_v0  ;;  %v7810_v19 = vld [vmem:[#allocation6 + $0xc0] ss:$8 sps:$4 sm:$0xff]   ;;  %3704 = vmatprep.subr.bf16.mxu0 %v7808_v18 }
  0x69   : > { %276 = vst [vmem:[#allocation2 + $0x84] sm:$0xf] %v8301_v0  ;;  %277 = vst [vmem:[#allocation2 + $0x88] sm:$0xf] %v8301_v0  ;;  %v7811_v20 = vld [vmem:[#allocation6 + $0x240] ss:$8 sps:$4 sm:$0xff]  }
  0x6a   : > { %278 = vst [vmem:[#allocation2 + $0x8c] sm:$0x1] %v8301_v0  ;;  %279 = vst [vmem:[#allocation2 + $0x90] sm:$0xf] %v8301_v0  ;;  %v7812_v21 = vld [vmem:[#allocation6 + $0xd4] ss:$8 sps:$4 sm:$0xff]   ;;  %1487 = vmatpush1.bf16.msra.mxu1 %v7810_v19  ;;  %3705 = vmatpush1.bf16.msra.mxu0 %v7811_v20 }
  0x6b   : > { %280 = vst [vmem:[#allocation2 + $0x94] sm:$0xf] %v8301_v0  ;;  %281 = vst [vmem:[#allocation2 + $0x98] sm:$0x1] %v8301_v0  ;;  %vm930_vm0 = vsmask.f32 3328  ;;  %1488 = vmatprep.subr.bf16.mxu1 %v7812_v21 }
  0x6c   : > { %282 = vst [vmem:[#allocation2 + $0x9c] sm:$0xf] %v8301_v0  ;;  %283 = vst [vmem:[#allocation2 + $0xa0] sm:$0xf] %v8301_v0  ;;  %v7814_v22 = vld [vmem:[#allocation6 + $0x254] ss:$8 sps:$4 sm:$0xff]  }
  0x6d   : > { %284 = vst [vmem:[#allocation2 + $0xa4] sm:$0x1] %v8301_v0  ;;  %285 = vst [vmem:[#allocation2 + $0xa8] sm:$0xf] %v8301_v0  ;;  %vm931_vm1 = vsmask.f32 7440  ;;  %3706 = vmatprep.subr.bf16.mxu0 %v7814_v22 }
  0x6e   : > { %286 = vst [vmem:[#allocation2 + $0xac] sm:$0xf] %v8301_v0  ;;  %287 = vst [vmem:[#allocation2 + $0xb0] sm:$0x1] %v8301_v0  ;;  %vm425_vm2 = vsmask.f32 256 }
  0x6f   : > { %288 = vst [vmem:[#allocation2 + $0xb4] sm:$0xf] %v8301_v0  ;;  %289 = vst [vmem:[#allocation2 + $0xb8] sm:$0xf] %v8301_v0  ;;  %vm426_vm3 = vsmask.f32 4368 }
  0x70   : > { %290 = vst [vmem:[#allocation2 + $0xbc] sm:$0x1] %v8301_v0  ;;  %291 = vst [vmem:[#allocation2 + $0xc0] sm:$0xf] %v8301_v0  ;;  %v7816_v23 = vld [vmem:[#allocation6 + $0xd0] ss:$8 sps:$4 sm:$0xff]  }
  0x71   : > { %292 = vst [vmem:[#allocation2 + $0xc4] sm:$0xf] %v8301_v0  ;;  %293 = vst [vmem:[#allocation2 + $0xc8] sm:$0x1] %v8301_v0  ;;  %vm750_vm4 = vsmask.f32 7938  ;;  %1489 = vmatpush1.bf16.msra.mxu1 %v7816_v23 }
  0x72   : > { %294 = vst [vmem:[#allocation2 + $0xcc] sm:$0xf] %v8301_v0  ;;  %295 = vst [vmem:[#allocation2 + $0xd0] sm:$0xf] %v8301_v0  ;;  %v7817_v24 = vld [vmem:[#allocation6 + $0x250] ss:$8 sps:$4 sm:$0xff]  }
  0x73   : > { %296 = vst [vmem:[#allocation2 + $0xd4] sm:$0x1] %v8301_v0  ;;  %v7818_v25 = vld [vmem:[#allocation6 + $0xe4] ss:$8 sps:$4 sm:$0xff]   ;;  %v866_v27 = vld [vmem:[#allocation2] sm:$0xf]  ;;  %3707 = vmatpush1.bf16.msra.mxu0 %v7817_v24  ;;  %vm8553_vm6 = vmor %vm930_vm0, %vm931_vm1 }
  0x74   : > { %v7820_v26 = vld [vmem:[#allocation6 + $0x264] ss:$8 sps:$4 sm:$0xff]   ;;  %v7822_v29 = vld [vmem:[#allocation6 + $0xe0] ss:$8 sps:$4 sm:$0xff]   ;;  %v914_v30 = vld [vmem:[#allocation2 + $0x8] sm:$0x1]  ;;  %1490 = vmatprep.subr.bf16.mxu1 %v7818_v25 }
  0x75   : > { %v867_v28 = vld [vmem:[#allocation2 + $0x4] sm:$0xf]  ;;  %v934_v31 = vshrl.u32 %v866_v27, 16  ;;  %v937_v32 = vshll.u32 %v866_v27, 16  ;;  %v7823_v35 = vld [vmem:[#allocation6 + $0x260] ss:$8 sps:$4 sm:$0xff]   ;;  %3708 = vmatprep.subr.bf16.mxu0 %v7820_v26  ;;  %1491 = vmatpush1.bf16.msra.mxu1 %v7822_v29  ;;  %vm8560_vm8 = vmor %vm425_vm2, %vm426_vm3 }
  0x76   : > { %v943_v33 = vshll.u32 %v867_v28, 16  ;;  %v947_v34 = vshrl.u32 %v867_v28, 16  ;;  %v953_v36 = vshll.u32 %v914_v30, 16  ;;  %v7824_v37 = vld [vmem:[#allocation6 + $0xf4] ss:$8 sps:$4 sm:$0xff]   ;;  %v297_v44 = vld [vmem:[%s8483_s5] sm:$0xff]  ;;  %vm8567_vm9 = vmand %vm749_vm5, %vm750_vm4 }
  0x77   : > { %v936_v38 = vrot.slane %v934_v31, 4  ;;  %v939_v39 = vrot.slane %v937_v32, 5  ;;  %v7826_v42 = vld [vmem:[#allocation6 + $0x274] ss:$8 sps:$4 sm:$0xff]   ;;  %v298_v45 = vld [vmem:[%s8483_s5 + $0x8] sm:$0xff]  ;;  %v7153_v49 = vpack.c.bf16 %v297_v44, %v297_v44  ;;  %vm756_vm7 = vcmask 1040384   ;;  %3709 = vmatpush1.bf16.msra.mxu0 %v7823_v35  ;;  %1492 = vmatprep.subr.bf16.mxu1 %v7824_v37 }
  0x78   : > { %v945_v40 = vrot.slane %v943_v33, 5  ;;  %v949_v41 = vrot.slane %v947_v34, 4  ;;  %v955_v43 = vrot.slane %v953_v36, 5  ;;  %v7154_v50 = vpack.c.bf16 %v298_v45, %v298_v45  ;;  %v7828_v51 = vld [vmem:[#allocation6 + $0xf0] ss:$8 sps:$4 sm:$0xff]   ;;  %3710 = vmatprep.subr.bf16.mxu0 %v7826_v42  ;;  %v301_v13 = vld [vmem:[%s8483_s5 + $0x20] sm:$0xff]  ;;  %vm8578_vm10 = vmand %vm756_vm7, %vm425_vm2 }
  0x79   : > { %v940_v47 = vor.u32 %v939_v39, %v936_v38  ;;  %v7829_v52 = vld [vmem:[#allocation6 + $0x270] ss:$8 sps:$4 sm:$0xff]   ;;  %v429_v57 = vshrl.u32 %v7153_v49, 16  ;;  %v432_v58 = vshll.u32 %v7153_v49, 16  ;;  %v7832_v60 = vld [vmem:[#allocation6 + $0x4] ss:$8 sps:$4 sm:$0xff]   ;;  %1493 = vmatpush1.bf16.msra.mxu1 %v7828_v51  ;;  %v7157_v25 = vpack.c.bf16 %v301_v13, %v301_v13 }
  0x7a   : > { %v950_v48 = vor.u32 %v949_v41, %v945_v40  ;;  %v299_v53 = vld [vmem:[%s8483_s5 + $0x10] sm:$0xff]  ;;  %v300_v59 = vld [vmem:[%s8483_s5 + $0x18] sm:$0xff]  ;;  %v437_v61 = vshrl.u32 %v7154_v50, 16  ;;  %v440_v62 = vshll.u32 %v7154_v50, 16  ;;  %v7835_v1 = vld [vmem:[#allocation6 + $0x284] ss:$8 sps:$4 sm:$0xff]   ;;  %1847 = vmatprep.subr.bf16.mxu1 %v7832_v60 }
  0x7b   : > { %v941_v54 = vrot.slane %v940_v47, 4  ;;  %v7155_v2 = vpack.c.bf16 %v299_v53, %v299_v53  ;;  %v7156_v3 = vpack.c.bf16 %v300_v59, %v300_v59  ;;  %v7830_v6 = vld [vmem:[#allocation6] ss:$8 sps:$4 sm:$0xff]   ;;  %v431_v7 = vrot.slane %v429_v57, 7  ;;  %v752_v8 = vld [vmem:[#allocation2 + $0xc] sm:$0xf]  ;;  %3711 = vmatpush1.bf16.msra.mxu0 %v7829_v52 }
  0x7c   : > { %v951_v55 = vrot.slane %v950_v48, 4  ;;  %v439_v10 = vrot.slane %v437_v61, 7  ;;  %v758_v17 = vld [vmem:[#allocation2 + $0x14] sm:$0x1]  ;;  %v302_v20 = vld [vmem:[%s8483_s5 + $0x28] sm:$0xff]  ;;  %4290 = vmatprep.subr.bf16.mxu0 %v7835_v1  ;;  %v303_v35 = vld [vmem:[%s8483_s5 + $0x30] sm:$0xff] }
  0x7d   : > { %v946_v4 = vsel %vm8553_vm6, %v941_v54, %v945_v40  ;;  %v446_v11 = vshrl.u32 %v7155_v2, 16  ;;  %v449_v12 = vshll.u32 %v7155_v2, 16  ;;  %v434_v14 = vor.u32 %v432_v58, %v431_v7  ;;  %v7841_v24 = vld [vmem:[#allocation6 + $0x14] ss:$8 sps:$4 sm:$0xff]   ;;  %v761_v28 = vld [vmem:[#allocation2 + $0x18] sm:$0xf] }
  0x7e   : > { %v956_v5 = vsel %vm8553_vm6, %v951_v55, %v955_v43  ;;  %v435_v15 = vrot.slane %v431_v7, 4  ;;  %v454_v18 = vshrl.u32 %v7156_v3, 16  ;;  %v457_v19 = vshll.u32 %v7156_v3, 16  ;;  %v765_v34 = vld [vmem:[#allocation2 + $0x20] sm:$0x1]  ;;  %v304_v41 = vld [vmem:[%s8483_s5 + $0x38] sm:$0xff] }
  0x7f   : > { %v6808_v9 = vcombine.low %v946_v4, %v956_v5  ;;  %v442_v21 = vor.u32 %v440_v62, %v439_v10  ;;  %v444_v22 = vrot.slane %v439_v10, 4  ;;  %v448_v23 = vrot.slane %v446_v11, 7  ;;  %v7839_v38 = vld [vmem:[#allocation6 + $0x10] ss:$8 sps:$4 sm:$0xff]   ;;  %v768_v50 = vld [vmem:[#allocation2 + $0x24] sm:$0xf] }
  0x80   : > { %v753_v26 = vsel %vm8567_vm9, %v434_v14, %v752_v8  ;;  %v456_v27 = vrot.slane %v454_v18, 7  ;;  %v7158_v29 = vpack.c.bf16 %v302_v20, %v302_v20  ;;  %v463_v39 = vshrl.u32 %v7157_v25, 16  ;;  %v772_v51 = vld [vmem:[#allocation2 + $0x2c] sm:$0x1]  ;;  %v7848_v55 = vld [vmem:[#allocation6 + $0x20] ss:$8 sps:$4 sm:$0xff]  }
  0x81   : > { %1511 = vmatmul.mubr.bf16.vlgmr.msra.gmra.mrb[0].mxu1 %v6808_v9  ;;  %v443_v30 = vsel %vm8560_vm8, %v435_v15, %v442_v21  ;;  %754 = vst [vmem:[#allocation2 + $0xc] sm:$0xf] %v753_v26  ;;  %v759_v31 = vsel %vm8578_vm10, %v444_v22, %v758_v17  ;;  %v451_v32 = vor.u32 %v449_v12, %v448_v23  ;;  %v452_v33 = vrot.slane %v448_v23, 4  ;;  %v7850_v61 = vld [vmem:[#allocation6 + $0x24] ss:$8 sps:$4 sm:$0xff]   ;;  %s9775_s12 = scalar_lea.vmem [#allocation8], %s8479_s20 }
  0x82   : > { %755 = vst [vmem:[#allocation2 + $0x10] sm:$0xf] %v443_v30  ;;  %760 = vst [vmem:[#allocation2 + $0x14] sm:$0x1] %v759_v31  ;;  %1848 = vmatpush1.bf16.msra.mxu1 %v7830_v6  ;;  %1520 = vmatprep.mubr.bf16.mxu1 %v8301_v0  ;;  %v459_v36 = vor.u32 %v457_v19, %v456_v27  ;;  %v461_v37 = vrot.slane %v456_v27, 4  ;;  %v466_v40 = vshll.u32 %v7157_v25, 16 }
  0x83   : > { %v762_v42 = vsel %vm8567_vm9, %v451_v32, %v761_v28  ;;  %1849 = vmatprep.subr.bf16.mxu1 %v7841_v24  ;;  %v471_v43 = vshrl.u32 %v7158_v29, 16  ;;  %v474_v44 = vshll.u32 %v7158_v29, 16  ;;  %v8594_v45 = vpack.c.bf16 %v303_v35, %v303_v35  ;;  %v305_v62 = vld [vmem:[%s8483_s5 + $0x40] sm:$0xff]  ;;  %v306_v5 = vld [vmem:[%s8483_s5 + $0x48] sm:$0xff]  ;;  %s9780_s13 = scalar_lea.vmem [#allocation9], %s8479_s20  ;;  %s7185_s9 = sshll.u32 %s8352_s19, 12 }
  0x84   : > { %v460_v47 = vsel %vm8560_vm8, %v452_v33, %v459_v36  ;;  %763 = vst [vmem:[#allocation2 + $0x18] sm:$0xf] %v762_v42  ;;  %v766_v48 = vsel %vm8578_vm10, %v461_v37, %v765_v34  ;;  %v465_v49 = vrot.slane %v463_v39, 7  ;;  %v8600_v52 = vpack.c.bf16 %v304_v41, %v304_v41  ;;  %s6633_s28 = sshll.u32 %s9775_s12, 4  ;;  %s9928_s7 = scalar_lea.hbm %s10022_s3, %s7185_s9  ;;  %s9932_s28 = int_to_ptr.vmem [resolvable:$true] %s6633_s28 }
  0x85   : > { %764 = vst [vmem:[#allocation2 + $0x1c] sm:$0xf] %v460_v47  ;;  %767 = vst [vmem:[#allocation2 + $0x20] sm:$0x1] %v766_v48  ;;  %v473_v53 = vrot.slane %v471_v43, 7  ;;  %v480_v54 = vshrl.u32 %v8594_v45, 16  ;;  %v8614_v10 = vpack.c.bf16 %v305_v62, %v305_v62  ;;  %v8616_v11 = vpack.c.bf16 %v306_v5, %v306_v5  ;;  %s9941_s25 = scalar_lea.hbm %s10023_s4, %s7185_s9 }
  0x86   : > { %v468_v57 = vor.u32 %v466_v40, %v465_v49  ;;  %v469_v58 = vrot.slane %v465_v49, 4  ;;  %1850 = vmatpush1.bf16.msra.mxu1 %v7839_v38  ;;  %v483_v59 = vshll.u32 %v8594_v45, 16  ;;  %v488_v60 = vshrl.u32 %v8600_v52, 16  ;;  %s6649_s19 = sshll.u32 %s9780_s13, 4  ;;  %s6615_s14 = scalar_lea.sflag [#allocation5], %s8476_s11  ;;  %s9943_s19 = int_to_ptr.vmem [resolvable:$true] %s6649_s19 }
  0x87   : > { %v476_v1 = vor.u32 %v474_v44, %v473_v53  ;;  %v478_v2 = vrot.slane %v473_v53, 4  ;;  %v8606_v3 = vrot.slane %v480_v54, 7  ;;  %v491_v4 = vshll.u32 %v8600_v52, 16  ;;  %1851 = vmatprep.subr.bf16.mxu1 %v7850_v61  ;;  %s8193_s20 = scalar_lea.vmem %s9932_s28, 4096  ;;  %s8302_s29 = smov [#allocation8]  }
  0x88   : > { %v3103_v6 = vld [vmem:[#allocation2 + $0xc] sm:$0xf]  ;;  %v769_v8 = vsel %vm8567_vm9, %v468_v57, %v768_v50  ;;  %v8612_v9 = vrot.slane %v488_v60, 7  ;;  %vm2088_vm11 = vcmask 1042432   ;;  %vm2089_vm12 = vcmask 1046532   ;;  %p8194_p4 = scmp.ne.s32.totalorder %s9932_s28, %s8193_s20 }
  0x89   : > { %v868_v7 = vld [vmem:[#allocation2 + $0xc] sm:$0xf]  ;;  %v8618_v12 = vld [vmem:[#allocation2 + $0x10] sm:$0xf]  ;;  %v8620_v13 = vld [vmem:[#allocation2 + $0x14] sm:$0x1]  ;;  %v477_v17 = vsel %vm8560_vm8, %v469_v58, %v476_v1  ;;  %v773_v18 = vsel %vm8578_vm10, %v478_v2, %v772_v51 }
  0x8a   : > { %v3152_v14 = vshrl.u32 %v3103_v6, 16  ;;  %v3155_v15 = vshll.u32 %v3103_v6, 16  ;;  %770 = vst [vmem:[#allocation2 + $0x24] sm:$0xf] %v769_v8  ;;  %v3161_v19 = vshll.u32 %v8618_v12, 16  ;;  %v3165_v20 = vshrl.u32 %v8618_v12, 16  ;;  %1852 = vmatpush1.bf16.msra.mxu1 %v7848_v55  ;;  %vm8763_vm13 = vmor %vm2088_vm11, %vm2089_vm12  ;;  %p8195_p6 = pnand %p8194_p4, %p8425_p12 }
  0x8b   : > { %v3171_v21 = vshll.u32 %v8620_v13, 16  ;;  %v4019_v22 = vrot.slane %v8618_v12, 5  ;;  %v869_v23 = vld [vmem:[#allocation2 + $0x10] sm:$0xf]  ;;  %771 = vst [vmem:[#allocation2 + $0x28] sm:$0xf] %v477_v17 }
  0x8c   : > { %774 = vst [vmem:[#allocation2 + $0x2c] sm:$0x1] %v773_v18  ;;  %v3154_v24 = vrot.slane %v3152_v14, 4  ;;  %v3157_v25 = vrot.slane %v3155_v15, 5  ;;  %v4022_v26 = vrot.slane %v8620_v13, 5  ;;  %v958_v28 = vshrl.u32 %v868_v7, 16  ;;  %p8196_p8 = pneg %p8195_p6 }
  0x8d   : > { %v915_v27 = vld [vmem:[#allocation2 + $0x14] sm:$0x1]  ;;  %v3163_v29 = vrot.slane %v3161_v19, 5  ;;  %v3167_v30 = vrot.slane %v3165_v20, 4  ;;  %v3173_v31 = vrot.slane %v3171_v21, 5  ;;  %v8633_v32 = vrot.slane %v4019_v22, 4 }
  0x8e   : > { %v3106_v33 = vld [vmem:[#allocation2 + $0x18] sm:$0xf]  ;;  %v3158_v34 = vor.u32 %v3157_v25, %v3154_v24  ;;  %v960_v35 = vrot.slane %v958_v28, 4  ;;  %v961_v36 = vshll.u32 %v868_v7, 16  ;;  %v967_v37 = vshll.u32 %v869_v23, 16 }
  0x8f   : > { %v3168_v38 = vor.u32 %v3167_v30, %v3163_v29  ;;  %v971_v39 = vshrl.u32 %v869_v23, 16  ;;  %v977_v40 = vshll.u32 %v915_v27, 16  ;;  %v3107_v41 = vld [vmem:[#allocation2 + $0x1c] sm:$0xf]  ;;  %v3176_v42 = vshrl.u32 %v3106_v33, 16 }
  0x90   : > { %v3159_v43 = vrot.slane %v3158_v34, 4  ;;  %v963_v44 = vrot.slane %v961_v36, 5  ;;  %v969_v47 = vrot.slane %v967_v37, 5  ;;  %v3108_v48 = vld [vmem:[#allocation2 + $0x20] sm:$0x1]  ;;  %v3179_v49 = vshll.u32 %v3106_v33, 16 }
  0x91   : > { %v3169_v50 = vrot.slane %v3168_v38, 4  ;;  %v973_v51 = vrot.slane %v971_v39, 4  ;;  %v979_v53 = vrot.slane %v977_v40, 5  ;;  %v3178_v54 = vrot.slane %v3176_v42, 4  ;;  %v870_v61 = vld [vmem:[#allocation2 + $0x18] sm:$0xf] }
  0x92   : > { %v3164_v55 = vsel %vm8553_vm6, %v3159_v43, %v3163_v29  ;;  %v964_v57 = vor.u32 %v963_v44, %v960_v35  ;;  %v3181_v58 = vrot.slane %v3179_v49, 5  ;;  %v3185_v60 = vshll.u32 %v3107_v41, 16  ;;  %v7833_v1 = vld [vmem:[#allocation6 + $0x280] ss:$8 sps:$4 sm:$0xff]   ;;  %v871_v7 = vld [vmem:[#allocation2 + $0x1c] sm:$0xf] }
  0x93   : > { %v3174_v62 = vsel %vm8553_vm6, %v3169_v50, %v3173_v31  ;;  %v974_v2 = vor.u32 %v973_v51, %v969_v47  ;;  %v3189_v5 = vshrl.u32 %v3107_v41, 16  ;;  %v3195_v6 = vshll.u32 %v3108_v48, 16  ;;  %v7838_v18 = vld [vmem:[#allocation6 + $0x294] ss:$8 sps:$4 sm:$0xff]   ;;  %v916_v23 = vld [vmem:[#allocation2 + $0x20] sm:$0x1] }
  0x94   : > { %v6952_v8 = vcombine.low %v3164_v55, %v3174_v62  ;;  %v965_v14 = vrot.slane %v964_v57, 4  ;;  %v3182_v15 = vor.u32 %v3181_v58, %v3178_v54  ;;  %v3187_v17 = vrot.slane %v3185_v60, 5  ;;  %v3109_v30 = vld [vmem:[#allocation2 + $0x24] sm:$0xf]  ;;  %v7836_v34 = vld [vmem:[#allocation6 + $0x290] ss:$8 sps:$4 sm:$0xff]  }
  0x95   : > { %v975_v19 = vrot.slane %v974_v2, 4  ;;  %v3191_v20 = vrot.slane %v3189_v5, 4  ;;  %v3197_v21 = vrot.slane %v3195_v6, 5  ;;  %v982_v24 = vshrl.u32 %v870_v61, 16  ;;  %v3110_v37 = vld [vmem:[#allocation2 + $0x28] sm:$0xf] }
  0x96   : > { %3729 = vmatmul.mubr.bf16.vlgmr.msra.gmra.mrb[0].mxu0 %v6952_v8  ;;  %v970_v25 = vsel %vm8553_vm6, %v965_v14, %v969_v47  ;;  %v3183_v27 = vrot.slane %v3182_v15, 4  ;;  %v985_v28 = vshll.u32 %v870_v61, 16  ;;  %v991_v29 = vshll.u32 %v871_v7, 16  ;;  %v3111_v42 = vld [vmem:[#allocation2 + $0x2c] sm:$0x1] }
  0x97   : > { %4291 = vmatpush1.bf16.msra.mxu0 %v7833_v1  ;;  %3738 = vmatprep.mubr.bf16.mxu0 %v8301_v0  ;;  %v980_v31 = vsel %vm8553_vm6, %v975_v19, %v979_v53  ;;  %v3192_v33 = vor.u32 %v3191_v20, %v3187_v17  ;;  %v984_v35 = vrot.slane %v982_v24, 4  ;;  %v995_v36 = vshrl.u32 %v871_v7, 16  ;;  %v7844_v43 = vld [vmem:[#allocation6 + $0x2a4] ss:$8 sps:$4 sm:$0xff]   ;;  %v7842_v50 = vld [vmem:[#allocation6 + $0x2a0] ss:$8 sps:$4 sm:$0xff]  }
  0x98   : > { %v6809_v38 = vcombine.low %v970_v25, %v980_v31  ;;  %v3188_v39 = vsel %vm8553_vm6, %v3183_v27, %v3187_v17  ;;  %4292 = vmatprep.subr.bf16.mxu0 %v7838_v18  ;;  %v987_v40 = vrot.slane %v985_v28, 5  ;;  %v993_v41 = vrot.slane %v991_v29, 5  ;;  %v872_v57 = vld [vmem:[#allocation2 + $0x24] sm:$0xf]  ;;  %v7847_v58 = vld [vmem:[#allocation6 + $0x2b4] ss:$8 sps:$4 sm:$0xff]  }
  0x99   : > { %v3193_v44 = vrot.slane %v3192_v33, 4  ;;  %v997_v47 = vrot.slane %v995_v36, 4  ;;  %v1001_v48 = vshll.u32 %v916_v23, 16  ;;  %v3200_v49 = vshrl.u32 %v3109_v30, 16  ;;  %v873_v2 = vld [vmem:[#allocation2 + $0x28] sm:$0xf] }
  0x9a   : > { %1521 = vmatmul.mubr.bf16.gmra.mrb[4].mxu1 %v6809_v38  ;;  %v988_v51 = vor.u32 %v987_v40, %v984_v35  ;;  %v3203_v53 = vshll.u32 %v3109_v30, 16  ;;  %v3209_v54 = vshll.u32 %v3110_v37, 16  ;;  %v3213_v55 = vshrl.u32 %v3110_v37, 16  ;;  %v7857_v5 = vld [vmem:[#allocation6 + $0x30] ss:$8 sps:$4 sm:$0xff]  }
  0x9b   : > { %v3198_v60 = vsel %vm8553_vm6, %v3193_v44, %v3197_v21  ;;  %4293 = vmatpush1.bf16.msra.mxu0 %v7836_v34  ;;  %1530 = vmatprep.mubr.bf16.mxu1 %v8301_v0  ;;  %v998_v61 = vor.u32 %v997_v47, %v993_v41  ;;  %v1003_v62 = vrot.slane %v1001_v48, 5  ;;  %v3202_v1 = vrot.slane %v3200_v49, 4  ;;  %v7859_v15 = vld [vmem:[#allocation6 + $0x34] ss:$8 sps:$4 sm:$0xff]   ;;  %v775_v33 = vld [vmem:[#allocation2 + $0x30] sm:$0xf] }
  0x9c   : > { %v6953_v6 = vcombine.low %v3188_v39, %v3198_v60  ;;  %v989_v7 = vrot.slane %v988_v51, 4  ;;  %v3205_v8 = vrot.slane %v3203_v53, 5  ;;  %v3211_v14 = vrot.slane %v3209_v54, 5  ;;  %4294 = vmatprep.subr.bf16.mxu0 %v7844_v43  ;;  %v917_v24 = vld [vmem:[#allocation2 + $0x2c] sm:$0x1]  ;;  %1853 = vmatprep.subr.bf16.mxu1 %v7859_v15  ;;  %v309_v60 = vld [vmem:[%s8483_s5 + $0x60] sm:$0xff] }
  0x9d   : > { %v999_v17 = vrot.slane %v998_v61, 4  ;;  %v3215_v18 = vrot.slane %v3213_v55, 4  ;;  %v3219_v19 = vshll.u32 %v3111_v42, 16  ;;  %v1006_v20 = vshrl.u32 %v872_v57, 16  ;;  %v7845_v34 = vld [vmem:[#allocation6 + $0x2b0] ss:$8 sps:$4 sm:$0xff]   ;;  %1854 = vmatpush1.bf16.msra.mxu1 %v7857_v5 }
  0x9e   : > { %3739 = vmatmul.mubr.bf16.gmra.mrb[4].mxu0 %v6953_v6  ;;  %v994_v21 = vsel %vm8553_vm6, %v989_v7, %v993_v41  ;;  %v3206_v23 = vor.u32 %v3205_v8, %v3202_v1  ;;  %v1009_v25 = vshll.u32 %v872_v57, 16  ;;  %v1015_v27 = vshll.u32 %v873_v2, 16  ;;  %v779_v39 = vld [vmem:[#allocation2 + $0x38] sm:$0x1]  ;;  %v7853_v40 = vld [vmem:[#allocation6 + $0x2c4] ss:$8 sps:$4 sm:$0xff]  }
  0x9f   : > { %3748 = vmatprep.mubr.bf16.mxu0 %v8301_v0  ;;  %v1004_v28 = vsel %vm8553_vm6, %v999_v17, %v1003_v62  ;;  %v3216_v29 = vor.u32 %v3215_v18, %v3211_v14  ;;  %v3221_v30 = vrot.slane %v3219_v19, 5  ;;  %4295 = vmatpush1.bf16.msra.mxu0 %v7842_v50  ;;  %v1008_v31 = vrot.slane %v1006_v20, 4  ;;  %v307_v47 = vld [vmem:[%s8483_s5 + $0x50] sm:$0xff]  ;;  %v7851_v53 = vld [vmem:[#allocation6 + $0x2c0] ss:$8 sps:$4 sm:$0xff]  }
  0xa0   : > { %v6810_v35 = vcombine.low %v994_v21, %v1004_v28  ;;  %v3207_v36 = vrot.slane %v3206_v23, 4  ;;  %v1011_v37 = vrot.slane %v1009_v25, 5  ;;  %v8654_v38 = vrot.slane %v1015_v27, 5  ;;  %4296 = vmatprep.subr.bf16.mxu0 %v7847_v58  ;;  %v7856_v54 = vld [vmem:[#allocation6 + $0x2d4] ss:$8 sps:$4 sm:$0xff]   ;;  %v310_v7 = vld [vmem:[%s8483_s5 + $0x68] sm:$0xff] }
  0xa1   : > { %v3217_v41 = vrot.slane %v3216_v29, 4  ;;  %v1019_v42 = vshrl.u32 %v873_v2, 16  ;;  %v1025_v43 = vshll.u32 %v917_v24, 16  ;;  %v485_v44 = vor.u32 %v483_v59, %v8606_v3  ;;  %v308_v58 = vld [vmem:[%s8483_s5 + $0x58] sm:$0xff]  ;;  %v7866_v62 = vld [vmem:[#allocation6 + $0x40] ss:$8 sps:$4 sm:$0xff]  }
  0xa2   : > { %1531 = vmatmul.mubr.bf16.gmra.mrb[8].mxu1 %v6810_v35  ;;  %v3212_v48 = vsel %vm8553_vm6, %v3207_v36, %v3211_v14  ;;  %v1012_v49 = vor.u32 %v1011_v37, %v1008_v31  ;;  %v486_v50 = vrot.slane %v8606_v3, 4  ;;  %v493_v51 = vor.u32 %v491_v4, %v8612_v9  ;;  %v7868_v1 = vld [vmem:[#allocation6 + $0x44] ss:$8 sps:$4 sm:$0xff]   ;;  %v7854_v21 = vld [vmem:[#allocation6 + $0x2d0] ss:$8 sps:$4 sm:$0xff]  }
  0xa3   : > { %v3222_v45 = vsel %vm8553_vm6, %v3217_v41, %v3221_v30  ;;  %1540 = vmatprep.mubr.bf16.mxu1 %v8301_v0  ;;  %v1021_v59 = vrot.slane %v1019_v42, 4  ;;  %v1027_v55 = vrot.slane %v1025_v43, 5  ;;  %v495_v57 = vrot.slane %v8612_v9, 4  ;;  %4297 = vmatpush1.bf16.msra.mxu0 %v7845_v34  ;;  %v782_v20 = vld [vmem:[#allocation2 + $0x3c] sm:$0xf] }
  0xa4   : > { %v6954_v3 = vcombine.low %v3212_v48, %v3222_v45  ;;  %v1013_v61 = vrot.slane %v1012_v49, 4  ;;  %v494_v52 = vsel %vm8560_vm8, %v486_v50, %v493_v51  ;;  %v776_v4 = vsel %vm8567_vm9, %v485_v44, %v775_v33  ;;  %4298 = vmatprep.subr.bf16.mxu0 %v7853_v40  ;;  %1855 = vmatprep.subr.bf16.mxu1 %v7868_v1  ;;  %v7862_v29 = vld [vmem:[#allocation6 + $0x2e4] ss:$8 sps:$4 sm:$0xff]   ;;  %v7860_v40 = vld [vmem:[#allocation6 + $0x2e0] ss:$8 sps:$4 sm:$0xff]  }
  0xa5   : > { %v1022_v2 = vor.u32 %v1021_v59, %v8654_v38  ;;  %777 = vst [vmem:[#allocation2 + $0x30] sm:$0xf] %v776_v4  ;;  %778 = vst [vmem:[#allocation2 + $0x34] sm:$0xf] %v494_v52  ;;  %v780_v9 = vsel %vm8578_vm10, %v495_v57, %v779_v39  ;;  %v497_v5 = vshrl.u32 %v8614_v10, 16  ;;  %v500_v6 = vshll.u32 %v8614_v10, 16  ;;  %1856 = vmatpush1.bf16.msra.mxu1 %v7866_v62 }
  0xa6   : > { %3749 = vmatmul.mubr.bf16.gmra.mrb[8].mxu0 %v6954_v3  ;;  %v1018_v8 = vsel %vm8553_vm6, %v1013_v61, %v8654_v38  ;;  %781 = vst [vmem:[#allocation2 + $0x38] sm:$0x1] %v780_v9  ;;  %v505_v14 = vshrl.u32 %v8616_v11, 16  ;;  %v508_v15 = vshll.u32 %v8616_v11, 16  ;;  %v7163_v17 = vpack.c.bf16 %v307_v47, %v307_v47  ;;  %v786_v33 = vld [vmem:[#allocation2 + $0x44] sm:$0x1] }
  0xa7   : > { %3758 = vmatprep.mubr.bf16.mxu0 %v8301_v0  ;;  %v1023_v18 = vrot.slane %v1022_v2, 4  ;;  %v499_v19 = vrot.slane %v497_v5, 7  ;;  %4299 = vmatpush1.bf16.msra.mxu0 %v7851_v53  ;;  %v7164_v10 = vpack.c.bf16 %v308_v58, %v308_v58  ;;  %v8688_v23 = vpack.c.bf16 %v309_v60, %v309_v60  ;;  %v789_v39 = vld [vmem:[#allocation2 + $0x48] sm:$0xf]  ;;  %v7865_v47 = vld [vmem:[#allocation6 + $0x2f4] ss:$8 sps:$4 sm:$0xff]  }
  0xa8   : > { %v507_v24 = vrot.slane %v505_v14, 7  ;;  %v514_v25 = vshrl.u32 %v7163_v17, 16  ;;  %v517_v27 = vshll.u32 %v7163_v17, 16  ;;  %4300 = vmatprep.subr.bf16.mxu0 %v7856_v54  ;;  %v8690_v28 = vpack.c.bf16 %v310_v7, %v310_v7  ;;  %v7872_v45 = vld [vmem:[#allocation6 + $0x50] ss:$8 sps:$4 sm:$0xff]  }
  0xa9   : > { %v1028_v11 = vsel %vm8553_vm6, %v1023_v18, %v1027_v55  ;;  %v502_v30 = vor.u32 %v500_v6, %v499_v19  ;;  %v503_v31 = vrot.slane %v499_v19, 4  ;;  %v522_v34 = vshrl.u32 %v7164_v10, 16  ;;  %v7863_v3 = vld [vmem:[#allocation6 + $0x2f0] ss:$8 sps:$4 sm:$0xff]   ;;  %v7871_v19 = vld [vmem:[#allocation6 + $0x304] ss:$8 sps:$4 sm:$0xff]  }
  0xaa   : > { %v6811_v35 = vcombine.low %v1018_v8, %v1028_v11  ;;  %v510_v36 = vor.u32 %v508_v15, %v507_v24  ;;  %v512_v37 = vrot.slane %v507_v24, 4  ;;  %v8694_v38 = vrot.slane %v514_v25, 7  ;;  %v7874_v8 = vld [vmem:[#allocation6 + $0x54] ss:$8 sps:$4 sm:$0xff]  }
  0xab   : > { %v783_v41 = vsel %vm8567_vm9, %v502_v30, %v782_v20  ;;  %v8698_v42 = vrot.slane %v522_v34, 7  ;;  %v525_v43 = vshll.u32 %v7164_v10, 16  ;;  %4301 = vmatpush1.bf16.msra.mxu0 %v7854_v21  ;;  %v531_v44 = vshrl.u32 %v8688_v23, 16  ;;  %1857 = vmatprep.subr.bf16.mxu1 %v7874_v8 }
  0xac   : > { %1541 = vmatmul.mubr.bf16.gmra.mrb[12].mxu1 %v6811_v35  ;;  %v3112_v48 = vld [vmem:[#allocation2 + $0x30] sm:$0xf]  ;;  %v8701_v49 = vld [vmem:[#allocation2 + $0x34] sm:$0xf]  ;;  %v511_v51 = vsel %vm8560_vm8, %v503_v31, %v510_v36  ;;  %784 = vst [vmem:[#allocation2 + $0x3c] sm:$0xf] %v783_v41  ;;  %v787_v53 = vsel %vm8578_vm10, %v512_v37, %v786_v33  ;;  %v519_v54 = vor.u32 %v517_v27, %v8694_v38 }
  0xad   : > { %v874_v50 = vld [vmem:[#allocation2 + $0x30] sm:$0xf]  ;;  %4302 = vmatprep.subr.bf16.mxu0 %v7862_v29  ;;  %v8708_v59 = vld [vmem:[#allocation2 + $0x38] sm:$0x1]  ;;  %v3224_v55 = vshrl.u32 %v3112_v48, 16  ;;  %v3227_v57 = vshll.u32 %v3112_v48, 16  ;;  %1550 = vmatprep.mubr.bf16.mxu1 %v8301_v0  ;;  %v527_v1 = vor.u32 %v525_v43, %v8698_v42 }
  0xae   : > { %v3233_v58 = vshll.u32 %v8701_v49, 16  ;;  %v3237_v60 = vshrl.u32 %v8701_v49, 16  ;;  %785 = vst [vmem:[#allocation2 + $0x40] sm:$0xf] %v511_v51  ;;  %788 = vst [vmem:[#allocation2 + $0x44] sm:$0x1] %v787_v53  ;;  %v790_v2 = vsel %vm8567_vm9, %v519_v54, %v789_v39  ;;  %1858 = vmatpush1.bf16.msra.mxu1 %v7872_v45 }
  0xaf   : > { %v3243_v61 = vshll.u32 %v8708_v59, 16  ;;  %v875_v52 = vld [vmem:[#allocation2 + $0x34] sm:$0xf]  ;;  %v918_v4 = vld [vmem:[#allocation2 + $0x38] sm:$0x1]  ;;  %v1030_v62 = vshrl.u32 %v874_v50, 16  ;;  %4303 = vmatpush1.bf16.msra.mxu0 %v7860_v40 }
  0xb0   : > { %v3226_v9 = vrot.slane %v3224_v55, 4  ;;  %v3229_v5 = vrot.slane %v3227_v57, 5  ;;  %v3235_v6 = vrot.slane %v3233_v58, 5  ;;  %v3239_v7 = vrot.slane %v3237_v60, 4  ;;  %791 = vst [vmem:[#allocation2 + $0x48] sm:$0xf] %v790_v2  ;;  %4304 = vmatprep.subr.bf16.mxu0 %v7865_v47 }
  0xb1   : > { %v3245_v14 = vrot.slane %v3243_v61, 5  ;;  %v1032_v15 = vrot.slane %v1030_v62, 4  ;;  %v1033_v17 = vshll.u32 %v874_v50, 16  ;;  %v1039_v18 = vshll.u32 %v875_v52, 16  ;;  %v793_v2 = vld [vmem:[#allocation2 + $0x50] sm:$0x1] }
  0xb2   : > { %v3230_v20 = vor.u32 %v3229_v5, %v3226_v9  ;;  %v3240_v10 = vor.u32 %v3239_v7, %v3235_v6  ;;  %v1043_v21 = vshrl.u32 %v875_v52, 16  ;;  %v1049_v24 = vshll.u32 %v918_v4, 16 }
  0xb3   : > { %v1035_v25 = vrot.slane %v1033_v17, 5  ;;  %v1041_v27 = vrot.slane %v1039_v18, 5  ;;  %v520_v29 = vrot.slane %v8694_v38, 4  ;;  %v529_v11 = vrot.slane %v8698_v42, 4  ;;  %v3115_v35 = vld [vmem:[#allocation2 + $0x3c] sm:$0xf]  ;;  %4305 = vmatpush1.bf16.msra.mxu0 %v7863_v3 }
  0xb4   : > { %v3231_v30 = vrot.slane %v3230_v20, 4  ;;  %v3241_v31 = vrot.slane %v3240_v10, 4  ;;  %v1045_v33 = vrot.slane %v1043_v21, 4  ;;  %v1051_v34 = vrot.slane %v1049_v24, 5  ;;  %4773 = vmatprep.subr.bf16.mxu0 %v7871_v19  ;;  %v876_v50 = vld [vmem:[#allocation2 + $0x3c] sm:$0xf] }
  0xb5   : > { %v1036_v36 = vor.u32 %v1035_v25, %v1032_v15  ;;  %v3116_v37 = vld [vmem:[#allocation2 + $0x40] sm:$0xf]  ;;  %v3117_v39 = vld [vmem:[#allocation2 + $0x44] sm:$0x1]  ;;  %v3248_v40 = vshrl.u32 %v3115_v35, 16  ;;  %v3251_v41 = vshll.u32 %v3115_v35, 16  ;;  %v528_v43 = vsel %vm8560_vm8, %v520_v29, %v527_v1 }
  0xb6   : > { %v3236_v38 = vsel %vm8553_vm6, %v3231_v30, %v3235_v6  ;;  %v3246_v42 = vsel %vm8553_vm6, %v3241_v31, %v3245_v14  ;;  %v1046_v47 = vor.u32 %v1045_v33, %v1041_v27  ;;  %v3257_v48 = vshll.u32 %v3116_v37, 16  ;;  %792 = vst [vmem:[#allocation2 + $0x4c] sm:$0xf] %v528_v43  ;;  %v877_v55 = vld [vmem:[#allocation2 + $0x40] sm:$0xf] }
  0xb7   : > { %v6955_v51 = vcombine.low %v3236_v38, %v3246_v42  ;;  %v1037_v53 = vrot.slane %v1036_v36, 4  ;;  %v3250_v54 = vrot.slane %v3248_v40, 4  ;;  %v3253_v45 = vrot.slane %v3251_v41, 5  ;;  %v919_v4 = vld [vmem:[#allocation2 + $0x44] sm:$0x1] }
  0xb8   : > { %v1047_v57 = vrot.slane %v1046_v47, 4  ;;  %v3259_v58 = vrot.slane %v3257_v48, 5  ;;  %v3261_v60 = vshrl.u32 %v3116_v37, 16  ;;  %v3267_v3 = vshll.u32 %v3117_v39, 16  ;;  %v3118_v8 = vld [vmem:[#allocation2 + $0x48] sm:$0xf] }
  0xb9   : > { %3759 = vmatmul.mubr.bf16.gmra.mrb[12].mxu0 %v6955_v51  ;;  %v1042_v61 = vsel %vm8553_vm6, %v1037_v53, %v1041_v27  ;;  %v3254_v52 = vor.u32 %v3253_v45, %v3250_v54  ;;  %v1054_v62 = vshrl.u32 %v876_v50, 16  ;;  %v1057_v1 = vshll.u32 %v876_v50, 16  ;;  %v878_v31 = vld [vmem:[#allocation2 + $0x48] sm:$0xf]  ;;  %v7878_v43 = vld [vmem:[#allocation6 + $0x60] ss:$8 sps:$4 sm:$0xff]  }
  0xba   : > { %3768 = vmatprep.mubr.bf16.mxu0 %v8301_v0  ;;  %v1052_v9 = vsel %vm8553_vm6, %v1047_v57, %v1051_v34  ;;  %v3263_v5 = vrot.slane %v3261_v60, 4  ;;  %v3269_v6 = vrot.slane %v3267_v3, 5  ;;  %v1063_v7 = vshll.u32 %v877_v55, 16  ;;  %v7880_v50 = vld [vmem:[#allocation6 + $0x64] ss:$8 sps:$4 sm:$0xff]   ;;  %v311_v3 = vld [vmem:[%s8483_s5 + $0x70] sm:$0xff] }
  0xbb   : > { %v6812_v14 = vcombine.low %v1042_v61, %v1052_v9  ;;  %v3255_v15 = vrot.slane %v3254_v52, 4  ;;  %v1056_v17 = vrot.slane %v1054_v62, 4  ;;  %v1059_v18 = vrot.slane %v1057_v1, 5  ;;  %1859 = vmatprep.subr.bf16.mxu1 %v7880_v50 }
  0xbc   : > { %v3264_v19 = vor.u32 %v3263_v5, %v3259_v58  ;;  %v1065_v20 = vrot.slane %v1063_v7, 5  ;;  %v1067_v10 = vshrl.u32 %v877_v55, 16  ;;  %v1073_v21 = vshll.u32 %v919_v4, 16  ;;  %1860 = vmatpush1.bf16.msra.mxu1 %v7878_v43 }
  0xbd   : > { %1551 = vmatmul.mubr.bf16.gmra.mrb[16].mxu1 %v6812_v14  ;;  %v3260_v24 = vsel %vm8553_vm6, %v3255_v15, %v3259_v58  ;;  %v1060_v25 = vor.u32 %v1059_v18, %v1056_v17  ;;  %v794_v27 = vsel %vm8578_vm10, %v529_v11, %v793_v2  ;;  %v3119_v29 = vld [vmem:[#allocation2 + $0x4c] sm:$0xf]  ;;  %v3272_v30 = vshrl.u32 %v3118_v8, 16 }
  0xbe   : > { %v3265_v33 = vrot.slane %v3264_v19, 4  ;;  %1560 = vmatprep.mubr.bf16.mxu1 %v8301_v0  ;;  %v1069_v34 = vrot.slane %v1067_v10, 4  ;;  %v1075_v35 = vrot.slane %v1073_v21, 5  ;;  %795 = vst [vmem:[#allocation2 + $0x50] sm:$0x1] %v794_v27  ;;  %v3275_v36 = vshll.u32 %v3118_v8, 16 }
  0xbf   : > { %v1061_v37 = vrot.slane %v1060_v25, 4  ;;  %v3274_v39 = vrot.slane %v3272_v30, 4  ;;  %v3281_v40 = vshll.u32 %v3119_v29, 16  ;;  %v3285_v41 = vshrl.u32 %v3119_v29, 16  ;;  %v879_v47 = vld [vmem:[#allocation2 + $0x4c] sm:$0xf] }
  0xc0   : > { %v3270_v11 = vsel %vm8553_vm6, %v3265_v33, %v3269_v6  ;;  %v1070_v38 = vor.u32 %v1069_v34, %v1065_v20  ;;  %v3277_v42 = vrot.slane %v3275_v36, 5  ;;  %v1078_v48 = vshrl.u32 %v878_v31, 16  ;;  %v796_v10 = vld [vmem:[#allocation2 + $0x54] sm:$0xf]  ;;  %v800_v34 = vld [vmem:[#allocation2 + $0x5c] sm:$0x1] }
  0xc1   : > { %v6956_v51 = vcombine.low %v3260_v24, %v3270_v11  ;;  %v1066_v53 = vsel %vm8553_vm6, %v1061_v37, %v1065_v20  ;;  %v3283_v54 = vrot.slane %v3281_v40, 5  ;;  %v3287_v45 = vrot.slane %v3285_v41, 4  ;;  %v312_v21 = vld [vmem:[%s8483_s5 + $0x78] sm:$0xff] }
  0xc2   : > { %v1071_v55 = vrot.slane %v1070_v38, 4  ;;  %v3278_v57 = vor.u32 %v3277_v42, %v3274_v39  ;;  %v1080_v58 = vrot.slane %v1078_v48, 4  ;;  %v1081_v60 = vshll.u32 %v878_v31, 16  ;;  %v7884_v40 = vld [vmem:[#allocation6 + $0x70] ss:$8 sps:$4 sm:$0xff]  }
  0xc3   : > { %3769 = vmatmul.mubr.bf16.gmra.mrb[16].mxu0 %v6956_v51  ;;  %v3288_v61 = vor.u32 %v3287_v45, %v3283_v54  ;;  %v1087_v52 = vshll.u32 %v879_v47, 16  ;;  %v1091_v4 = vshrl.u32 %v879_v47, 16  ;;  %v533_v62 = vrot.slane %v531_v44, 7  ;;  %v7886_v41 = vld [vmem:[#allocation6 + $0x74] ss:$8 sps:$4 sm:$0xff]   ;;  %v313_v45 = vld [vmem:[%s8483_s5 + $0x80] sm:$0xff] }
  0xc4   : > { %3778 = vmatprep.mubr.bf16.mxu0 %v8301_v0  ;;  %v1076_v1 = vsel %vm8553_vm6, %v1071_v55, %v1075_v35  ;;  %v3279_v2 = vrot.slane %v3278_v57, 4  ;;  %v1083_v9 = vrot.slane %v1081_v60, 5  ;;  %v534_v5 = vshll.u32 %v8688_v23, 16  ;;  %v3953_v47 = vld [vmem:[#allocation2 + $0xc] sm:$0xe]  ;;  %v314_v55 = vld [vmem:[%s8483_s5 + $0x88] sm:$0xff]  ;;  %1861 = vmatprep.subr.bf16.mxu1 %v7886_v41 }
  0xc5   : > { %v6813_v6 = vcombine.low %v1066_v53, %v1076_v1  ;;  %v8746_v7 = vld [vmem:[#allocation2 + $0x50] sm:$0x1]  ;;  %v3289_v8 = vrot.slane %v3288_v61, 4  ;;  %v1089_v15 = vrot.slane %v1087_v52, 5  ;;  %v7167_v17 = vpack.c.bf16 %v311_v3, %v311_v3  ;;  %v8771_v61 = vld [vmem:[#allocation2 + $0x18] sm:$0xe]  ;;  %1862 = vmatpush1.bf16.msra.mxu1 %v7884_v40 }
  0xc6   : > { %v920_v14 = vld [vmem:[#allocation2 + $0x50] sm:$0x1]  ;;  %v3284_v44 = vsel %vm8553_vm6, %v3279_v2, %v3283_v54  ;;  %v3291_v18 = vshll.u32 %v8746_v7, 16  ;;  %v1084_v19 = vor.u32 %v1083_v9, %v1080_v58  ;;  %v1093_v20 = vrot.slane %v1091_v4, 4  ;;  %v803_v54 = vld [vmem:[#allocation2 + $0x60] sm:$0xf] }
  0xc7   : > { %1561 = vmatmul.mubr.bf16.gmra.mrb[20].mxu1 %v6813_v6  ;;  %v1097_v24 = vshll.u32 %v920_v14, 16  ;;  %v536_v25 = vor.u32 %v534_v5, %v533_v62  ;;  %v537_v23 = vrot.slane %v533_v62, 4  ;;  %v539_v27 = vshrl.u32 %v8690_v28, 16  ;;  %v315_v2 = vld [vmem:[%s8483_s5 + $0x90] sm:$0xff]  ;;  %v316_v9 = vld [vmem:[%s8483_s5 + $0x98] sm:$0xff] }
  0xc8   : > { %v3293_v29 = vrot.slane %v3291_v18, 5  ;;  %1570 = vmatprep.mubr.bf16.mxu1 %v8301_v0  ;;  %v1085_v30 = vrot.slane %v1084_v19, 4  ;;  %v1094_v31 = vor.u32 %v1093_v20, %v1089_v15  ;;  %v542_v33 = vshll.u32 %v8690_v28, 16 }
  0xc9   : > { %v1099_v35 = vrot.slane %v1097_v24, 5  ;;  %v541_v36 = vrot.slane %v539_v27, 7  ;;  %v797_v37 = vsel %vm8567_vm9, %v536_v25, %v796_v10  ;;  %v7168_v39 = vpack.c.bf16 %v312_v21, %v312_v21 }
  0xca   : > { %v3294_v43 = vsel %vm8553_vm6, %v3289_v8, %v3293_v29  ;;  %v1090_v11 = vsel %vm8553_vm6, %v1085_v30, %v1089_v15  ;;  %v1095_v38 = vrot.slane %v1094_v31, 4  ;;  %798 = vst [vmem:[#allocation2 + $0x54] sm:$0xf] %v797_v37  ;;  %v548_v28 = vshrl.u32 %v7167_v17, 16  ;;  %v7893_v15 = vld [vmem:[#allocation6 + $0x104] ss:$8 sps:$4 sm:$0xff]  }
  0xcb   : > { %v6957_v48 = vcombine.low %v3284_v44, %v3294_v43  ;;  %v544_v50 = vor.u32 %v542_v33, %v541_v36  ;;  %v546_v51 = vrot.slane %v541_v36, 4  ;;  %v551_v53 = vshll.u32 %v7167_v17, 16  ;;  %2364 = vmatprep.subr.bf16.mxu1 %v7893_v15 }
  0xcc   : > { %v1100_v57 = vsel %vm8553_vm6, %v1095_v38, %v1099_v35  ;;  %v550_v58 = vrot.slane %v548_v28, 7  ;;  %v556_v60 = vshrl.u32 %v7168_v39, 16  ;;  %v559_v3 = vshll.u32 %v7168_v39, 16  ;;  %v319_v35 = vld [vmem:[%s8483_s5 + $0xb0] sm:$0xff] }
  0xcd   : > { %3779 = vmatmul.mubr.bf16.gmra.mrb[20].mxu0 %v6957_v48  ;;  %v6814_v52 = vcombine.low %v1090_v11, %v1100_v57  ;;  %v545_v4 = vsel %vm8560_vm8, %v537_v23, %v544_v50  ;;  %v801_v62 = vsel %vm8578_vm10, %v546_v51, %v800_v34  ;;  %v6984_v1 = vrot.slane %v3953_v47, 9  ;;  %v318_v34 = vld [vmem:[%s8483_s5 + $0xa8] sm:$0xff] }
  0xce   : > { %3788 = vmatprep.mubr.bf16.mxu0 %v8301_v0  ;;  %799 = vst [vmem:[#allocation2 + $0x58] sm:$0xf] %v545_v4  ;;  %802 = vst [vmem:[#allocation2 + $0x5c] sm:$0x1] %v801_v62  ;;  %v553_v5 = vor.u32 %v551_v53, %v550_v58  ;;  %v554_v6 = vrot.slane %v550_v58, 4  ;;  %v558_v8 = vrot.slane %v556_v60, 7  ;;  %v8785_v14 = vsel %vm8763_vm13, %v8633_v32, %v4022_v26 }
  0xcf   : > { %1571 = vmatmul.mubr.bf16.gmra.mrb[24].mxu1 %v6814_v52  ;;  %v8791_v17 = vsel %vm8763_vm13, %v6984_v1, %v4019_v22  ;;  %v7169_v44 = vpack.c.bf16 %v313_v45, %v313_v45  ;;  %v8793_v18 = vpack.c.bf16 %v314_v55, %v314_v55  ;;  %v6985_v19 = vrot.slane %v8771_v61, 9  ;;  %v807_v32 = vld [vmem:[#allocation2 + $0x68] sm:$0x1]  ;;  %v317_v22 = vld [vmem:[%s8483_s5 + $0xa0] sm:$0xff]  ;;  %v320_v52 = vld [vmem:[%s8483_s5 + $0xb8] sm:$0xff] }
  0xd0   : > { %1580 = vmatprep.mubr.bf16.mxu1 %v8301_v0  ;;  %v561_v13 = vor.u32 %v559_v3, %v558_v8  ;;  %v563_v20 = vrot.slane %v558_v8, 4  ;;  %v804_v26 = vsel %vm8567_vm9, %v553_v5, %v803_v54  ;;  %v7000_v12 = vcombine.low %v8791_v17, %v8785_v14  ;;  %v810_v3 = vld [vmem:[#allocation2 + $0x6c] sm:$0xf] }
  0xd1   : > { %v3121_v10 = vld [vmem:[#allocation2 + $0x54] sm:$0xf]  ;;  %805 = vst [vmem:[#allocation2 + $0x60] sm:$0xf] %v804_v26  ;;  %v565_v24 = vshrl.u32 %v7169_v44, 16  ;;  %v568_v25 = vshll.u32 %v7169_v44, 16  ;;  %v8802_v23 = vpack.c.bf16 %v315_v2, %v315_v2  ;;  %v8804_v27 = vpack.c.bf16 %v316_v9, %v316_v9 }
  0xd2   : > { %v880_v21 = vld [vmem:[#allocation2 + $0x54] sm:$0xf]  ;;  %v3296_v29 = vshrl.u32 %v3121_v10, 16  ;;  %v3299_v30 = vshll.u32 %v3121_v10, 16  ;;  %v562_v36 = vsel %vm8560_vm8, %v554_v6, %v561_v13  ;;  %v808_v37 = vsel %vm8578_vm10, %v563_v20, %v807_v32 }
  0xd3   : > { %v1102_v31 = vshrl.u32 %v880_v21, 16  ;;  %v1105_v33 = vshll.u32 %v880_v21, 16  ;;  %v8812_v39 = vrot.slane %v565_v24, 7  ;;  %v573_v40 = vshrl.u32 %v8793_v18, 16  ;;  %806 = vst [vmem:[#allocation2 + $0x64] sm:$0xf] %v562_v36 }
  0xd4   : > { %v3298_v41 = vrot.slane %v3296_v29, 4  ;;  %v3301_v43 = vrot.slane %v3299_v30, 5  ;;  %809 = vst [vmem:[#allocation2 + $0x68] sm:$0x1] %v808_v37  ;;  %v8820_v51 = vpack.c.bf16 %v317_v22, %v317_v22  ;;  %v8822_v53 = vpack.c.bf16 %v318_v34, %v318_v34 }
  0xd5   : > { %v1104_v11 = vrot.slane %v1102_v31, 4  ;;  %v1107_v38 = vrot.slane %v1105_v33, 5  ;;  %v8815_v28 = vld [vmem:[#allocation2 + $0x58] sm:$0xf]  ;;  %v8817_v47 = vld [vmem:[#allocation2 + $0x5c] sm:$0x1]  ;;  %v570_v50 = vor.u32 %v568_v25, %v8812_v39  ;;  %v8824_v54 = vpack.c.bf16 %v319_v35, %v319_v35 }
  0xd6   : > { %v881_v48 = vld [vmem:[#allocation2 + $0x58] sm:$0xf]  ;;  %v3302_v45 = vor.u32 %v3301_v43, %v3298_v41  ;;  %v3305_v55 = vshll.u32 %v8815_v28, 16  ;;  %v3309_v57 = vshrl.u32 %v8815_v28, 16  ;;  %v3315_v58 = vshll.u32 %v8817_v47, 16 }
  0xd7   : > { %v921_v60 = vld [vmem:[#allocation2 + $0x5c] sm:$0x1]  ;;  %v1108_v4 = vor.u32 %v1107_v38, %v1104_v11  ;;  %v1111_v62 = vshll.u32 %v881_v48, 16  ;;  %v1115_v1 = vshrl.u32 %v881_v48, 16  ;;  %v811_v33 = vsel %vm8567_vm9, %v570_v50, %v810_v3 }
  0xd8   : > { %v1121_v2 = vshll.u32 %v921_v60, 16  ;;  %v3303_v9 = vrot.slane %v3302_v45, 4  ;;  %v3307_v5 = vrot.slane %v3305_v55, 5  ;;  %v3311_v6 = vrot.slane %v3309_v57, 4  ;;  %v3124_v15 = vld [vmem:[#allocation2 + $0x60] sm:$0xf] }
  0xd9   : > { %v3317_v8 = vrot.slane %v3315_v58, 5  ;;  %v1109_v44 = vrot.slane %v1108_v4, 4  ;;  %v1113_v13 = vrot.slane %v1111_v62, 5  ;;  %v1117_v20 = vrot.slane %v1115_v1, 4  ;;  %v882_v24 = vld [vmem:[#allocation2 + $0x60] sm:$0xf] }
  0xda   : > { %v1123_v26 = vrot.slane %v1121_v2, 5  ;;  %v3308_v32 = vsel %vm8553_vm6, %v3303_v9, %v3307_v5  ;;  %v3312_v22 = vor.u32 %v3311_v6, %v3307_v5  ;;  %v3320_v10 = vshrl.u32 %v3124_v15, 16  ;;  %v8834_v30 = vld [vmem:[#allocation2 + $0x64] sm:$0xf]  ;;  %812 = vst [vmem:[#allocation2 + $0x6c] sm:$0xf] %v811_v33 }
  0xdb   : > { %v3323_v21 = vshll.u32 %v3124_v15, 16  ;;  %v1114_v25 = vsel %vm8553_vm6, %v1109_v44, %v1113_v13  ;;  %v1118_v29 = vor.u32 %v1117_v20, %v1113_v13  ;;  %v8836_v31 = vld [vmem:[#allocation2 + $0x68] sm:$0x1]  ;;  %v8840_v34 = vpack.c.bf16 %v320_v52, %v320_v52  ;;  %v883_v50 = vld [vmem:[#allocation2 + $0x64] sm:$0xf] }
  0xdc   : > { %v3313_v35 = vrot.slane %v3312_v22, 4  ;;  %v3322_v36 = vrot.slane %v3320_v10, 4  ;;  %v3329_v41 = vshll.u32 %v8834_v30, 16  ;;  %v3333_v11 = vshrl.u32 %v8834_v30, 16  ;;  %v922_v58 = vld [vmem:[#allocation2 + $0x68] sm:$0x1] }
  0xdd   : > { %v3325_v37 = vrot.slane %v3323_v21, 5  ;;  %v1119_v43 = vrot.slane %v1118_v29, 4  ;;  %v3339_v38 = vshll.u32 %v8836_v31, 16  ;;  %v1126_v48 = vshrl.u32 %v882_v24, 16  ;;  %v814_v22 = vld [vmem:[#allocation2 + $0x74] sm:$0x1] }
  0xde   : > { %v3318_v45 = vsel %vm8553_vm6, %v3313_v35, %v3317_v8  ;;  %v3331_v57 = vrot.slane %v3329_v41, 5  ;;  %v1129_v60 = vshll.u32 %v882_v24, 16  ;;  %v3335_v4 = vrot.slane %v3333_v11, 4  ;;  %v8046_v11 = vld [vmem:[#allocation2 + $0x1c] sm:$0xf] }
  0xdf   : > { %v3326_v55 = vor.u32 %v3325_v37, %v3322_v36  ;;  %v6958_v3 = vcombine.low %v3308_v32, %v3318_v45  ;;  %v1124_v52 = vsel %vm8553_vm6, %v1119_v43, %v1123_v26  ;;  %v3341_v62 = vrot.slane %v3339_v38, 5 }
  0xe0   : > { %v6815_v1 = vcombine.low %v1114_v25, %v1124_v52  ;;  %v1128_v9 = vrot.slane %v1126_v48, 4  ;;  %v1131_v5 = vrot.slane %v1129_v60, 5  ;;  %v3336_v6 = vor.u32 %v3335_v4, %v3331_v57  ;;  %v8047_v4 = vld [vmem:[#allocation2 + $0x20] sm:$0x1] }
  0xe1   : > { %v3327_v2 = vrot.slane %v3326_v55, 4  ;;  %3789 = vmatmul.mubr.bf16.gmra.mrb[24].mxu0 %v6958_v3  ;;  %v1135_v15 = vshll.u32 %v883_v50, 16  ;;  %v1139_v44 = vshrl.u32 %v883_v50, 16  ;;  %v1145_v8 = vshll.u32 %v922_v58, 16  ;;  %v884_v29 = vld [vmem:[#allocation2 + $0x6c] sm:$0xf] }
  0xe2   : > { %3798 = vmatprep.mubr.bf16.mxu0 %v8301_v0  ;;  %1581 = vmatmul.mubr.bf16.gmra.mrb[28].mxu1 %v6815_v1  ;;  %v1132_v20 = vor.u32 %v1131_v5, %v1128_v9  ;;  %v571_v26 = vrot.slane %v8812_v39, 4  ;;  %v575_v32 = vrot.slane %v573_v40, 7  ;;  %v3337_v10 = vrot.slane %v3336_v6, 4 }
  0xe3   : > { %v3332_v13 = vsel %vm8553_vm6, %v3327_v2, %v3331_v57  ;;  %1590 = vmatprep.mubr.bf16.mxu1 %v8301_v0  ;;  %v1137_v21 = vrot.slane %v1135_v15, 5  ;;  %v1141_v24 = vrot.slane %v1139_v44, 4  ;;  %v1147_v25 = vrot.slane %v1145_v8, 5  ;;  %v3955_v57 = vld [vmem:[#allocation2 + $0x24] sm:$0xe] }
  0xe4   : > { %v1133_v33 = vrot.slane %v1132_v20, 4  ;;  %v576_v35 = vshll.u32 %v8793_v18, 16  ;;  %v580_v36 = vrot.slane %v575_v32, 4  ;;  %v1150_v37 = vshrl.u32 %v884_v29, 16  ;;  %v817_v8 = vld [vmem:[#allocation2 + $0x78] sm:$0xf] }
  0xe5   : > { %v3342_v41 = vsel %vm8553_vm6, %v3337_v10, %v3341_v62  ;;  %v1142_v39 = vor.u32 %v1141_v24, %v1137_v21  ;;  %v1153_v43 = vshll.u32 %v884_v29, 16  ;;  %v4026_v40 = vrot.slane %v8046_v11, 5  ;;  %v7869_v10 = vld [vmem:[#allocation6 + $0x300] ss:$8 sps:$4 sm:$0xff]  }
  0xe6   : > { %v6959_v38 = vcombine.low %v3332_v13, %v3342_v41  ;;  %v1138_v48 = vsel %vm8553_vm6, %v1133_v33, %v1137_v21  ;;  %v578_v45 = vor.u32 %v576_v35, %v575_v32  ;;  %v815_v55 = vsel %vm8578_vm10, %v580_v36, %v814_v22  ;;  %v821_v13 = vld [vmem:[#allocation2 + $0x80] sm:$0x1]  ;;  %v8886_v22 = vld [vmem:[#allocation2 + $0x30] sm:$0xe]  ;;  %v8049_v33 = vld [vmem:[#allocation2 + $0x2c] sm:$0x1] }
  0xe7   : > { %v1143_v50 = vrot.slane %v1142_v39, 4  ;;  %816 = vst [vmem:[#allocation2 + $0x74] sm:$0x1] %v815_v55  ;;  %v1152_v18 = vrot.slane %v1150_v37, 4  ;;  %v1155_v58 = vrot.slane %v1153_v43, 5  ;;  %v8867_v60 = vsel %vm8763_vm13, %v6985_v19, %v4026_v40 }
  0xe8   : > { %v579_v3 = vsel %vm8560_vm8, %v571_v26, %v578_v45  ;;  %v4028_v52 = vrot.slane %v4026_v40, 4  ;;  %v4029_v62 = vrot.slane %v8047_v4, 5  ;;  %v582_v1 = vshrl.u32 %v8802_v23, 16 }
  0xe9   : > { %3799 = vmatmul.mubr.bf16.gmra.mrb[28].mxu0 %v6959_v38  ;;  %v1148_v2 = vsel %vm8553_vm6, %v1143_v50, %v1147_v25  ;;  %813 = vst [vmem:[#allocation2 + $0x70] sm:$0xf] %v579_v3  ;;  %v1156_v9 = vor.u32 %v1155_v58, %v1152_v18  ;;  %v585_v61 = vshll.u32 %v8802_v23, 16  ;;  %v590_v5 = vshrl.u32 %v8804_v27, 16  ;;  %v8048_v25 = vld [vmem:[#allocation2 + $0x28] sm:$0xf] }
  0xea   : > { %4322 = vmatprep.mubr.bf16.mxu0 %v8301_v0  ;;  %v6816_v19 = vcombine.low %v1138_v48, %v1148_v2  ;;  %v8879_v6 = vsel %vm8763_vm13, %v4028_v52, %v4029_v62  ;;  %v584_v15 = vrot.slane %v582_v1, 7  ;;  %v593_v44 = vshll.u32 %v8804_v27, 16  ;;  %v7877_v38 = vld [vmem:[#allocation6 + $0x314] ss:$8 sps:$4 sm:$0xff]   ;;  %v824_v50 = vld [vmem:[#allocation2 + $0x84] sm:$0xf] }
  0xeb   : > { %v8882_v20 = vrot.slane %v1156_v9, 4  ;;  %v7001_v26 = vcombine.low %v8867_v60, %v8879_v6  ;;  %v592_v23 = vrot.slane %v590_v5, 7  ;;  %v6986_v32 = vrot.slane %v3955_v57, 9  ;;  %v828_v18 = vld [vmem:[#allocation2 + $0x8c] sm:$0x1] }
  0xec   : > { %1591 = vmatmul.mubr.bf16.gmra.mrb[32].mxu1 %v6816_v19  ;;  %v587_v21 = vor.u32 %v585_v61, %v584_v15  ;;  %v588_v24 = vrot.slane %v584_v15, 4  ;;  %v4033_v29 = vrot.slane %v8048_v25, 5  ;;  %v4036_v35 = vrot.slane %v8049_v33, 5  ;;  %v7875_v52 = vld [vmem:[#allocation6 + $0x310] ss:$8 sps:$4 sm:$0xff]  }
  0xed   : > { %1600 = vmatprep.mubr.bf16.mxu1 %v8301_v0  ;;  %v595_v27 = vor.u32 %v593_v44, %v592_v23  ;;  %v597_v36 = vrot.slane %v592_v23, 4  ;;  %v599_v37 = vshrl.u32 %v8820_v51, 16  ;;  %v602_v41 = vshll.u32 %v8820_v51, 16  ;;  %v7883_v19 = vld [vmem:[#allocation6 + $0x324] ss:$8 sps:$4 sm:$0xff]  }
  0xee   : > { %v923_v39 = vld [vmem:[#allocation2 + $0x74] sm:$0x1]  ;;  %v818_v43 = vsel %vm8567_vm9, %v587_v21, %v817_v8  ;;  %v8895_v11 = vsel %vm8763_vm13, %v6986_v32, %v4033_v29  ;;  %v4035_v40 = vrot.slane %v4033_v29, 4  ;;  %v607_v48 = vshrl.u32 %v8822_v53, 16 }
  0xef   : > { %v1169_v45 = vshll.u32 %v923_v39, 16  ;;  %v596_v55 = vsel %vm8560_vm8, %v588_v24, %v595_v27  ;;  %819 = vst [vmem:[#allocation2 + $0x78] sm:$0xf] %v818_v43  ;;  %v822_v51 = vsel %vm8578_vm10, %v597_v36, %v821_v13  ;;  %v601_v57 = vrot.slane %v599_v37, 7  ;;  %v321_v13 = vld [vmem:[%s8483_s5 + $0xc0] sm:$0xff] }
  0xf0   : > { %v885_v58 = vld [vmem:[#allocation2 + $0x70] sm:$0xf]  ;;  %820 = vst [vmem:[#allocation2 + $0x7c] sm:$0xf] %v596_v55  ;;  %823 = vst [vmem:[#allocation2 + $0x80] sm:$0x1] %v822_v51  ;;  %v8904_v3 = vsel %vm8763_vm13, %v4035_v40, %v4036_v35 }
  0xf1   : > { %v609_v4 = vrot.slane %v607_v48, 7  ;;  %v610_v62 = vshll.u32 %v8822_v53, 16  ;;  %v6987_v1 = vrot.slane %v8886_v22, 9  ;;  %4323 = vmatmul.mubr.bf16.vlgmr.msra.gmra.mrb[0].mxu0 %v7000_v12  ;;  %v1159_v2 = vshll.u32 %v885_v58, 16  ;;  %v7881_v24 = vld [vmem:[#allocation6 + $0x320] ss:$8 sps:$4 sm:$0xff]  }
  0xf2   : > { %v1163_v9 = vshrl.u32 %v885_v58, 16  ;;  %v1171_v61 = vrot.slane %v1169_v45, 5  ;;  %v7002_v5 = vcombine.low %v8895_v11, %v8904_v3  ;;  %4774 = vmatpush1.bf16.msra.mxu0 %v7869_v10  ;;  %4332 = vmatprep.mubr.bf16.mxu0 %v8301_v0  ;;  %v604_v15 = vor.u32 %v602_v41, %v601_v57  ;;  %v7889_v33 = vld [vmem:[#allocation6 + $0x334] ss:$8 sps:$4 sm:$0xff]  }
  0xf3   : > { %v605_v44 = vrot.slane %v601_v57, 4  ;;  %v612_v8 = vor.u32 %v610_v62, %v609_v4  ;;  %v614_v53 = vrot.slane %v609_v4, 4  ;;  %v1161_v23 = vrot.slane %v1159_v2, 5  ;;  %4775 = vmatprep.subr.bf16.mxu0 %v7877_v38  ;;  %v831_v57 = vld [vmem:[#allocation2 + $0x90] sm:$0xf]  ;;  %v323_v4 = vld [vmem:[%s8483_s5 + $0xd0] sm:$0xff] }
  0xf4   : > { %v1165_v32 = vrot.slane %v1163_v9, 4  ;;  %v4040_v14 = vrot.slane %v8701_v49, 5  ;;  %v4043_v17 = vrot.slane %v8708_v59, 5  ;;  %v825_v22 = vsel %vm8567_vm9, %v604_v15, %v824_v50  ;;  %v7896_v15 = vld [vmem:[#allocation6 + $0x344] ss:$8 sps:$4 sm:$0xff]  }
  0xf5   : > { %v613_v12 = vsel %vm8560_vm8, %v605_v44, %v612_v8  ;;  %v829_v10 = vsel %vm8578_vm10, %v614_v53, %v828_v18  ;;  %v616_v21 = vshrl.u32 %v8824_v54, 16  ;;  %v1162_v25 = vsel %vm8553_vm6, %v8882_v20, %v1161_v23  ;;  %826 = vst [vmem:[#allocation2 + $0x84] sm:$0xf] %v825_v22 }
  0xf6   : > { %v1166_v29 = vor.u32 %v1165_v32, %v1161_v23  ;;  %827 = vst [vmem:[#allocation2 + $0x88] sm:$0xf] %v613_v12  ;;  %830 = vst [vmem:[#allocation2 + $0x8c] sm:$0x1] %v829_v10  ;;  %v8929_v49 = vsel %vm8763_vm13, %v6987_v1, %v4040_v14  ;;  %v4042_v59 = vrot.slane %v4040_v14, 4  ;;  %4776 = vmatpush1.bf16.msra.mxu0 %v7875_v52  ;;  %v619_v36 = vshll.u32 %v8824_v54, 16 }
  0xf7   : > { %v886_v35 = vld [vmem:[#allocation2 + $0x78] sm:$0xf]  ;;  %v8931_v27 = vrot.slane %v616_v21, 7  ;;  %v624_v37 = vshrl.u32 %v8840_v34, 16  ;;  %v627_v20 = vshll.u32 %v8840_v34, 16  ;;  %4777 = vmatprep.subr.bf16.mxu0 %v7883_v19  ;;  %v8940_v48 = vpack.c.bf16 %v321_v13, %v321_v13  ;;  %v322_v52 = vld [vmem:[%s8483_s5 + $0xc8] sm:$0xff] }
  0xf8   : > { %v1167_v41 = vrot.slane %v1166_v29, 4  ;;  %v887_v39 = vld [vmem:[#allocation2 + $0x7c] sm:$0xf]  ;;  %v924_v43 = vld [vmem:[#allocation2 + $0x80] sm:$0x1]  ;;  %v1174_v40 = vshrl.u32 %v886_v35, 16  ;;  %v8938_v38 = vsel %vm8763_vm13, %v4042_v59, %v4043_v17  ;;  %v8956_v32 = vpack.c.bf16 %v322_v52, %v322_v52 }
  0xf9   : > { %v1177_v45 = vshll.u32 %v886_v35, 16  ;;  %v1183_v55 = vshll.u32 %v887_v39, 16  ;;  %v1187_v54 = vshrl.u32 %v887_v39, 16  ;;  %v1193_v51 = vshll.u32 %v924_v43, 16  ;;  %4333 = vmatmul.mubr.bf16.gmra.mrb[4].mxu0 %v7001_v26  ;;  %v3957_v21 = vld [vmem:[#allocation2 + $0x3c] sm:$0xe] }
  0xfa   : > { %v1172_v34 = vsel %vm8553_vm6, %v1167_v41, %v1171_v61  ;;  %v1176_v50 = vrot.slane %v1174_v40, 4  ;;  %v7003_v18 = vcombine.low %v8929_v49, %v8938_v38  ;;  %v621_v58 = vor.u32 %v619_v36, %v8931_v27  ;;  %4342 = vmatprep.mubr.bf16.mxu0 %v8301_v0  ;;  %4778 = vmatpush1.bf16.msra.mxu0 %v7881_v24  ;;  %v7887_v61 = vld [vmem:[#allocation6 + $0x330] ss:$8 sps:$4 sm:$0xff]   ;;  %v7904_v41 = vld [vmem:[#allocation6 + $0x354] ss:$8 sps:$4 sm:$0xff]  }
  0xfb   : > { %v6817_v62 = vcombine.low %v1162_v25, %v1172_v34  ;;  %v1179_v1 = vrot.slane %v1177_v45, 5  ;;  %v1185_v2 = vrot.slane %v1183_v55, 5  ;;  %v1189_v9 = vrot.slane %v1187_v54, 4  ;;  %4779 = vmatprep.subr.bf16.mxu0 %v7889_v33  ;;  %v7894_v33 = vld [vmem:[#allocation6 + $0x340] ss:$8 sps:$4 sm:$0xff]  }
  0xfc   : > { %v1195_v19 = vrot.slane %v1193_v51, 5  ;;  %v622_v60 = vrot.slane %v8931_v27, 4  ;;  %v626_v6 = vrot.slane %v624_v37, 7  ;;  %v832_v26 = vsel %vm8567_vm9, %v621_v58, %v831_v57  ;;  %v888_v53 = vld [vmem:[#allocation2 + $0x84] sm:$0xf] }
  0xfd   : > { %1601 = vmatmul.mubr.bf16.gmra.mrb[36].mxu1 %v6817_v62  ;;  %v1180_v44 = vor.u32 %v1179_v1, %v1176_v50  ;;  %v1190_v8 = vor.u32 %v1189_v9, %v1185_v2  ;;  %v889_v13 = vld [vmem:[#allocation2 + $0x88] sm:$0xf]  ;;  %v925_v23 = vld [vmem:[#allocation2 + $0x8c] sm:$0x1]  ;;  %833 = vst [vmem:[#allocation2 + $0x90] sm:$0xf] %v832_v26  ;;  %v8958_v14 = vpack.c.bf16 %v323_v4, %v323_v4 }
  0xfe   : > { %1610 = vmatprep.mubr.bf16.mxu1 %v8301_v0  ;;  %v1198_v17 = vshrl.u32 %v888_v53, 16  ;;  %v1201_v12 = vshll.u32 %v888_v53, 16  ;;  %v1207_v22 = vshll.u32 %v889_v13, 16  ;;  %v1211_v10 = vshrl.u32 %v889_v13, 16  ;;  %4780 = vmatpush1.bf16.msra.mxu0 %v7887_v61  ;;  %v835_v55 = vld [vmem:[#allocation2 + $0x98] sm:$0x1] }
  0xff   : > { %v1181_v24 = vrot.slane %v1180_v44, 4  ;;  %v1191_v25 = vrot.slane %v1190_v8, 4  ;;  %v1217_v29 = vshll.u32 %v925_v23, 16  ;;  %v629_v59 = vor.u32 %v627_v20, %v626_v6  ;;  %4781 = vmatprep.subr.bf16.mxu0 %v7896_v15  ;;  %v7902_v20 = vld [vmem:[#allocation6 + $0x350] ss:$8 sps:$4 sm:$0xff]  }
 0x100   : > { %v1200_v35 = vrot.slane %v1198_v17, 4  ;;  %v1203_v27 = vrot.slane %v1201_v12, 5  ;;  %v1209_v36 = vrot.slane %v1207_v22, 5  ;;  %v1213_v37 = vrot.slane %v1211_v10, 4  ;;  %v7912_v50 = vld [vmem:[#allocation6 + $0x364] ss:$8 sps:$4 sm:$0xff]  }
 0x101   : > { %v1186_v39 = vsel %vm8553_vm6, %v1181_v24, %v1185_v2  ;;  %v1196_v43 = vsel %vm8553_vm6, %v1191_v25, %v1195_v19  ;;  %v1219_v40 = vrot.slane %v1217_v29, 5  ;;  %v630_v45 = vsel %vm8560_vm8, %v622_v60, %v629_v59  ;;  %4343 = vmatmul.mubr.bf16.gmra.mrb[8].mxu0 %v7002_v5  ;;  %v8050_v52 = vld [vmem:[#allocation2 + $0x40] sm:$0xf]  ;;  %v8051_v62 = vld [vmem:[#allocation2 + $0x44] sm:$0x1] }
 0x102   : > { %v6818_v54 = vcombine.low %v1186_v39, %v1196_v43  ;;  %v1204_v51 = vor.u32 %v1203_v27, %v1200_v35  ;;  %v1214_v57 = vor.u32 %v1213_v37, %v1209_v36  ;;  %v631_v34 = vrot.slane %v626_v6, 4  ;;  %834 = vst [vmem:[#allocation2 + $0x94] sm:$0xf] %v630_v45  ;;  %4352 = vmatprep.mubr.bf16.mxu0 %v8301_v0  ;;  %v3958_v19 = vld [vmem:[#allocation2 + $0x48] sm:$0xe] }
 0x103   : > { %v6988_v58 = vrot.slane %v3957_v21, 9  ;;  %v4047_v4 = vrot.slane %v8050_v52, 5  ;;  %v4050_v1 = vrot.slane %v8051_v62, 5  ;;  %v633_v2 = vshrl.u32 %v8940_v48, 16  ;;  %4782 = vmatpush1.bf16.msra.mxu0 %v7894_v33  ;;  %v838_v44 = vld [vmem:[#allocation2 + $0x9c] sm:$0xf] }
 0x104   : > { %v1205_v9 = vrot.slane %v1204_v51, 4  ;;  %v1215_v61 = vrot.slane %v1214_v57, 4  ;;  %v836_v11 = vsel %vm8578_vm10, %v631_v34, %v835_v55  ;;  %v890_v3 = vld [vmem:[#allocation2 + $0x90] sm:$0xf]  ;;  %v636_v5 = vshll.u32 %v8940_v48, 16  ;;  %4783 = vmatprep.subr.bf16.mxu0 %v7904_v41 }
 0x105   : > { %1611 = vmatmul.mubr.bf16.gmra.mrb[40].mxu1 %v6818_v54  ;;  %837 = vst [vmem:[#allocation2 + $0x98] sm:$0x1] %v836_v11  ;;  %v1222_v60 = vshrl.u32 %v890_v3, 16  ;;  %v1225_v6 = vshll.u32 %v890_v3, 16  ;;  %v8977_v26 = vsel %vm8763_vm13, %v6988_v58, %v4047_v4  ;;  %v4049_v15 = vrot.slane %v4047_v4, 4 }
 0x106   : > { %v7910_v8 = vld [vmem:[#allocation6 + $0x360] ss:$8 sps:$4 sm:$0xff]   ;;  %1620 = vmatprep.mubr.bf16.mxu1 %v8301_v0  ;;  %v1210_v53 = vsel %vm8553_vm6, %v1205_v9, %v1209_v36  ;;  %v1220_v48 = vsel %vm8553_vm6, %v1215_v61, %v1219_v40  ;;  %v635_v13 = vrot.slane %v633_v2, 7  ;;  %v641_v23 = vshrl.u32 %v8956_v32, 16  ;;  %v842_v21 = vld [vmem:[#allocation2 + $0xa4] sm:$0x1] }
 0x107   : > { %v6819_v17 = vcombine.low %v1210_v53, %v1220_v48  ;;  %v1224_v12 = vrot.slane %v1222_v60, 4  ;;  %v1227_v22 = vrot.slane %v1225_v6, 5  ;;  %v8987_v10 = vsel %vm8763_vm13, %v4049_v15, %v4050_v1  ;;  %4784 = vmatpush1.bf16.msra.mxu0 %v7902_v20  ;;  %v7920_v33 = vld [vmem:[#allocation6 + $0x374] ss:$8 sps:$4 sm:$0xff]   ;;  %v7918_v38 = vld [vmem:[#allocation6 + $0x370] ss:$8 sps:$4 sm:$0xff]  }
 0x108   : > { %v7004_v24 = vcombine.low %v8977_v26, %v8987_v10  ;;  %v638_v25 = vor.u32 %v636_v5, %v635_v13  ;;  %v639_v29 = vrot.slane %v635_v13, 4  ;;  %v643_v59 = vrot.slane %v641_v23, 7  ;;  %4785 = vmatprep.subr.bf16.mxu0 %v7912_v50  ;;  %v8052_v41 = vld [vmem:[#allocation2 + $0x4c] sm:$0xf]  ;;  %v324_v20 = vld [vmem:[%s8483_s5 + $0xd8] sm:$0xff]  ;;  %v325_v5 = vld [vmem:[%s8483_s5 + $0xe0] sm:$0xff] }
 0x109   : > { %v8991_v35 = vld [vmem:[#allocation2 + $0x94] sm:$0xf]  ;;  %v1228_v27 = vor.u32 %v1227_v22, %v1224_v12  ;;  %v644_v36 = vshll.u32 %v8956_v32, 16  ;;  %v6989_v37 = vrot.slane %v3958_v19, 9  ;;  %v4054_v39 = vrot.slane %v8052_v41, 5  ;;  %4353 = vmatmul.mubr.bf16.gmra.mrb[12].mxu0 %v7003_v18  ;;  %v326_v23 = vld [vmem:[%s8483_s5 + $0xe8] sm:$0xff] }
 0x10a   : > { %v1231_v43 = vshll.u32 %v8991_v35, 16  ;;  %v1235_v40 = vshrl.u32 %v8991_v35, 16  ;;  %v648_v45 = vrot.slane %v643_v59, 4  ;;  %v839_v55 = vsel %vm8567_vm9, %v638_v25, %v838_v44  ;;  %4362 = vmatprep.mubr.bf16.mxu0 %v8301_v0  ;;  %v7929_v18 = vld [vmem:[#allocation6 + $0x384] ss:$8 sps:$4 sm:$0xff]  }
 0x10b   : > { %v1229_v54 = vrot.slane %v1228_v27, 4  ;;  %v646_v32 = vor.u32 %v644_v36, %v643_v59  ;;  %840 = vst [vmem:[#allocation2 + $0x9c] sm:$0xf] %v839_v55  ;;  %v9005_v51 = vsel %vm8763_vm13, %v6989_v37, %v4054_v39  ;;  %v4056_v49 = vrot.slane %v4054_v39, 4  ;;  %4786 = vmatpush1.bf16.msra.mxu0 %v7910_v8  ;;  %v3959_v9 = vld [vmem:[#allocation2 + $0x54] sm:$0xe] }
 0x10c   : > { %v926_v57 = vld [vmem:[#allocation2 + $0x98] sm:$0x1]  ;;  %v1233_v34 = vrot.slane %v1231_v43, 5  ;;  %v1237_v50 = vrot.slane %v1235_v40, 4  ;;  %v843_v58 = vsel %vm8578_vm10, %v648_v45, %v842_v21  ;;  %v4057_v52 = vrot.slane %v8746_v7, 5  ;;  %4787 = vmatprep.subr.bf16.mxu0 %v7920_v33 }
 0x10d   : > { %1621 = vmatmul.mubr.bf16.gmra.mrb[44].mxu1 %v6819_v17  ;;  %v1241_v4 = vshll.u32 %v926_v57, 16  ;;  %v647_v62 = vsel %vm8560_vm8, %v639_v29, %v646_v32  ;;  %844 = vst [vmem:[#allocation2 + $0xa4] sm:$0x1] %v843_v58  ;;  %v7180_v1 = vpack.c.bf16 %v324_v20, %v324_v20  ;;  %v650_v2 = vshrl.u32 %v8958_v14, 16  ;;  %v845_v44 = vld [vmem:[#allocation2 + $0xa8] sm:$0xf] }
 0x10e   : > { %1630 = vmatprep.mubr.bf16.mxu1 %v8301_v0  ;;  %v1234_v61 = vsel %vm8553_vm6, %v1229_v54, %v1233_v34  ;;  %v1238_v11 = vor.u32 %v1237_v50, %v1233_v34  ;;  %841 = vst [vmem:[#allocation2 + $0xa0] sm:$0xf] %v647_v62  ;;  %v9018_v7 = vsel %vm8763_vm13, %v4056_v49, %v4057_v52  ;;  %v653_v3 = vshll.u32 %v8958_v14, 16  ;;  %v849_v29 = vld [vmem:[#allocation2 + $0xb0] sm:$0x1] }
 0x10f   : > { %v1243_v19 = vrot.slane %v1241_v4, 5  ;;  %v7005_v60 = vcombine.low %v9005_v51, %v9018_v7  ;;  %v652_v6 = vrot.slane %v650_v2, 7  ;;  %v658_v15 = vshrl.u32 %v7180_v1, 16  ;;  %4788 = vmatpush1.bf16.msra.mxu0 %v7918_v38  ;;  %v3960_v38 = vld [vmem:[#allocation2 + $0x60] sm:$0xe] }
 0x110   : > { %v1239_v8 = vrot.slane %v1238_v11, 4  ;;  %v661_v53 = vshll.u32 %v7180_v1, 16  ;;  %v6990_v48 = vrot.slane %v3959_v9, 9  ;;  %v4061_v13 = vrot.slane %v8815_v28, 5  ;;  %5623 = vmatprep.subr.bf16.mxu0 %v7929_v18 }
 0x111   : > { %v655_v17 = vor.u32 %v653_v3, %v652_v6  ;;  %v656_v12 = vrot.slane %v652_v6, 4  ;;  %v660_v22 = vrot.slane %v658_v15, 7  ;;  %v4064_v14 = vrot.slane %v8817_v47, 5  ;;  %4363 = vmatmul.mubr.bf16.gmra.mrb[16].mxu0 %v7004_v24  ;;  %v852_v3 = vld [vmem:[#allocation2 + $0xb4] sm:$0xf] }
 0x112   : > { %v1244_v21 = vsel %vm8553_vm6, %v1239_v8, %v1243_v19  ;;  %v9032_v25 = vld [vmem:[#allocation2 + $0x9c] sm:$0xf]  ;;  %v9036_v28 = vsel %vm8763_vm13, %v6990_v48, %v4061_v13  ;;  %v4063_v59 = vrot.slane %v4061_v13, 4  ;;  %v7181_v33 = vpack.c.bf16 %v325_v5, %v325_v5  ;;  %4372 = vmatprep.mubr.bf16.mxu0 %v8301_v0 }
 0x113   : > { %v6820_v27 = vcombine.low %v1234_v61, %v1244_v21  ;;  %v1246_v47 = vshrl.u32 %v9032_v25, 16  ;;  %v1249_v36 = vshll.u32 %v9032_v25, 16  ;;  %v663_v37 = vor.u32 %v661_v53, %v660_v22  ;;  %v856_v15 = vld [vmem:[#allocation2 + $0xbc] sm:$0x1] }
 0x114   : > { %v927_v41 = vld [vmem:[#allocation2 + $0xa4] sm:$0x1]  ;;  %v665_v26 = vrot.slane %v660_v22, 4  ;;  %v846_v10 = vsel %vm8567_vm9, %v655_v17, %v845_v44  ;;  %v9045_v24 = vsel %vm8763_vm13, %v4063_v59, %v4064_v14  ;;  %v7182_v39 = vpack.c.bf16 %v326_v23, %v326_v23 }
 0x115   : > { %1631 = vmatmul.mubr.bf16.gmra.mrb[48].mxu1 %v6820_v27  ;;  %v9047_v43 = vld [vmem:[#allocation2 + $0xa0] sm:$0xf]  ;;  %v1248_v40 = vrot.slane %v1246_v47, 4  ;;  %v1251_v45 = vrot.slane %v1249_v36, 5  ;;  %v1265_v55 = vshll.u32 %v927_v41, 16  ;;  %v664_v20 = vsel %vm8560_vm8, %v656_v12, %v663_v37 }
 0x116   : > { %847 = vst [vmem:[#allocation2 + $0xa8] sm:$0xf] %v846_v10  ;;  %1640 = vmatprep.mubr.bf16.mxu1 %v8301_v0  ;;  %v1255_v54 = vshll.u32 %v9047_v43, 16  ;;  %v1259_v32 = vshrl.u32 %v9047_v43, 16  ;;  %848 = vst [vmem:[#allocation2 + $0xac] sm:$0xf] %v664_v20  ;;  %v850_v51 = vsel %vm8578_vm10, %v665_v26, %v849_v29  ;;  %v7006_v49 = vcombine.low %v9036_v28, %v9045_v24 }
 0x117   : > { %v1252_v18 = vor.u32 %v1251_v45, %v1248_v40  ;;  %851 = vst [vmem:[#allocation2 + $0xb0] sm:$0x1] %v850_v51  ;;  %v667_v57 = vshrl.u32 %v7181_v33, 16  ;;  %v670_v34 = vshll.u32 %v7181_v33, 16  ;;  %v675_v52 = vshrl.u32 %v7182_v39, 16 }
 0x118   : > { %v1257_v50 = vrot.slane %v1255_v54, 5  ;;  %v1261_v58 = vrot.slane %v1259_v32, 4  ;;  %v678_v4 = vshll.u32 %v7182_v39, 16  ;;  %v6991_v2 = vrot.slane %v3960_v38, 9  ;;  %v3128_v10 = vld [vmem:[#allocation2 + $0x70] sm:$0xf] }
 0x119   : > { %v1253_v62 = vrot.slane %v1252_v18, 4  ;;  %v669_v1 = vrot.slane %v667_v57, 7  ;;  %v4068_v9 = vrot.slane %v8834_v30, 5  ;;  %v1267_v11 = vrot.slane %v1265_v55, 5  ;;  %4373 = vmatmul.mubr.bf16.gmra.mrb[20].mxu0 %v7005_v60  ;;  %v3961_v40 = vld [vmem:[#allocation2 + $0x6c] sm:$0xe] }
 0x11a   : > { %v1262_v61 = vor.u32 %v1261_v58, %v1257_v50  ;;  %v677_v7 = vrot.slane %v675_v52, 7  ;;  %4382 = vmatprep.mubr.bf16.mxu0 %v8301_v0  ;;  %v4071_v44 = vrot.slane %v8836_v31, 5  ;;  %v3129_v20 = vld [vmem:[#allocation2 + $0x74] sm:$0x1]  ;;  %v4075_v32 = vrot.slane %v3128_v10, 5 }
 0x11b   : > { %v1258_v5 = vsel %vm8553_vm6, %v1253_v62, %v1257_v50  ;;  %v672_v19 = vor.u32 %v670_v34, %v669_v1  ;;  %v673_v6 = vrot.slane %v669_v1, 4  ;;  %v4070_v13 = vrot.slane %v4068_v9, 4  ;;  %v3135_v10 = vld [vmem:[#allocation2 + $0x8c] sm:$0x1]  ;;  %v3140_v63 = vld [vmem:[#allocation2 + $0xa0] sm:$0xf] }
 0x11c   : > { %v1263_v8 = vrot.slane %v1262_v61, 4  ;;  %v680_v48 = vor.u32 %v678_v4, %v677_v7  ;;  %v682_v30 = vrot.slane %v677_v7, 4  ;;  %v4069_v22 = vsel %vm8763_vm13, %v6991_v2, %v4068_v9  ;;  %v3131_v7 = vld [vmem:[#allocation2 + $0x7c] sm:$0xf] }
 0x11d   : > { %v9063_v53 = vld [vmem:[#allocation2 + $0xa8] sm:$0xf]  ;;  %v9065_v23 = vld [vmem:[#allocation2 + $0xac] sm:$0xf]  ;;  %v853_v12 = vsel %vm8567_vm9, %v672_v19, %v852_v3  ;;  %v4072_v26 = vsel %vm8763_vm13, %v4070_v13, %v4071_v44  ;;  %v6992_v57 = vrot.slane %v3961_v40, 9  ;;  %v4078_v34 = vrot.slane %v3129_v20, 5 }
 0x11e   : > { %v1270_v60 = vshrl.u32 %v9063_v53, 16  ;;  %v1273_v17 = vshll.u32 %v9063_v53, 16  ;;  %v1268_v31 = vsel %vm8553_vm6, %v1263_v8, %v1267_v11  ;;  %v928_v14 = vld [vmem:[#allocation2 + $0xb0] sm:$0x1]  ;;  %v1279_v21 = vshll.u32 %v9065_v23, 16 }
 0x11f   : > { %v1283_v29 = vshrl.u32 %v9065_v23, 16  ;;  %v681_v28 = vsel %vm8560_vm8, %v673_v6, %v680_v48  ;;  %854 = vst [vmem:[#allocation2 + $0xb4] sm:$0xf] %v853_v12  ;;  %v6821_v59 = vcombine.low %v1258_v5, %v1268_v31  ;;  %v1289_v47 = vshll.u32 %v928_v14, 16  ;;  %v3137_v40 = vld [vmem:[#allocation2 + $0x94] sm:$0xf] }
 0x120   : > { %v1272_v33 = vrot.slane %v1270_v60, 4  ;;  %v1275_v27 = vrot.slane %v1273_v17, 5  ;;  %855 = vst [vmem:[#allocation2 + $0xb8] sm:$0xf] %v681_v28  ;;  %v1281_v36 = vrot.slane %v1279_v21, 5  ;;  %v857_v41 = vsel %vm8578_vm10, %v682_v30, %v856_v15 }
 0x121   : > { %v1285_v37 = vrot.slane %v1283_v29, 4  ;;  %1641 = vmatmul.mubr.bf16.gmra.mrb[52].mxu1 %v6821_v59  ;;  %858 = vst [vmem:[#allocation2 + $0xbc] sm:$0x1] %v857_v41  ;;  %v7007_v39 = vcombine.low %v4069_v22, %v4072_v26  ;;  %v1291_v55 = vrot.slane %v1289_v47, 5  ;;  %4383 = vmatmul.mubr.bf16.gmra.mrb[24].mxu0 %v7006_v49  ;;  %v4077_v4 = vrot.slane %v4075_v32, 4  ;;  %v327_v47 = vld [vmem:[%s8483_s5 + $0xf0] sm:$0xff] }
 0x122   : > { %v1276_v24 = vor.u32 %v1275_v27, %v1272_v33  ;;  %1650 = vmatprep.mubr.bf16.mxu1 %v8301_v0  ;;  %4392 = vmatprep.mubr.bf16.mxu0 %v8301_v0  ;;  %v4076_v15 = vsel %vm8763_vm13, %v6992_v57, %v4075_v32  ;;  %v3962_v30 = vld [vmem:[#allocation2 + $0x78] sm:$0xe]  ;;  %v4082_v13 = vrot.slane %v3131_v7, 5  ;;  %v3132_v17 = vld [vmem:[#allocation2 + $0x80] sm:$0x1] }
 0x123   : > { %v1286_v45 = vor.u32 %v1285_v37, %v1281_v36  ;;  %v4079_v48 = vsel %vm8763_vm13, %v4077_v4, %v4078_v34  ;;  %v6993_v14 = vrot.slane %v3962_v30, 9  ;;  %v3134_v21 = vld [vmem:[#allocation2 + $0x88] sm:$0xf]  ;;  %v4085_v59 = vrot.slane %v3132_v17, 5  ;;  %v3963_v27 = vld [vmem:[#allocation2 + $0x84] sm:$0xe] }
 0x124   : > { %v1277_v54 = vrot.slane %v1276_v24, 4  ;;  %v7008_v31 = vcombine.low %v4076_v15, %v4079_v48  ;;  %v4084_v28 = vrot.slane %v4082_v13, 4  ;;  %v328_v37 = vld [vmem:[%s8483_s5 + $0xf8] sm:$0xff]  ;;  %v6994_v24 = vrot.slane %v3963_v27, 9  ;;  %v8053_v20 = vld [vmem:[#allocation2] sm:$0xf] }
 0x125   : > { %v1287_v51 = vrot.slane %v1286_v45, 4  ;;  %v4083_v41 = vsel %vm8763_vm13, %v6993_v14, %v4082_v13  ;;  %v7183_v45 = vpack.c.bf16 %v327_v47, %v327_v47  ;;  %v4092_v34 = vrot.slane %v3135_v10, 5  ;;  %v863_v7 = vld [vmem:[#allocation2 + $0xc8] sm:$0x1]  ;;  %v3964_v48 = vld [vmem:[#allocation2 + $0x90] sm:$0xe] }
 0x126   : > { %v1282_v38 = vsel %vm8553_vm6, %v1277_v54, %v1281_v36  ;;  %v9087_v18 = vld [vmem:[#allocation2 + $0xb4] sm:$0xf]  ;;  %v4089_v36 = vrot.slane %v3134_v21, 5  ;;  %v4086_v26 = vsel %vm8763_vm13, %v4084_v28, %v4085_v59  ;;  %v9115_v54 = vld [vmem:[#allocation2 + $0x4] sm:$0xf]  ;;  %v6995_v14 = vrot.slane %v3964_v48, 9 }
 0x127   : > { %v1292_v50 = vsel %vm8553_vm6, %v1287_v51, %v1291_v55  ;;  %v9091_v58 = vld [vmem:[#allocation2 + $0xb8] sm:$0xf]  ;;  %v1294_v49 = vshrl.u32 %v9087_v18, 16  ;;  %v1297_v52 = vshll.u32 %v9087_v18, 16  ;;  %v7184_v55 = vpack.c.bf16 %v328_v37, %v328_v37  ;;  %v8055_v17 = vld [vmem:[#allocation2 + $0xc] sm:$0xf] }
 0x128   : > { %v6822_v62 = vcombine.low %v1282_v38, %v1292_v50  ;;  %v1303_v1 = vshll.u32 %v9091_v58, 16  ;;  %v1307_v2 = vshrl.u32 %v9091_v58, 16  ;;  %v929_v9 = vld [vmem:[#allocation2 + $0xbc] sm:$0x1]  ;;  %v6840_v32 = vcombine.low %v8053_v20, %v9115_v54  ;;  %v7901_v38 = vld [vmem:[#allocation6 + $0x114] ss:$8 sps:$4 sm:$0xff]  }
 0x129   : > { %v1296_v61 = vrot.slane %v1294_v49, 4  ;;  %v1299_v11 = vrot.slane %v1297_v52, 5  ;;  %v1313_v19 = vshll.u32 %v929_v9, 16  ;;  %4393 = vmatmul.mubr.bf16.gmra.mrb[28].mxu0 %v7007_v39  ;;  %v7891_v39 = vld [vmem:[#allocation6 + $0x100] ss:$8 sps:$4 sm:$0xff]   ;;  %v7009_v51 = vcombine.low %v4083_v41, %v4086_v26  ;;  %s8197_s5 = sshll.u32 %s8302_s29, 4  ;;  %s8198_s5 = int_to_ptr.vmem [resolvable:$false] %s8197_s5 }
 0x12a   : > { %1651 = vmatmul.mubr.bf16.gmra.mrb[56].mxu1 %v6822_v62  ;;  %v1305_v3 = vrot.slane %v1303_v1, 5  ;;  %v1309_v5 = vrot.slane %v1307_v2, 4  ;;  %4402 = vmatprep.mubr.bf16.mxu0 %v8301_v0  ;;  %v4091_v57 = vrot.slane %v4089_v36, 4  ;;  %v684_v50 = vshrl.u32 %v7183_v45, 16  ;;  %v7917_v28 = vld [vmem:[#allocation6 + $0x134] ss:$8 sps:$4 sm:$0xff]   ;;  %p8200_p10 = scmp.lt.s32.totalorder %s9932_s28, %s8198_s5 }
 0x12b   : > { %1660 = vmatprep.mubr.bf16.mxu1 %v8301_v0  ;;  %v1300_v6 = vor.u32 %v1299_v11, %v1296_v61  ;;  %v1315_v8 = vrot.slane %v1313_v19, 5  ;;  %v687_v49 = vshll.u32 %v7183_v45, 16  ;;  %v692_v52 = vshrl.u32 %v7184_v55, 16  ;;  %v859_v11 = vld [vmem:[#allocation2 + $0xc0] sm:$0xf]  ;;  %s8199_s21 = scalar_lea.vmem %s8198_s5, 8192 }
 0x12c   : > { %v1310_v44 = vor.u32 %v1309_v5, %v1305_v3  ;;  %v695_v4 = vshll.u32 %v7184_v55, 16  ;;  %v686_v62 = vrot.slane %v684_v50, 7  ;;  %v4090_v2 = vsel %vm8763_vm13, %v6994_v24, %v4089_v36  ;;  %v7909_v5 = vld [vmem:[#allocation6 + $0x124] ss:$8 sps:$4 sm:$0xff]   ;;  %v7915_v36 = vld [vmem:[#allocation6 + $0x130] ss:$8 sps:$4 sm:$0xff]   ;;  %p8201_p13 = scmp.lt.s32.totalorder %s8199_s21, %s8193_s20 }
 0x12d   : > { %v1301_v60 = vrot.slane %v1300_v6, 4  ;;  %v694_v1 = vrot.slane %v692_v52, 7  ;;  %v4093_v9 = vsel %vm8763_vm13, %v4091_v57, %v4092_v34  ;;  %v4096_v61 = vrot.slane %v3137_v40, 5  ;;  %v3141_v47 = vld [vmem:[#allocation2 + $0xa4] sm:$0x1] }
 0x12e   : > { %v1311_v12 = vrot.slane %v1310_v44, 4  ;;  %v689_v19 = vor.u32 %v687_v49, %v686_v62  ;;  %v690_v6 = vrot.slane %v686_v62, 4  ;;  %v4103_v27 = vrot.slane %v3140_v63, 5  ;;  %v7925_v37 = vld [vmem:[#allocation6 + $0x144] ss:$8 sps:$4 sm:$0xff]   ;;  %p8202_p3 = por %p8201_p13, %p8200_p10 }
 0x12f   : > { %v1306_v22 = vsel %vm8553_vm6, %v1301_v60, %v1305_v3  ;;  %v7899_v3 = vld [vmem:[#allocation6 + $0x110] ss:$8 sps:$4 sm:$0xff]   ;;  %v697_v15 = vor.u32 %v695_v4, %v694_v1  ;;  %v699_v44 = vrot.slane %v694_v1, 4  ;;  %v4098_v21 = vrot.slane %v4096_v61, 4  ;;  %v8057_v41 = vld [vmem:[#allocation2 + $0x18] sm:$0xf] }
 0x130   : > { %v1316_v29 = vsel %vm8553_vm6, %v1311_v12, %v1315_v8  ;;  %v3138_v8 = vld [vmem:[#allocation2 + $0x98] sm:$0x1]  ;;  %v860_v13 = vsel %vm8567_vm9, %v689_v19, %v859_v11  ;;  %v9130_v12 = vld [vmem:[#allocation2 + $0x10] sm:$0xf]  ;;  %v4097_v16 = vsel %vm8763_vm13, %v6995_v14, %v4096_v61  ;;  %v9139_v26 = vld [vmem:[#allocation2 + $0x1c] sm:$0xf]  ;;  %p8203_p7 = pnand %p8202_p3, %p8196_p8 }
 0x131   : > { %v6823_v33 = vcombine.low %v1306_v22, %v1316_v29  ;;  %4403 = vmatmul.mubr.bf16.gmra.mrb[32].mxu0 %v7008_v31  ;;  %v698_v30 = vsel %vm8560_vm8, %v690_v6, %v697_v15  ;;  %v864_v60 = vsel %vm8578_vm10, %v699_v44, %v863_v7  ;;  %v6841_v22 = vcombine.low %v8055_v17, %v9130_v12  ;;  %v7907_v29 = vld [vmem:[#allocation6 + $0x120] ss:$8 sps:$4 sm:$0xff]   ;;  %v3143_v55 = vld [vmem:[#allocation2 + $0xac] sm:$0xf]  ;;  %v3144_v34 = vld [vmem:[#allocation2 + $0xb0] sm:$0x1] }
 0x132   : > { %4412 = vmatprep.mubr.bf16.mxu0 %v8301_v0  ;;  %v7010_v31 = vcombine.low %v4090_v2, %v4093_v9  ;;  %861 = vst [vmem:[#allocation2 + $0xc0] sm:$0xf] %v860_v13  ;;  %862 = vst [vmem:[#allocation2 + $0xc4] sm:$0xf] %v698_v30  ;;  %v4099_v56 = vrot.slane %v3138_v8, 5  ;;  %v6842_v10 = vcombine.low %v8057_v41, %v9139_v26  ;;  %v4105_v40 = vrot.slane %v4103_v27, 4 }
 0x133   : > { %1661 = vmatmul.mubr.bf16.gmra.mrb[60].mxu1 %v6823_v33  ;;  %865 = vst [vmem:[#allocation2 + $0xc8] sm:$0x1] %v864_v60  ;;  %v3965_v33 = vld [vmem:[#allocation2 + $0x9c] sm:$0xe]  ;;  %v4106_v45 = vrot.slane %v3141_v47, 5  ;;  %v4110_v57 = vrot.slane %v3143_v55, 5 }
 0x134   : > { %1879 = vmatprep.mubr.bf16.mxu1 %v8301_v0  ;;  %v4100_v59 = vsel %vm8763_vm13, %v4098_v21, %v4099_v56  ;;  %v7923_v20 = vld [vmem:[#allocation6 + $0x140] ss:$8 sps:$4 sm:$0xff]   ;;  %v3966_v50 = vld [vmem:[#allocation2 + $0xa8] sm:$0xe]  ;;  %v7945_v52 = vld [vmem:[#allocation6 + $0x164] ss:$8 sps:$4 sm:$0xff]  }
 0x135   : > { %v7011_v24 = vcombine.low %v4097_v16, %v4100_v59  ;;  %v7933_v49 = vld [vmem:[#allocation6 + $0x150] ss:$8 sps:$4 sm:$0xff]   ;;  %v8059_v4 = vld [vmem:[#allocation2 + $0x24] sm:$0xf]  ;;  %v6997_v9 = vrot.slane %v3966_v50, 9  ;;  %v4112_v61 = vrot.slane %v4110_v57, 4 }
 0x136   : > { %v9148_v62 = vld [vmem:[#allocation2 + $0x28] sm:$0xf]  ;;  %v4113_v11 = vrot.slane %v3144_v34, 5  ;;  %v3146_v7 = vld [vmem:[#allocation2 + $0xb8] sm:$0xf] }
 0x137   : > { %v6843_v1 = vcombine.low %v8059_v4, %v9148_v62  ;;  %v4111_v19 = vsel %vm8763_vm13, %v6997_v9, %v4110_v57  ;;  %v4117_v15 = vrot.slane %v3146_v7, 5  ;;  %v3147_v44 = vld [vmem:[#allocation2 + $0xbc] sm:$0x1]  ;;  %v3967_v8 = vld [vmem:[#allocation2 + $0xb4] sm:$0xe]  ;;  %v7931_v9 = vld [vmem:[#allocation2 + $0x24] sm:$0xff]  }
 0x138   : > { %v4114_v6 = vsel %vm8763_vm13, %v4112_v61, %v4113_v11  ;;  %v7953_v48 = vld [vmem:[#allocation6 + $0x170] ss:$8 sps:$4 sm:$0xff]   ;;  %v7964_v30 = vld [vmem:[#allocation6 + $0x184] ss:$8 sps:$4 sm:$0xff]   ;;  %v9157_v60 = vld [vmem:[#allocation2 + $0x34] sm:$0xf] }
 0x139   : > { %4413 = vmatmul.mubr.bf16.gmra.mrb[36].mxu0 %v7009_v51  ;;  %v8061_v13 = vld [vmem:[#allocation2 + $0x30] sm:$0xf]  ;;  %v4119_v14 = vrot.slane %v4117_v15, 4  ;;  %v4120_v21 = vrot.slane %v3147_v44, 5  ;;  %v3149_v56 = vld [vmem:[#allocation2 + $0xc4] sm:$0xf] }
 0x13a   : > { %4422 = vmatprep.mubr.bf16.mxu0 %v8301_v0  ;;  %v6844_v17 = vcombine.low %v8061_v13, %v9157_v60  ;;  %v3150_v16 = vld [vmem:[#allocation2 + $0xc8] sm:$0x1]  ;;  %v3968_v59 = vld [vmem:[#allocation2 + $0xc0] sm:$0xe]  ;;  %v7926_v57 = vld [vmem:[#allocation2 + $0x18] sm:$0xff]  }
 0x13b   : > { %1880 = vmatmul.mubr.bf16.vlgmr.msra.gmra.mrb[0].mxu1 %v6840_v32  ;;  %v7935_v32 = vld [vmem:[#allocation6 + $0x154] ss:$8 sps:$4 sm:$0xff]   ;;  %v4121_v63 = vsel %vm8763_vm13, %v4119_v14, %v4120_v21  ;;  %v7927_v34 = vld [vmem:[#allocation6 + $0x380] ss:$8 sps:$4 sm:$0xff]   ;;  %v7957_v7 = vld [vmem:[#allocation6 + $0x3b0] ss:$8 sps:$4 sm:$0xff]  }
 0x13c   : > { %2365 = vmatpush1.bf16.msra.mxu1 %v7891_v39  ;;  %1889 = vmatprep.mubr.bf16.mxu1 %v8301_v0  ;;  %v6996_v39 = vrot.slane %v3965_v33, 9  ;;  %v8063_v33 = vld [vmem:[#allocation2 + $0x3c] sm:$0xf]  ;;  %v7939_v50 = vld [vmem:[#allocation6 + $0x394] ss:$8 sps:$4 sm:$0xff]  }
 0x13d   : > { %2366 = vmatprep.subr.bf16.mxu1 %v7901_v38  ;;  %v4107_v38 = vsel %vm8763_vm13, %v4105_v40, %v4106_v45  ;;  %v8065_v40 = vld [vmem:[#allocation2 + $0x48] sm:$0xf]  ;;  %v9175_v45 = vld [vmem:[#allocation2 + $0x4c] sm:$0xf]  ;;  %v8069_v4 = vld [vmem:[#allocation2 + $0x60] sm:$0xf] }
 0x13e   : > { %v4104_v51 = vsel %vm8763_vm13, %v6996_v39, %v4103_v27  ;;  %v9166_v27 = vld [vmem:[#allocation2 + $0x40] sm:$0xf]  ;;  %v6846_v55 = vcombine.low %v8065_v40, %v9175_v45  ;;  %v7959_v11 = vld [vmem:[#allocation6 + $0x3b4] ss:$8 sps:$4 sm:$0xff]   ;;  %v8073_v13 = vld [vmem:[#allocation2 + $0x78] sm:$0xf] }
 0x13f   : > { %v7012_v2 = vcombine.low %v4104_v51, %v4107_v38  ;;  %v6845_v47 = vcombine.low %v8063_v33, %v9166_v27  ;;  %v9180_v51 = vld [vmem:[#allocation2 + $0x58] sm:$0xf]  ;;  %v7992_v21 = vld [vmem:[#allocation6 + $0x3f4] ss:$8 sps:$4 sm:$0xff]   ;;  %v8077_v33 = vld [vmem:[#allocation2 + $0x90] sm:$0xf] }
 0x140   : > { %2367 = vmatpush1.bf16.msra.mxu1 %v7899_v3  ;;  %v7943_v3 = vld [vmem:[#allocation6 + $0x160] ss:$8 sps:$4 sm:$0xff]   ;;  %v8078_v40 = vld [vmem:[#allocation2 + $0x8] sm:$0x1] }
 0x141   : > { %2368 = vmatprep.subr.bf16.mxu1 %v7909_v5  ;;  %4423 = vmatmul.mubr.bf16.gmra.mrb[40].mxu0 %v7010_v31  ;;  %v7955_v5 = vld [vmem:[#allocation6 + $0x174] ss:$8 sps:$4 sm:$0xff]   ;;  %v6998_v31 = vrot.slane %v3967_v8, 9  ;;  %v7947_v61 = vld [vmem:[#allocation6 + $0x3a0] ss:$8 sps:$4 sm:$0xff]  }
 0x142   : > { %4432 = vmatprep.mubr.bf16.mxu0 %v8301_v0  ;;  %v7966_v44 = vld [vmem:[#allocation6 + $0x3c0] ss:$8 sps:$4 sm:$0xff]   ;;  %v7976_v8 = vld [vmem:[#allocation6 + $0x3d4] ss:$8 sps:$4 sm:$0xff]  }
 0x143   : > { %1890 = vmatmul.mubr.bf16.gmra.mrb[4].mxu1 %v6841_v22  ;;  %v7013_v22 = vcombine.low %v4111_v19, %v4114_v6  ;;  %v9190_v19 = vld [vmem:[#allocation2 + $0x70] sm:$0xf]  ;;  %v7982_v14 = vld [vmem:[#allocation6 + $0x3e0] ss:$8 sps:$4 sm:$0xff]  }
 0x144   : > { %1899 = vmatprep.mubr.bf16.mxu1 %v8301_v0  ;;  %2369 = vmatpush1.bf16.msra.mxu1 %v7907_v29  ;;  %v4118_v29 = vsel %vm8763_vm13, %v6998_v31, %v4117_v15  ;;  %v7936_v15 = vld [vmem:[#allocation2 + $0x30] sm:$0xff]   ;;  %v7941_v31 = vld [vmem:[#allocation2 + $0x3c] sm:$0xff]  }
 0x145   : > { %2370 = vmatprep.subr.bf16.mxu1 %v7917_v28  ;;  %v4124_v28 = vrot.slane %v3149_v56, 5  ;;  %v7990_v56 = vld [vmem:[#allocation6 + $0x3f0] ss:$8 sps:$4 sm:$0xff]  }
 0x147   : > { %v4126_v41 = vrot.slane %v4124_v28, 4 }
 0x148   : > { %2371 = vmatpush1.bf16.msra.mxu1 %v7915_v36  ;;  %v7014_v36 = vcombine.low %v4118_v29, %v4121_v63  ;;  %v7999_v29 = vld [vmem:[#allocation6 + $0x404] ss:$8 sps:$4 sm:$0xff]  }
 0x149   : > { %2372 = vmatprep.subr.bf16.mxu1 %v7925_v37  ;;  %4433 = vmatmul.mubr.bf16.gmra.mrb[44].mxu0 %v7011_v24  ;;  %v6999_v37 = vrot.slane %v3968_v59, 9  ;;  %v8075_v63 = vld [vmem:[#allocation2 + $0x84] sm:$0xf]  ;;  %v7946_v59 = vld [vmem:[#allocation2 + $0x48] sm:$0xff]  }
 0x14a   : > { %4442 = vmatprep.mubr.bf16.mxu0 %v8301_v0 }
 0x14b   : > { %1900 = vmatmul.mubr.bf16.gmra.mrb[8].mxu1 %v6842_v10  ;;  %v4127_v10 = vrot.slane %v3150_v16, 5  ;;  %v4125_v24 = vsel %vm8763_vm13, %v6999_v37, %v4124_v28  ;;  %v9200_v28 = vld [vmem:[#allocation2 + $0x88] sm:$0xf]  ;;  %v6853_v37 = vcombine.low %v9032_v25, %v9047_v43  ;;  %v2040_v25 = vld [vmem:[#allocation2] sm:$0xe]  ;;  %v6855_v43 = vcombine.low %v9087_v18, %v9091_v58 }
 0x14c   : > { %1909 = vmatprep.mubr.bf16.mxu1 %v8301_v0  ;;  %2373 = vmatpush1.bf16.msra.mxu1 %v7923_v20  ;;  %v6851_v16 = vcombine.low %v8075_v63, %v9200_v28  ;;  %v2041_v18 = vld [vmem:[#allocation2 + $0xc] sm:$0xe] }
 0x14d   : > { %2374 = vmatprep.subr.bf16.mxu1 %v7935_v32  ;;  %v4128_v39 = vsel %vm8763_vm13, %v4126_v41, %v4127_v10  ;;  %v8067_v32 = vld [vmem:[#allocation2 + $0x54] sm:$0xf]  ;;  %v7956_v41 = vld [vmem:[#allocation2 + $0x60] sm:$0xff]   ;;  %v7961_v10 = vld [vmem:[#allocation2 + $0x6c] sm:$0xff]  }
 0x14e   : > { %v7015_v20 = vcombine.low %v4125_v24, %v4128_v39  ;;  %v6847_v38 = vcombine.low %v8067_v32, %v9180_v51  ;;  %v2093_v24 = vrot.slane %v9115_v54, 5  ;;  %v7965_v39 = vld [vmem:[#allocation2 + $0x78] sm:$0xff]   ;;  %v2100_v54 = vrot.slane %v9130_v12, 5 }
 0x150   : > { %2375 = vmatpush1.bf16.msra.mxu1 %v7933_v49  ;;  %v7937_v49 = vld [vmem:[#allocation6 + $0x390] ss:$8 sps:$4 sm:$0xff]   ;;  %v2095_v32 = vrot.slane %v2093_v24, 4 }
 0x151   : > { %2376 = vmatprep.subr.bf16.mxu1 %v7945_v52  ;;  %4443 = vmatmul.mubr.bf16.gmra.mrb[48].mxu0 %v7012_v2  ;;  %v7949_v52 = vld [vmem:[#allocation6 + $0x3a4] ss:$8 sps:$4 sm:$0xff]  }
 0x152   : > { %4452 = vmatprep.mubr.bf16.mxu0 %v8301_v0 }
 0x153   : > { %1910 = vmatmul.mubr.bf16.gmra.mrb[12].mxu1 %v6843_v1  ;;  %v9185_v1 = vld [vmem:[#allocation2 + $0x64] sm:$0xf] }
 0x154   : > { %1919 = vmatprep.mubr.bf16.mxu1 %v8301_v0  ;;  %2377 = vmatpush1.bf16.msra.mxu1 %v7943_v3  ;;  %v6848_v2 = vcombine.low %v8069_v4, %v9185_v1  ;;  %v7968_v3 = vld [vmem:[#allocation6 + $0x3c4] ss:$8 sps:$4 sm:$0xff]   ;;  %v7972_v4 = vld [vmem:[#allocation6 + $0x194] ss:$8 sps:$4 sm:$0xff]  }
 0x155   : > { %2378 = vmatprep.subr.bf16.mxu1 %v7955_v5  ;;  %v8071_v5 = vld [vmem:[#allocation2 + $0x6c] sm:$0xf] }
 0x156   : > { %v6849_v6 = vcombine.low %v8071_v5, %v9190_v19  ;;  %v7973_v5 = vld [vmem:[#allocation2 + $0x90] sm:$0xff]  }
 0x158   : > { %2379 = vmatpush1.bf16.msra.mxu1 %v7953_v48  ;;  %v7974_v48 = vld [vmem:[#allocation6 + $0x3d0] ss:$8 sps:$4 sm:$0xff]  }
 0x159   : > { %2846 = vmatprep.subr.bf16.mxu1 %v7964_v30  ;;  %4453 = vmatmul.mubr.bf16.gmra.mrb[52].mxu0 %v7013_v22  ;;  %v7984_v30 = vld [vmem:[#allocation6 + $0x3e4] ss:$8 sps:$4 sm:$0xff]  }
 0x15a   : > { %4462 = vmatprep.mubr.bf16.mxu0 %v8301_v0 }
 0x15b   : > { %1920 = vmatmul.mubr.bf16.gmra.mrb[16].mxu1 %v6844_v17  ;;  %v9195_v17 = vld [vmem:[#allocation2 + $0x7c] sm:$0xf] }
 0x15c   : > { %1929 = vmatprep.mubr.bf16.mxu1 %v8301_v0  ;;  %v6850_v22 = vcombine.low %v8073_v13, %v9195_v17 }
 0x161   : > { %4463 = vmatmul.mubr.bf16.gmra.mrb[56].mxu0 %v7014_v36  ;;  %v7951_v36 = vld [vmem:[#allocation2 + $0x54] sm:$0xff]  }
 0x162   : > { %4472 = vmatprep.mubr.bf16.mxu0 %v8301_v0 }
 0x163   : > { %1930 = vmatmul.mubr.bf16.gmra.mrb[20].mxu1 %v6845_v47  ;;  %v6852_v47 = vcombine.low %v8077_v33, %v8991_v35  ;;  %v6854_v35 = vcombine.low %v9063_v53, %v9065_v23 }
 0x164   : > { %1939 = vmatprep.mubr.bf16.mxu1 %v8301_v0 }
 0x169   : > { %4473 = vmatmul.mubr.bf16.gmra.mrb[60].mxu0 %v7015_v20  ;;  %v6872_v20 = vrot.slane %v2040_v25, 9 }
 0x16a   : > { %4805 = vmatprep.mubr.bf16.mxu0 %v8301_v0 }
 0x16b   : > { %1940 = vmatmul.mubr.bf16.gmra.mrb[24].mxu1 %v6846_v55  ;;  %v2096_v55 = vrot.slane %v8078_v40, 5  ;;  %v2094_v53 = vsel %vm8763_vm13, %v6872_v20, %v2093_v24  ;;  %v8008_v24 = vld [vmem:[#allocation6 + $0x1e4] ss:$8 sps:$4 sm:$0xff]  }
 0x16c   : > { %1949 = vmatprep.mubr.bf16.mxu1 %v8301_v0 }
 0x16d   : > { %v2097_v23 = vsel %vm8763_vm13, %v2095_v32, %v2096_v55  ;;  %v8082_v55 = vld [vmem:[#allocation2 + $0x38] sm:$0x1] }
 0x16e   : > { %v6888_v58 = vcombine.low %v2094_v53, %v2097_v23  ;;  %v2124_v20 = vrot.slane %v8082_v55, 5  ;;  %v8006_v32 = vld [vmem:[#allocation6 + $0x1e0] ss:$8 sps:$4 sm:$0xff]   ;;  %v8014_v53 = vld [vmem:[#allocation6 + $0x1f4] ss:$8 sps:$4 sm:$0xff]   ;;  %v2128_v23 = vrot.slane %v9166_v27, 5 }
 0x16f   : > { %v7985_v27 = vld [vmem:[#allocation2 + $0xb4] sm:$0xff]  }
 0x171   : > { %4806 = vmatmul.mubr.bf16.vlgmr.msra.gmra.mrb[0].mxu0 %v7926_v57  ;;  %v7962_v57 = vld [vmem:[#allocation6 + $0x180] ss:$8 sps:$4 sm:$0xff]  }
 0x172   : > { %5624 = vmatpush1.bf16.msra.mxu0 %v7927_v34  ;;  %4815 = vmatprep.mubr.bf16.mxu0 %v8301_v0  ;;  %v6873_v34 = vrot.slane %v2041_v18, 9  ;;  %v2045_v18 = vld [vmem:[#allocation2 + $0x3c] sm:$0xe] }
 0x173   : > { %1950 = vmatmul.mubr.bf16.gmra.mrb[28].mxu1 %v6847_v38  ;;  %5625 = vmatprep.subr.bf16.mxu0 %v7939_v50  ;;  %v7969_v38 = vld [vmem:[#allocation2 + $0x84] sm:$0xff]   ;;  %v2102_v50 = vrot.slane %v2100_v54, 4 }
 0x174   : > { %1959 = vmatprep.mubr.bf16.mxu1 %v8301_v0 }
 0x176   : > { %5626 = vmatpush1.bf16.msra.mxu0 %v7937_v49  ;;  %v8079_v49 = vld [vmem:[#allocation2 + $0x14] sm:$0x1] }
 0x177   : > { %5627 = vmatprep.subr.bf16.mxu0 %v7949_v52  ;;  %v2103_v52 = vrot.slane %v8079_v49, 5 }
 0x179   : > { %4816 = vmatmul.mubr.bf16.gmra.mrb[4].mxu0 %v7931_v9  ;;  %v2104_v12 = vsel %vm8763_vm13, %v2102_v50, %v2103_v52  ;;  %v2107_v9 = vrot.slane %v9139_v26, 5  ;;  %v8083_v50 = vld [vmem:[#allocation2 + $0x44] sm:$0x1]  ;;  %v5030_v52 = vld [vmem:[#allocation2 + $0x18] sm:$0xf] }
 0x17a   : > { %4825 = vmatprep.mubr.bf16.mxu0 %v8301_v0  ;;  %5628 = vmatpush1.bf16.msra.mxu0 %v7947_v61  ;;  %v7970_v61 = vld [vmem:[#allocation6 + $0x190] ss:$8 sps:$4 sm:$0xff]   ;;  %v2131_v49 = vrot.slane %v8083_v50, 5 }
 0x17b   : > { %1960 = vmatmul.mubr.bf16.gmra.mrb[32].mxu1 %v6848_v2  ;;  %5629 = vmatprep.subr.bf16.mxu0 %v7959_v11  ;;  %v2101_v2 = vsel %vm8763_vm13, %v6873_v34, %v2100_v54  ;;  %v2042_v11 = vld [vmem:[#allocation2 + $0x18] sm:$0xe]  ;;  %v2130_v34 = vrot.slane %v2128_v23, 4 }
 0x17c   : > { %1969 = vmatprep.mubr.bf16.mxu1 %v8301_v0 }
 0x17e   : > { %5630 = vmatpush1.bf16.msra.mxu0 %v7957_v7  ;;  %v7980_v7 = vld [vmem:[#allocation6 + $0x1a4] ss:$8 sps:$4 sm:$0xff]  }
 0x17f   : > { %5631 = vmatprep.subr.bf16.mxu0 %v7968_v3  ;;  %v6889_v3 = vcombine.low %v2101_v2, %v2104_v12  ;;  %v8084_v2 = vld [vmem:[#allocation6 + $0x204] ss:$8 sps:$4 sm:$0xff]  }
 0x181   : > { %4826 = vmatmul.mubr.bf16.gmra.mrb[8].mxu0 %v7936_v15  ;;  %v2109_v15 = vrot.slane %v2107_v9, 4 }
 0x182   : > { %4835 = vmatprep.mubr.bf16.mxu0 %v8301_v0  ;;  %5632 = vmatpush1.bf16.msra.mxu0 %v7966_v44  ;;  %v8080_v44 = vld [vmem:[#allocation2 + $0x20] sm:$0x1] }
 0x183   : > { %1970 = vmatmul.mubr.bf16.gmra.mrb[36].mxu1 %v6849_v6  ;;  %5633 = vmatprep.subr.bf16.mxu0 %v7976_v8  ;;  %v6874_v6 = vrot.slane %v2042_v11, 9  ;;  %v2110_v8 = vrot.slane %v8080_v44, 5  ;;  %v2046_v11 = vld [vmem:[#allocation2 + $0x48] sm:$0xe] }
 0x184   : > { %1979 = vmatprep.mubr.bf16.mxu1 %v8301_v0  ;;  %v5034_v44 = vld [vmem:[#allocation2 + $0x28] sm:$0xf] }
 0x185   : > { %v2108_v26 = vsel %vm8763_vm13, %v6874_v6, %v2107_v9  ;;  %v2111_v13 = vsel %vm8763_vm13, %v2109_v15, %v2110_v8  ;;  %v2132_v9 = vsel %vm8763_vm13, %v2130_v34, %v2131_v49  ;;  %v5033_v15 = vld [vmem:[#allocation2 + $0x24] sm:$0xf] }
 0x186   : > { %5634 = vmatpush1.bf16.msra.mxu0 %v7974_v48  ;;  %v7978_v48 = vld [vmem:[#allocation6 + $0x1a0] ss:$8 sps:$4 sm:$0xff]  }
 0x187   : > { %5635 = vmatprep.subr.bf16.mxu0 %v7984_v30  ;;  %v7988_v30 = vld [vmem:[#allocation6 + $0x1b4] ss:$8 sps:$4 sm:$0xff]  }
 0x189   : > { %4836 = vmatmul.mubr.bf16.gmra.mrb[12].mxu0 %v7941_v31  ;;  %v2043_v31 = vld [vmem:[#allocation2 + $0x24] sm:$0xe] }
 0x18a   : > { %4845 = vmatprep.mubr.bf16.mxu0 %v8301_v0  ;;  %5636 = vmatpush1.bf16.msra.mxu0 %v7982_v14  ;;  %v7986_v14 = vld [vmem:[#allocation6 + $0x1b0] ss:$8 sps:$4 sm:$0xff]   ;;  %v6875_v63 = vrot.slane %v2043_v31, 9 }
 0x18b   : > { %1980 = vmatmul.mubr.bf16.gmra.mrb[40].mxu1 %v6850_v22  ;;  %5637 = vmatprep.subr.bf16.mxu0 %v7992_v21  ;;  %v2114_v22 = vrot.slane %v9148_v62, 5  ;;  %v7996_v21 = vld [vmem:[#allocation6 + $0x1c4] ss:$8 sps:$4 sm:$0xff]  }
 0x18c   : > { %1989 = vmatprep.mubr.bf16.mxu1 %v8301_v0 }
 0x18d   : > { %v2115_v62 = vsel %vm8763_vm13, %v6875_v63, %v2114_v22  ;;  %v5106_v63 = vshll.u32 %v5033_v15, 16 }
 0x18e   : > { %5638 = vmatpush1.bf16.msra.mxu0 %v7990_v56  ;;  %v6890_v56 = vcombine.low %v2108_v26, %v2111_v13  ;;  %v8085_v26 = vld [vmem:[#allocation2 + $0x50] sm:$0x1] }
 0x18f   : > { %6217 = vmatprep.subr.bf16.mxu0 %v7999_v29  ;;  %v7977_v29 = vld [vmem:[#allocation2 + $0x9c] sm:$0xff]   ;;  %v2138_v13 = vrot.slane %v8085_v26, 5 }
 0x191   : > { %4846 = vmatmul.mubr.bf16.gmra.mrb[16].mxu0 %v7946_v59  ;;  %v8081_v59 = vld [vmem:[#allocation2 + $0x2c] sm:$0x1] }
 0x192   : > { %4855 = vmatprep.mubr.bf16.mxu0 %v8301_v0  ;;  %v2117_v33 = vrot.slane %v8081_v59, 5  ;;  %v5116_v59 = vshrl.u32 %v5034_v44, 16 }
 0x193   : > { %1990 = vmatmul.mubr.bf16.gmra.mrb[44].mxu1 %v6851_v16  ;;  %v2116_v16 = vrot.slane %v2114_v22, 4  ;;  %v7989_v22 = vld [vmem:[#allocation2 + $0xc0] sm:$0xff]  }
 0x194   : > { %1999 = vmatprep.mubr.bf16.mxu1 %v8301_v0 }
 0x199   : > { %4856 = vmatmul.mubr.bf16.gmra.mrb[20].mxu0 %v7951_v36  ;;  %v8002_v36 = vld [vmem:[#allocation6 + $0x1d4] ss:$8 sps:$4 sm:$0xff]  }
 0x19a   : > { %4865 = vmatprep.mubr.bf16.mxu0 %v8301_v0 }
 0x19b   : > { %2000 = vmatmul.mubr.bf16.gmra.mrb[48].mxu1 %v6852_v47  ;;  %v7994_v47 = vld [vmem:[#allocation6 + $0x1c0] ss:$8 sps:$4 sm:$0xff]  }
 0x19c   : > { %2009 = vmatprep.mubr.bf16.mxu1 %v8301_v0 }
 0x1a1   : > { %4866 = vmatmul.mubr.bf16.gmra.mrb[24].mxu0 %v7956_v41  ;;  %v2121_v41 = vrot.slane %v9157_v60, 5 }
 0x1a2   : > { %4875 = vmatprep.mubr.bf16.mxu0 %v8301_v0 }
 0x1a3   : > { %2010 = vmatmul.mubr.bf16.gmra.mrb[52].mxu1 %v6853_v37  ;;  %v2118_v37 = vsel %vm8763_vm13, %v2116_v16, %v2117_v33  ;;  %v2123_v40 = vrot.slane %v2121_v41, 4  ;;  %v5112_v16 = vshll.u32 %v5034_v44, 16 }
 0x1a4   : > { %2019 = vmatprep.mubr.bf16.mxu1 %v8301_v0  ;;  %v6891_v25 = vcombine.low %v2115_v62, %v2118_v37 }
 0x1a5   : > { %v2125_v54 = vsel %vm8763_vm13, %v2123_v40, %v2124_v20  ;;  %v8086_v40 = vld [vmem:[#allocation2 + $0x5c] sm:$0x1] }
 0x1a6   : > { %v2145_v55 = vrot.slane %v8086_v40, 5  ;;  %v8088_v40 = vld [vmem:[#allocation2 + $0x74] sm:$0x1] }
 0x1a9   : > { %4876 = vmatmul.mubr.bf16.gmra.mrb[28].mxu0 %v7961_v10  ;;  %v8000_v10 = vld [vmem:[#allocation6 + $0x1d0] ss:$8 sps:$4 sm:$0xff]  }
 0x1aa   : > { %4885 = vmatprep.mubr.bf16.mxu0 %v8301_v0 }
 0x1ab   : > { %2020 = vmatmul.mubr.bf16.gmra.mrb[56].mxu1 %v6854_v35  ;;  %v2044_v35 = vld [vmem:[#allocation2 + $0x30] sm:$0xe] }
 0x1ac   : > { %2029 = vmatprep.mubr.bf16.mxu1 %v8301_v0 }
 0x1b1   : > { %4886 = vmatmul.mubr.bf16.gmra.mrb[32].mxu0 %v7965_v39  ;;  %v6876_v39 = vrot.slane %v2044_v35, 9 }
 0x1b2   : > { %4895 = vmatprep.mubr.bf16.mxu0 %v8301_v0 }
 0x1b3   : > { %2030 = vmatmul.mubr.bf16.gmra.mrb[60].mxu1 %v6855_v43  ;;  %v7981_v43 = vld [vmem:[#allocation2 + $0xa8] sm:$0xff]   ;;  %v2122_v60 = vsel %vm8763_vm13, %v6876_v39, %v2121_v41 }
 0x1b4   : > { %2396 = vmatprep.mubr.bf16.mxu1 %v8301_v0 }
 0x1b9   : > { %4896 = vmatmul.mubr.bf16.gmra.mrb[36].mxu0 %v7969_v38  ;;  %v6892_v38 = vcombine.low %v2122_v60, %v2125_v54  ;;  %v5037_v60 = vld [vmem:[#allocation2 + $0x34] sm:$0xf] }
 0x1ba   : > { %4905 = vmatprep.mubr.bf16.mxu0 %v8301_v0 }
 0x1bb   : > { %2397 = vmatmul.mubr.bf16.vlgmr.msra.gmra.mrb[0].mxu1 %v6888_v58  ;;  %v8012_v58 = vld [vmem:[#allocation6 + $0x1f0] ss:$8 sps:$4 sm:$0xff]  }
 0x1bc   : > { %2847 = vmatpush1.bf16.msra.mxu1 %v7962_v57  ;;  %2406 = vmatprep.mubr.bf16.mxu1 %v8301_v0  ;;  %v6877_v57 = vrot.slane %v2045_v18, 9 }
 0x1bd   : > { %2848 = vmatprep.subr.bf16.mxu1 %v7972_v4  ;;  %v5031_v4 = vld [vmem:[#allocation2 + $0x1c] sm:$0xf] }
 0x1be   : > { %v2129_v12 = vsel %vm8763_vm13, %v6877_v57, %v2128_v23  ;;  %v5092_v6 = vshrl.u32 %v5031_v4, 16  ;;  %v5036_v23 = vld [vmem:[#allocation2 + $0x30] sm:$0xf]  ;;  %v2149_v57 = vrot.slane %v9185_v1, 5 }
 0x1bf   : > { %v6893_v8 = vcombine.low %v2129_v12, %v2132_v9 }
 0x1c0   : > { %2849 = vmatpush1.bf16.msra.mxu1 %v7970_v61  ;;  %v2135_v61 = vrot.slane %v9175_v45, 5 }
 0x1c1   : > { %2850 = vmatprep.subr.bf16.mxu1 %v7980_v7  ;;  %4906 = vmatmul.mubr.bf16.gmra.mrb[40].mxu0 %v7973_v5  ;;  %v5079_v7 = vshrl.u32 %v5030_v52, 16  ;;  %v5088_v5 = vshll.u32 %v5031_v4, 16  ;;  %v5136_v4 = vshll.u32 %v5037_v60, 16 }
 0x1c2   : > { %4915 = vmatprep.mubr.bf16.mxu0 %v8301_v0 }
 0x1c3   : > { %2407 = vmatmul.mubr.bf16.gmra.mrb[4].mxu1 %v6889_v3  ;;  %v5082_v3 = vshll.u32 %v5030_v52, 16  ;;  %v5081_v31 = vrot.slane %v5079_v7, 4  ;;  %v9261_v45 = vrot.slane %v5088_v5, 5  ;;  %v5130_v52 = vshll.u32 %v5036_v23, 16 }
 0x1c4   : > { %2416 = vmatprep.mubr.bf16.mxu1 %v8301_v0  ;;  %2851 = vmatpush1.bf16.msra.mxu1 %v7978_v48  ;;  %v6878_v48 = vrot.slane %v2046_v11, 9  ;;  %v2151_v5 = vrot.slane %v2149_v57, 4 }
 0x1c5   : > { %2852 = vmatprep.subr.bf16.mxu1 %v7988_v30  ;;  %v2137_v30 = vrot.slane %v2135_v61, 4 }
 0x1c6   : > { %v2136_v33 = vsel %vm8763_vm13, %v6878_v48, %v2135_v61  ;;  %v8087_v61 = vld [vmem:[#allocation2 + $0x68] sm:$0x1]  ;;  %v5132_v48 = vrot.slane %v5130_v52, 5 }
 0x1c7   : > { %v2139_v62 = vsel %vm8763_vm13, %v2137_v30, %v2138_v13  ;;  %v2152_v11 = vrot.slane %v8087_v61, 5  ;;  %v9286_v30 = vrot.slane %v5136_v4, 5  ;;  %v2050_v4 = vld [vmem:[#allocation2 + $0x78] sm:$0xe] }
 0x1c8   : > { %2853 = vmatpush1.bf16.msra.mxu1 %v7986_v14  ;;  %v5084_v14 = vrot.slane %v5082_v3, 5  ;;  %v6894_v20 = vcombine.low %v2136_v33, %v2139_v62  ;;  %v2049_v33 = vld [vmem:[#allocation2 + $0x6c] sm:$0xe] }
 0x1c9   : > { %2854 = vmatprep.subr.bf16.mxu1 %v7996_v21  ;;  %4916 = vmatmul.mubr.bf16.gmra.mrb[44].mxu0 %v7977_v29  ;;  %v5094_v21 = vrot.slane %v5092_v6, 4  ;;  %v5103_v29 = vshrl.u32 %v5033_v15, 16 }
 0x1ca   : > { %4925 = vmatprep.mubr.bf16.mxu0 %v8301_v0  ;;  %v5085_v37 = vor.u32 %v5084_v14, %v5081_v31  ;;  %v9288_v31 = vld [vmem:[#allocation2 + $0x38] sm:$0x1] }
 0x1cb   : > { %2417 = vmatmul.mubr.bf16.gmra.mrb[8].mxu1 %v6890_v56  ;;  %v5032_v56 = vld [vmem:[#allocation2 + $0x20] sm:$0x1]  ;;  %v5095_v41 = vor.u32 %v5094_v21, %v9261_v45  ;;  %v5039_v21 = vld [vmem:[#allocation2 + $0x3c] sm:$0xf] }
 0x1cc   : > { %2426 = vmatprep.mubr.bf16.mxu1 %v8301_v0  ;;  %2855 = vmatpush1.bf16.msra.mxu1 %v7994_v47  ;;  %v2047_v47 = vld [vmem:[#allocation2 + $0x54] sm:$0xe]  ;;  %v5098_v35 = vshll.u32 %v5032_v56, 16  ;;  %v5086_v54 = vrot.slane %v5085_v37, 4  ;;  %v7997_v14 = vld [vmem:[#allocation6 + $0x400] ss:$8 sps:$4 sm:$0xff]  }
 0x1cd   : > { %2856 = vmatprep.subr.bf16.mxu1 %v8002_v36  ;;  %v2142_v36 = vrot.slane %v9180_v51, 5  ;;  %v6879_v39 = vrot.slane %v2047_v47, 9  ;;  %v5035_v51 = vld [vmem:[#allocation2 + $0x2c] sm:$0x1]  ;;  %v5096_v18 = vrot.slane %v5095_v41, 4  ;;  %v5146_v37 = vshll.u32 %v9288_v31, 16 }
 0x1ce   : > { %v5122_v49 = vshll.u32 %v5035_v51, 16  ;;  %v5091_v7 = vsel %vm8553_vm6, %v5086_v54, %v9261_v45  ;;  %v9290_v56 = vld [vmem:[#allocation2 + $0x40] sm:$0xf]  ;;  %v5151_v41 = vshrl.u32 %v5039_v21, 16  ;;  %v8011_v51 = vld [vmem:[#allocation6 + $0x424] ss:$8 sps:$4 sm:$0xff]  }
 0x1cf   : > { %v2143_v12 = vsel %vm8763_vm13, %v6879_v39, %v2142_v36 }
 0x1d0   : > { %2857 = vmatpush1.bf16.msra.mxu1 %v8000_v10  ;;  %v5105_v10 = vrot.slane %v5103_v29, 4  ;;  %v5124_v44 = vrot.slane %v5122_v49, 5  ;;  %v2153_v29 = vsel %vm8763_vm13, %v2151_v5, %v2152_v11  ;;  %v8009_v49 = vld [vmem:[#allocation6 + $0x420] ss:$8 sps:$4 sm:$0xff]  }
 0x1d1   : > { %2858 = vmatprep.subr.bf16.mxu1 %v8008_v24  ;;  %4926 = vmatmul.mubr.bf16.gmra.mrb[48].mxu0 %v7981_v43  ;;  %v5108_v24 = vrot.slane %v5106_v63, 5  ;;  %v5118_v43 = vrot.slane %v5116_v59, 4  ;;  %v2156_v63 = vrot.slane %v9190_v19, 5  ;;  %v8005_v59 = vld [vmem:[#allocation6 + $0x414] ss:$8 sps:$4 sm:$0xff]   ;;  %v5160_v19 = vshll.u32 %v9290_v56, 16 }
 0x1d2   : > { %4935 = vmatprep.mubr.bf16.mxu0 %v8301_v0 }
 0x1d3   : > { %2427 = vmatmul.mubr.bf16.gmra.mrb[12].mxu1 %v6891_v25  ;;  %v9271_v25 = vrot.slane %v5112_v16, 5  ;;  %v5109_v34 = vor.u32 %v5108_v24, %v5105_v10  ;;  %v5164_v10 = vshrl.u32 %v9290_v56, 16  ;;  %v8003_v24 = vld [vmem:[#allocation6 + $0x410] ss:$8 sps:$4 sm:$0xff]   ;;  %v2158_v39 = vrot.slane %v2156_v63, 4 }
 0x1d4   : > { %2436 = vmatprep.mubr.bf16.mxu1 %v8301_v0  ;;  %2859 = vmatpush1.bf16.msra.mxu1 %v8006_v32  ;;  %v2144_v32 = vrot.slane %v2142_v36, 4 }
 0x1d5   : > { %2860 = vmatprep.subr.bf16.mxu1 %v8014_v53  ;;  %v7993_v53 = vld [vmem:[#allocation2 + $0xcc] sm:$0xff]   ;;  %v5119_v50 = vor.u32 %v5118_v43, %v9271_v25  ;;  %v5110_v6 = vrot.slane %v5109_v34, 4  ;;  %v6881_v43 = vrot.slane %v2049_v33, 9  ;;  %v5042_v34 = vld [vmem:[#allocation2 + $0x48] sm:$0xf] }
 0x1d6   : > { %v2146_v9 = vsel %vm8763_vm13, %v2144_v32, %v2145_v55  ;;  %v2159_v55 = vrot.slane %v8088_v40, 5  ;;  %v5175_v11 = vshrl.u32 %v5042_v34, 16 }
 0x1d7   : > { %v5120_v15 = vrot.slane %v5119_v50, 4  ;;  %v6895_v13 = vcombine.low %v2143_v12, %v2146_v9  ;;  %v5115_v16 = vsel %vm8553_vm6, %v5110_v6, %v9271_v25  ;;  %v9313_v50 = vld [vmem:[#allocation2 + $0x4c] sm:$0xf]  ;;  %v6882_v6 = vrot.slane %v2050_v4, 9  ;;  %v5048_v4 = vld [vmem:[#allocation2 + $0x60] sm:$0xf] }
 0x1d8   : > { %2861 = vmatpush1.bf16.msra.mxu1 %v8012_v58  ;;  %v5100_v58 = vrot.slane %v5098_v35, 5  ;;  %v5154_v35 = vshll.u32 %v5039_v21, 16  ;;  %v2160_v52 = vsel %vm8763_vm13, %v2158_v39, %v2159_v55  ;;  %v5188_v5 = vshrl.u32 %v9313_v50, 16  ;;  %v2051_v39 = vld [vmem:[#allocation2 + $0x84] sm:$0xe] }
 0x1d9   : > { %7187 = vmatprep.subr.bf16.mxu1 %v8084_v2  ;;  %4936 = vmatmul.mubr.bf16.gmra.mrb[52].mxu0 %v7985_v27  ;;  %v5127_v27 = vshrl.u32 %v5036_v23, 16  ;;  %v5140_v2 = vshrl.u32 %v5037_v60, 16  ;;  %v5125_v47 = vsel %vm8553_vm6, %v5120_v15, %v5124_v44  ;;  %v5148_v23 = vrot.slane %v5146_v37, 5  ;;  %v8089_v44 = vld [vmem:[#allocation2 + $0x80] sm:$0x1] }
 0x1da   : > { %4945 = vmatprep.mubr.bf16.mxu0 %v8301_v0  ;;  %v5101_v3 = vsel %vm8553_vm6, %v5096_v18, %v5100_v58  ;;  %v5153_v60 = vrot.slane %v5151_v41, 4  ;;  %v5156_v54 = vrot.slane %v5154_v35, 5  ;;  %v9308_v18 = vrot.slane %v5160_v19, 5  ;;  %v8019_v35 = vld [vmem:[#allocation6 + $0x440] ss:$8 sps:$4 sm:$0xff]  }
 0x1db   : > { %2437 = vmatmul.mubr.bf16.gmra.mrb[16].mxu1 %v6892_v38  ;;  %v2048_v38 = vld [vmem:[#allocation2 + $0x60] sm:$0xe]  ;;  %v5142_v26 = vrot.slane %v5140_v2, 4  ;;  %v5166_v58 = vrot.slane %v5164_v10, 4  ;;  %v8026_v19 = vld [vmem:[#allocation6 + $0x454] ss:$8 sps:$4 sm:$0xff]  }
 0x1dc   : > { %2446 = vmatprep.mubr.bf16.mxu1 %v8301_v0  ;;  %v6880_v1 = vrot.slane %v2048_v38, 9  ;;  %v2163_v38 = vrot.slane %v9195_v17, 5  ;;  %v8017_v17 = vld [vmem:[#allocation6 + $0x434] ss:$8 sps:$4 sm:$0xff]   ;;  %v5157_v9 = vor.u32 %v5156_v54, %v5153_v60  ;;  %v8024_v60 = vld [vmem:[#allocation6 + $0x450] ss:$8 sps:$4 sm:$0xff]  }
 0x1dd   : > { %v5143_v62 = vor.u32 %v5142_v26, %v9286_v30  ;;  %v5045_v26 = vld [vmem:[#allocation2 + $0x54] sm:$0xf]  ;;  %v8090_v54 = vld [vmem:[#allocation2 + $0x8c] sm:$0x1] }
 0x1de   : > { %v2150_v45 = vsel %vm8763_vm13, %v6880_v1, %v2149_v57  ;;  %v9311_v57 = vld [vmem:[#allocation2 + $0x44] sm:$0x1]  ;;  %v5167_v1 = vor.u32 %v5166_v58, %v9308_v18  ;;  %v2165_v15 = vrot.slane %v2163_v38, 4  ;;  %v5158_v21 = vrot.slane %v5157_v9, 4  ;;  %v9354_v58 = vld [vmem:[#allocation2 + $0x5c] sm:$0x1] }
 0x1df   : > { %v6896_v25 = vcombine.low %v2150_v45, %v2153_v29  ;;  %v5170_v61 = vshll.u32 %v9311_v57, 16  ;;  %v2164_v10 = vsel %vm8763_vm13, %v6882_v6, %v2163_v38  ;;  %v8031_v38 = vld [vmem:[#allocation6 + $0x464] ss:$8 sps:$4 sm:$0xff]   ;;  %v8029_v6 = vld [vmem:[#allocation6 + $0x460] ss:$8 sps:$4 sm:$0xff]  }
 0x1e0   : > { %v5168_v45 = vrot.slane %v5167_v1, 4  ;;  %v2052_v1 = vld [vmem:[#allocation2 + $0x90] sm:$0xe] }
 0x1e1   : > { %4946 = vmatmul.mubr.bf16.gmra.mrb[56].mxu0 %v7989_v22  ;;  %v7064_v22 = vcombine.low %v5091_v7, %v5101_v3  ;;  %v5178_v7 = vshll.u32 %v5042_v34, 16  ;;  %v5184_v3 = vshll.u32 %v9313_v50, 16  ;;  %v5172_v29 = vrot.slane %v5170_v61, 5  ;;  %v8091_v61 = vld [vmem:[#allocation2 + $0x94] sm:$0xf] }
 0x1e2   : > { %4955 = vmatprep.mubr.bf16.mxu0 %v8301_v0 }
 0x1e3   : > { %2447 = vmatmul.mubr.bf16.gmra.mrb[20].mxu1 %v6893_v8  ;;  %v5129_v8 = vrot.slane %v5127_v27, 4  ;;  %v2157_v27 = vsel %vm8763_vm13, %v6881_v43, %v2156_v63  ;;  %v9332_v63 = vld [vmem:[#allocation2 + $0x50] sm:$0x1]  ;;  %v9334_v33 = vrot.slane %v5184_v3, 5  ;;  %v5163_v43 = vsel %vm8553_vm6, %v5158_v21, %v9308_v18  ;;  %v8092_v21 = vld [vmem:[#allocation2 + $0x98] sm:$0x1] }
 0x1e4   : > { %2456 = vmatprep.mubr.bf16.mxu1 %v8301_v0  ;;  %v5173_v40 = vsel %vm8553_vm6, %v5168_v45, %v5172_v29  ;;  %v2173_v18 = vrot.slane %v8090_v54, 5  ;;  %v2180_v45 = vrot.slane %v8092_v21, 5  ;;  %v2054_v21 = vld [vmem:[#allocation2 + $0xa8] sm:$0xe] }
 0x1e5   : > { %v5133_v36 = vor.u32 %v5132_v48, %v5129_v8  ;;  %v2166_v8 = vrot.slane %v8089_v44, 5  ;;  %v8015_v48 = vld [vmem:[#allocation6 + $0x430] ss:$8 sps:$4 sm:$0xff]   ;;  %v5226_v44 = vshll.u32 %v5048_v4, 16 }
 0x1e7   : > { %v5134_v32 = vrot.slane %v5133_v36, 4  ;;  %v5199_v36 = vshrl.u32 %v5045_v26, 16 }
 0x1e9   : > { %4956 = vmatmul.mubr.bf16.gmra.mrb[60].mxu0 %v7993_v53  ;;  %v5144_v53 = vrot.slane %v5143_v62, 4  ;;  %v5139_v2 = vsel %vm8553_vm6, %v5134_v32, %v9286_v30  ;;  %v6897_v30 = vcombine.low %v2157_v27, %v2160_v52  ;;  %v5202_v62 = vshll.u32 %v5045_v26, 16 }
 0x1ea   : > { %5655 = vmatprep.mubr.bf16.mxu0 %v8301_v0  ;;  %v5201_v32 = vrot.slane %v5199_v36, 4  ;;  %v7067_v52 = vcombine.low %v5163_v43, %v5173_v40  ;;  %v9375_v43 = vld [vmem:[#allocation2 + $0x68] sm:$0x1] }
 0x1eb   : > { %2457 = vmatmul.mubr.bf16.gmra.mrb[24].mxu1 %v6894_v20  ;;  %v7065_v20 = vcombine.low %v5115_v16, %v5125_v47  ;;  %v5149_v12 = vsel %vm8553_vm6, %v5144_v53, %v5148_v23  ;;  %v5177_v16 = vrot.slane %v5175_v11, 4  ;;  %v5190_v47 = vrot.slane %v5188_v5, 4 }
 0x1ec   : > { %2466 = vmatprep.mubr.bf16.mxu1 %v8301_v0  ;;  %v5204_v53 = vrot.slane %v5202_v62, 5  ;;  %v2177_v11 = vrot.slane %v8091_v61, 5  ;;  %v5218_v5 = vshll.u32 %v9354_v58, 16 }
 0x1ee   : > { %v5220_v62 = vrot.slane %v5218_v5, 5 }
 0x1f1   : > { %5656 = vmatmul.mubr.bf16.vlgmr.msra.gmra.mrb[0].mxu0 %v7064_v22  ;;  %v8021_v22 = vld [vmem:[#allocation6 + $0x444] ss:$8 sps:$4 sm:$0xff]  }
 0x1f2   : > { %6218 = vmatpush1.bf16.msra.mxu0 %v7997_v14  ;;  %5665 = vmatprep.mubr.bf16.mxu0 %v8301_v0  ;;  %v7066_v14 = vcombine.low %v5139_v2, %v5149_v12  ;;  %v9356_v2 = vld [vmem:[#allocation2 + $0x64] sm:$0xf] }
 0x1f3   : > { %2467 = vmatmul.mubr.bf16.gmra.mrb[28].mxu1 %v6895_v13  ;;  %6219 = vmatprep.subr.bf16.mxu0 %v8005_v59  ;;  %v9330_v13 = vld [vmem:[#allocation2 + $0x58] sm:$0xf]  ;;  %v5180_v59 = vrot.slane %v5178_v7, 5  ;;  %v5205_v7 = vor.u32 %v5204_v53, %v5201_v32  ;;  %v2053_v53 = vld [vmem:[#allocation2 + $0x9c] sm:$0xe] }
 0x1f4   : > { %2476 = vmatprep.mubr.bf16.mxu1 %v8301_v0  ;;  %v5208_v37 = vshll.u32 %v9330_v13, 16  ;;  %v5212_v41 = vshrl.u32 %v9330_v13, 16 }
 0x1f5   : > { %v5181_v55 = vor.u32 %v5180_v59, %v5177_v16  ;;  %v2179_v59 = vrot.slane %v2177_v11, 4 }
 0x1f6   : > { %6220 = vmatpush1.bf16.msra.mxu0 %v8003_v24  ;;  %v2167_v24 = vsel %vm8763_vm13, %v2165_v15, %v2166_v8  ;;  %v5214_v23 = vrot.slane %v5212_v41, 4  ;;  %v5223_v15 = vshrl.u32 %v5048_v4, 16  ;;  %v5232_v8 = vshll.u32 %v9356_v2, 16 }
 0x1f7   : > { %6221 = vmatprep.subr.bf16.mxu0 %v8011_v51  ;;  %v5191_v51 = vor.u32 %v5190_v47, %v9334_v33  ;;  %v6898_v34 = vcombine.low %v2164_v10, %v2167_v24  ;;  %v5206_v47 = vrot.slane %v5205_v7, 4 }
 0x1f8   : > { %v5225_v41 = vrot.slane %v5223_v15, 4  ;;  %v9396_v15 = vld [vmem:[#allocation2 + $0x74] sm:$0x1] }
 0x1f9   : > { %5666 = vmatmul.mubr.bf16.gmra.mrb[4].mxu0 %v7065_v20  ;;  %v5194_v20 = vshll.u32 %v9332_v63, 16  ;;  %v5192_v12 = vrot.slane %v5191_v51, 4  ;;  %v8093_v51 = vld [vmem:[#allocation2 + $0xa0] sm:$0xf] }
 0x1fa   : > { %5675 = vmatprep.mubr.bf16.mxu0 %v8301_v0  ;;  %6222 = vmatpush1.bf16.msra.mxu0 %v8009_v49  ;;  %v6883_v49 = vrot.slane %v2051_v39, 9  ;;  %v9377_v39 = vld [vmem:[#allocation2 + $0x70] sm:$0xf] }
 0x1fb   : > { %2477 = vmatmul.mubr.bf16.gmra.mrb[32].mxu1 %v6896_v25  ;;  %6223 = vmatprep.subr.bf16.mxu0 %v8017_v17  ;;  %v2170_v25 = vrot.slane %v9200_v28, 5  ;;  %v9352_v28 = vrot.slane %v5208_v37, 5  ;;  %v5182_v17 = vrot.slane %v5181_v55, 4  ;;  %v5196_v9 = vrot.slane %v5194_v20, 5  ;;  %v8034_v37 = vld [vmem:[#allocation6 + $0x470] ss:$8 sps:$4 sm:$0xff]  }
 0x1fc   : > { %2486 = vmatprep.mubr.bf16.mxu1 %v8301_v0  ;;  %v2181_v55 = vsel %vm8763_vm13, %v2179_v59, %v2180_v45  ;;  %v2184_v20 = vrot.slane %v8093_v51, 5  ;;  %v5266_v59 = vshll.u32 %v9396_v15, 16 }
 0x1fd   : > { %v2172_v27 = vrot.slane %v2170_v25, 4  ;;  %v5215_v3 = vor.u32 %v5214_v23, %v9352_v28  ;;  %v2171_v26 = vsel %vm8763_vm13, %v6883_v49, %v2170_v25  ;;  %v5187_v29 = vsel %vm8553_vm6, %v5182_v17, %v9334_v33  ;;  %v5051_v33 = vld [vmem:[#allocation2 + $0x6c] sm:$0xf]  ;;  %v8094_v17 = vld [vmem:[#allocation2 + $0xa4] sm:$0x1] }
 0x1fe   : > { %6224 = vmatpush1.bf16.msra.mxu0 %v8015_v48  ;;  %v5236_v48 = vshrl.u32 %v9356_v2, 16  ;;  %v5197_v16 = vsel %vm8553_vm6, %v5192_v12, %v5196_v9  ;;  %v5211_v32 = vsel %vm8553_vm6, %v5206_v47, %v9352_v28  ;;  %v5256_v49 = vshll.u32 %v9377_v39, 16 }
 0x1ff   : > { %6225 = vmatprep.subr.bf16.mxu0 %v8021_v22  ;;  %v2174_v22 = vsel %vm8763_vm13, %v2172_v27, %v2173_v18  ;;  %v5216_v36 = vrot.slane %v5215_v3, 4  ;;  %v7068_v25 = vcombine.low %v5187_v29, %v5197_v16  ;;  %v5242_v18 = vshll.u32 %v9375_v43, 16 }
 0x200   : > { %v5238_v10 = vrot.slane %v5236_v48, 4  ;;  %v6899_v24 = vcombine.low %v2171_v26, %v2174_v22  ;;  %v5260_v27 = vshrl.u32 %v9377_v39, 16  ;;  %v2186_v4 = vrot.slane %v2184_v20, 4  ;;  %v8095_v26 = vld [vmem:[#allocation2 + $0xac] sm:$0xf] }
 0x201   : > { %5676 = vmatmul.mubr.bf16.gmra.mrb[8].mxu0 %v7066_v14  ;;  %v6884_v14 = vrot.slane %v2052_v1, 9  ;;  %v5221_v23 = vsel %vm8553_vm6, %v5216_v36, %v5220_v62  ;;  %v2187_v12 = vrot.slane %v8094_v17, 5  ;;  %v9394_v5 = vrot.slane %v5256_v49, 5 }
 0x202   : > { %5685 = vmatprep.mubr.bf16.mxu0 %v8301_v0  ;;  %6226 = vmatpush1.bf16.msra.mxu0 %v8019_v35  ;;  %v5228_v35 = vrot.slane %v5226_v44, 5  ;;  %v7069_v9 = vcombine.low %v5211_v32, %v5221_v23  ;;  %v5054_v44 = vld [vmem:[#allocation2 + $0x78] sm:$0xf]  ;;  %v2191_v22 = vrot.slane %v8095_v26, 5  ;;  %v5268_v51 = vrot.slane %v5266_v59, 5 }
 0x203   : > { %2487 = vmatmul.mubr.bf16.gmra.mrb[36].mxu1 %v6897_v30  ;;  %6227 = vmatprep.subr.bf16.mxu0 %v8026_v19  ;;  %v8036_v30 = vld [vmem:[#allocation6 + $0x474] ss:$8 sps:$4 sm:$0xff]   ;;  %v9373_v19 = vrot.slane %v5232_v8, 5  ;;  %v2178_v40 = vsel %vm8763_vm13, %v6884_v14, %v2177_v11  ;;  %v5244_v11 = vrot.slane %v5242_v18, 5  ;;  %v9398_v8 = vld [vmem:[#allocation2 + $0x7c] sm:$0xf] }
 0x204   : > { %2496 = vmatprep.mubr.bf16.mxu1 %v8301_v0  ;;  %v6900_v28 = vcombine.low %v2178_v40, %v2181_v55  ;;  %v5271_v47 = vshrl.u32 %v5054_v44, 16  ;;  %v5274_v36 = vshll.u32 %v5054_v44, 16  ;;  %v5280_v62 = vshll.u32 %v9398_v8, 16  ;;  %v9440_v59 = vld [vmem:[#allocation2 + $0x8c] sm:$0x1] }
 0x205   : > { %v5239_v54 = vor.u32 %v5238_v10, %v9373_v19  ;;  %v8096_v10 = vld [vmem:[#allocation2 + $0xb0] sm:$0x1] }
 0x206   : > { %6228 = vmatpush1.bf16.msra.mxu0 %v8024_v60  ;;  %v5229_v60 = vor.u32 %v5228_v35, %v5225_v41  ;;  %v6886_v35 = vrot.slane %v2054_v21, 9  ;;  %v5273_v32 = vrot.slane %v5271_v47, 4  ;;  %v9417_v23 = vrot.slane %v5280_v62, 5  ;;  %v5060_v47 = vld [vmem:[#allocation2 + $0x90] sm:$0xf] }
 0x207   : > { %6229 = vmatprep.subr.bf16.mxu0 %v8031_v38  ;;  %v5247_v38 = vshrl.u32 %v5051_v33, 16  ;;  %v5240_v61 = vrot.slane %v5239_v54, 4  ;;  %v8097_v54 = vld [vmem:[#allocation2 + $0x70] sm:$0xf] }
 0x208   : > { %v5230_v1 = vrot.slane %v5229_v60, 4  ;;  %v3353_v18 = vshll.u32 %v8097_v54, 16 }
 0x209   : > { %5686 = vmatmul.mubr.bf16.gmra.mrb[12].mxu0 %v7067_v52  ;;  %v6885_v52 = vrot.slane %v2053_v53, 9  ;;  %v5249_v7 = vrot.slane %v5247_v38, 4  ;;  %v5245_v45 = vsel %vm8553_vm6, %v5240_v61, %v5244_v11  ;;  %v5276_v53 = vrot.slane %v5274_v36, 5  ;;  %v2055_v61 = vld [vmem:[#allocation2 + $0xb4] sm:$0xe] }
 0x20a   : > { %5695 = vmatprep.mubr.bf16.mxu0 %v8301_v0  ;;  %6230 = vmatpush1.bf16.msra.mxu0 %v8029_v6  ;;  %v5262_v6 = vrot.slane %v5260_v27, 4  ;;  %v5235_v14 = vsel %vm8553_vm6, %v5230_v1, %v9373_v19  ;;  %v2193_v19 = vrot.slane %v2191_v22, 4  ;;  %v3357_v38 = vshrl.u32 %v8097_v54, 16 }
 0x20b   : > { %2497 = vmatmul.mubr.bf16.gmra.mrb[40].mxu1 %v6898_v34  ;;  %6231 = vmatprep.subr.bf16.mxu0 %v8036_v30  ;;  %v5250_v34 = vshll.u32 %v5051_v33, 16  ;;  %v2185_v48 = vsel %vm8763_vm13, %v6885_v52, %v2184_v20  ;;  %v2188_v30 = vsel %vm8763_vm13, %v2186_v4, %v2187_v12  ;;  %v7070_v33 = vcombine.low %v5235_v14, %v5245_v45  ;;  %v9415_v20 = vld [vmem:[#allocation2 + $0x88] sm:$0xf]  ;;  %v8098_v12 = vld [vmem:[#allocation2 + $0xb8] sm:$0xf] }
 0x20c   : > { %2506 = vmatprep.mubr.bf16.mxu1 %v8301_v0  ;;  %v5263_v16 = vor.u32 %v5262_v6, %v9394_v5  ;;  %v6901_v41 = vcombine.low %v2185_v48, %v2188_v30  ;;  %v5308_v52 = vshrl.u32 %v9415_v20, 16  ;;  %v2192_v4 = vsel %vm8763_vm13, %v6886_v35, %v2191_v22  ;;  %v8099_v45 = vld [vmem:[#allocation2 + $0xbc] sm:$0x1]  ;;  %v9442_v35 = vld [vmem:[#allocation2 + $0x94] sm:$0xf] }
 0x20d   : > { %v5252_v3 = vrot.slane %v5250_v34, 5  ;;  %v9419_v34 = vld [vmem:[#allocation2 + $0x80] sm:$0x1]  ;;  %v9436_v44 = vrot.slane %v3353_v18, 5  ;;  %v3359_v48 = vrot.slane %v3357_v38, 4  ;;  %v6887_v21 = vrot.slane %v2055_v61, 9 }
 0x20e   : > { %6232 = vmatpush1.bf16.msra.mxu0 %v8034_v37  ;;  %v5284_v37 = vshrl.u32 %v9398_v8, 16  ;;  %v5264_v55 = vrot.slane %v5263_v16, 4  ;;  %v5290_v6 = vshll.u32 %v9419_v34, 16 }
 0x20f   : > { %v5253_v29 = vor.u32 %v5252_v3, %v5249_v7  ;;  %v5277_v7 = vor.u32 %v5276_v53, %v5273_v32  ;;  %v5328_v53 = vshll.u32 %v9442_v35, 16 }
 0x210   : > { %v5286_v60 = vrot.slane %v5284_v37, 4  ;;  %v5269_v11 = vsel %vm8553_vm6, %v5264_v55, %v5268_v51  ;;  %v5319_v55 = vshrl.u32 %v5060_v47, 16  ;;  %v5322_v51 = vshll.u32 %v5060_v47, 16 }
 0x211   : > { %5696 = vmatmul.mubr.bf16.gmra.mrb[16].mxu0 %v7068_v25  ;;  %v5057_v25 = vld [vmem:[#allocation2 + $0x84] sm:$0xf]  ;;  %v5254_v40 = vrot.slane %v5253_v29, 4  ;;  %v2201_v29 = vrot.slane %v8099_v45, 5  ;;  %v5278_v62 = vrot.slane %v5277_v7, 4  ;;  %v9460_v61 = vrot.slane %v5328_v53, 5 }
 0x212   : > { %5705 = vmatprep.mubr.bf16.mxu0 %v8301_v0  ;;  %v5295_v49 = vshrl.u32 %v5057_v25, 16  ;;  %v5298_v27 = vshll.u32 %v5057_v25, 16  ;;  %v5287_v3 = vor.u32 %v5286_v60, %v9417_v23  ;;  %v5332_v60 = vshrl.u32 %v9442_v35, 16  ;;  %v3127_v7 = vld [vmem:[#allocation2 + $0x6c] sm:$0xf] }
 0x213   : > { %2507 = vmatmul.mubr.bf16.gmra.mrb[44].mxu1 %v6899_v24  ;;  %v2194_v24 = vrot.slane %v8096_v10, 5  ;;  %v5259_v1 = vsel %vm8553_vm6, %v5254_v40, %v9394_v5  ;;  %v5310_v5 = vrot.slane %v5308_v52, 4  ;;  %v8100_v10 = vld [vmem:[#allocation2 + $0x74] sm:$0x1]  ;;  %v5314_v40 = vshll.u32 %v9440_v59, 16 }
 0x214   : > { %2516 = vmatprep.mubr.bf16.mxu1 %v8301_v0  ;;  %v5297_v30 = vrot.slane %v5295_v49, 4  ;;  %v5300_v26 = vrot.slane %v5298_v27, 5  ;;  %v7071_v16 = vcombine.low %v5259_v1, %v5269_v11  ;;  %v5288_v37 = vrot.slane %v5287_v3, 4  ;;  %v9462_v3 = vld [vmem:[#allocation2 + $0x98] sm:$0x1] }
 0x215   : > { %v2195_v17 = vsel %vm8763_vm13, %v2193_v19, %v2194_v24  ;;  %v3360_v19 = vor.u32 %v3359_v48, %v9436_v44  ;;  %v3363_v24 = vshll.u32 %v8100_v10, 16  ;;  %v5283_v18 = vsel %vm8553_vm6, %v5278_v62, %v9417_v23 }
 0x216   : > { %v6902_v14 = vcombine.low %v2192_v4, %v2195_v17  ;;  %v5301_v25 = vor.u32 %v5300_v26, %v5297_v30  ;;  %v5316_v4 = vrot.slane %v5314_v40, 5  ;;  %v5321_v17 = vrot.slane %v5319_v55, 4  ;;  %v9467_v26 = vld [vmem:[#allocation2 + $0xa0] sm:$0xf]  ;;  %v8018_v40 = vld [vmem:[#allocation2 + $0xc] sm:$0xff]  }
 0x217   : > { %v3361_v49 = vrot.slane %v3360_v19, 4  ;;  %v3365_v27 = vrot.slane %v3363_v24, 5  ;;  %v5334_v11 = vrot.slane %v5332_v60, 4  ;;  %v3344_v23 = vshrl.u32 %v3127_v7, 16  ;;  %v5066_v19 = vld [vmem:[#allocation2 + $0xa8] sm:$0xf] }
 0x218   : > { %v3347_v48 = vshll.u32 %v3127_v7, 16  ;;  %v5356_v62 = vshrl.u32 %v9467_v26, 16  ;;  %v8102_v7 = vld [vmem:[#allocation6 + $0x214] ss:$8 sps:$4 sm:$0xff]  }
 0x219   : > { %5706 = vmatmul.mubr.bf16.gmra.mrb[20].mxu0 %v7069_v9  ;;  %v2198_v9 = vrot.slane %v8098_v12, 5  ;;  %v5324_v12 = vrot.slane %v5322_v51, 5 }
 0x21a   : > { %5715 = vmatprep.mubr.bf16.mxu0 %v8301_v0  ;;  %v3349_v45 = vrot.slane %v3347_v48, 5 }
 0x21b   : > { %2517 = vmatmul.mubr.bf16.gmra.mrb[48].mxu1 %v6900_v28  ;;  %v5304_v28 = vshll.u32 %v9415_v20, 16  ;;  %v2200_v36 = vrot.slane %v2198_v9, 4  ;;  %v2199_v32 = vsel %vm8763_vm13, %v6887_v21, %v2198_v9  ;;  %v3346_v21 = vrot.slane %v3344_v23, 4 }
 0x21c   : > { %2526 = vmatprep.mubr.bf16.mxu1 %v8301_v0 }
 0x21d   : > { %v9438_v22 = vrot.slane %v5304_v28, 5  ;;  %v2202_v54 = vsel %vm8763_vm13, %v2200_v36, %v2201_v29  ;;  %v5302_v28 = vrot.slane %v5301_v25, 4  ;;  %v5335_v29 = vor.u32 %v5334_v11, %v9460_v61  ;;  %v9479_v25 = vld [vmem:[#allocation2 + $0xac] sm:$0xf] }
 0x21e   : > { %v6903_v9 = vcombine.low %v2199_v32, %v2202_v54  ;;  %v5358_v54 = vrot.slane %v5356_v62, 4 }
 0x21f   : > { %v5307_v30 = vsel %vm8553_vm6, %v5302_v28, %v9438_v22  ;;  %v5336_v55 = vrot.slane %v5335_v29, 4  ;;  %v5376_v28 = vshll.u32 %v9479_v25, 16  ;;  %v8103_v29 = vld [vmem:[#allocation6 + $0x210] ss:$8 sps:$4 sm:$0xff]  }
 0x221   : > { %5716 = vmatmul.mubr.bf16.gmra.mrb[24].mxu0 %v7070_v33  ;;  %v5311_v33 = vor.u32 %v5310_v5, %v9438_v22  ;;  %v5352_v22 = vshll.u32 %v9467_v26, 16  ;;  %v9501_v48 = vrot.slane %v5376_v28, 5 }
 0x222   : > { %5725 = vmatprep.mubr.bf16.mxu0 %v8301_v0 }
 0x223   : > { %2527 = vmatmul.mubr.bf16.gmra.mrb[52].mxu1 %v6901_v41  ;;  %v5292_v41 = vrot.slane %v5290_v6, 5  ;;  %v5312_v52 = vrot.slane %v5311_v33, 4  ;;  %v5063_v6 = vld [vmem:[#allocation2 + $0x9c] sm:$0xf]  ;;  %v9481_v60 = vrot.slane %v5352_v22, 5 }
 0x224   : > { %2536 = vmatprep.mubr.bf16.mxu1 %v8301_v0  ;;  %v5343_v47 = vshrl.u32 %v5063_v6, 16  ;;  %v5346_v36 = vshll.u32 %v5063_v6, 16  ;;  %v8104_v22 = vld [vmem:[#allocation6 + $0x224] ss:$8 sps:$4 sm:$0xff]  }
 0x225   : > { %v5293_v38 = vsel %vm8553_vm6, %v5288_v37, %v5292_v41  ;;  %v5317_v5 = vsel %vm8553_vm6, %v5312_v52, %v5316_v4  ;;  %v3350_v37 = vor.u32 %v3349_v45, %v3346_v21  ;;  %v3366_v41 = vsel %vm8553_vm6, %v3361_v49, %v3365_v27  ;;  %v9486_v49 = vld [vmem:[#allocation2 + $0xa4] sm:$0x1]  ;;  %v5069_v21 = vld [vmem:[#allocation2 + $0xb4] sm:$0xf]  ;;  %v9505_v45 = vld [vmem:[#allocation2 + $0xb8] sm:$0xf] }
 0x226   : > { %v7072_v1 = vcombine.low %v5283_v18, %v5293_v38  ;;  %v7073_v10 = vcombine.low %v5307_v30, %v5317_v5  ;;  %v5345_v32 = vrot.slane %v5343_v47, 4  ;;  %v5348_v53 = vrot.slane %v5346_v36, 5  ;;  %v9503_v30 = vld [vmem:[#allocation2 + $0xb0] sm:$0x1]  ;;  %v8022_v5 = vld [vmem:[#allocation2 + $0x18] sm:$0xff]  }
 0x227   : > { %v3351_v33 = vrot.slane %v3350_v37, 4  ;;  %v5367_v18 = vshrl.u32 %v5066_v19, 16  ;;  %v5370_v27 = vshll.u32 %v5066_v19, 16  ;;  %v5380_v52 = vshrl.u32 %v9479_v25, 16 }
 0x228   : > { %v5362_v11 = vshll.u32 %v9486_v49, 16  ;;  %v5391_v19 = vshrl.u32 %v5069_v21, 16 }
 0x229   : > { %5726 = vmatmul.mubr.bf16.gmra.mrb[28].mxu0 %v7071_v16  ;;  %v5338_v16 = vshll.u32 %v9462_v3, 16  ;;  %v3356_v38 = vsel %vm8553_vm6, %v3351_v33, %v9436_v44  ;;  %v5369_v6 = vrot.slane %v5367_v18, 4  ;;  %v5372_v23 = vrot.slane %v5370_v27, 5 }
 0x22a   : > { %5735 = vmatprep.mubr.bf16.mxu0 %v8301_v0  ;;  %v9490_v4 = vcombine.low %v3356_v38, %v3366_v41  ;;  %v5364_v36 = vrot.slane %v5362_v11, 5  ;;  %v5386_v41 = vshll.u32 %v9503_v30, 16  ;;  %v5404_v33 = vshrl.u32 %v9505_v45, 16  ;;  %v8107_v11 = vld [vmem:[#allocation6 + $0x230] ss:$8 sps:$4 sm:$0xff]  }
 0x22b   : > { %2537 = vmatmul.mubr.bf16.gmra.mrb[56].mxu1 %v6902_v14  ;;  %v5325_v14 = vor.u32 %v5324_v12, %v5321_v17  ;;  %v5340_v51 = vrot.slane %v5338_v16, 5  ;;  %v8101_v12 = vld [vmem:[#allocation6 + $0x200] ss:$8 sps:$4 sm:$0xff]   ;;  %v5373_v62 = vor.u32 %v5372_v23, %v5369_v6  ;;  %v5393_v18 = vrot.slane %v5391_v19, 4 }
 0x22c   : > { %2546 = vmatprep.mubr.bf16.mxu1 %v8301_v0  ;;  %v5406_v28 = vrot.slane %v5404_v33, 4 }
 0x22d   : > { %v5326_v24 = vrot.slane %v5325_v14, 4  ;;  %v5341_v44 = vsel %vm8553_vm6, %v5336_v55, %v5340_v51  ;;  %v5374_v51 = vrot.slane %v5373_v62, 4 }
 0x22f   : > { %v5331_v17 = vsel %vm8553_vm6, %v5326_v24, %v9460_v61  ;;  %v5382_v61 = vrot.slane %v5380_v52, 4  ;;  %v5400_v24 = vshll.u32 %v9505_v45, 16  ;;  %v8106_v52 = vld [vmem:[#allocation6 + $0x234] ss:$8 sps:$4 sm:$0xff]  }
 0x230   : > { %v7074_v14 = vcombine.low %v5331_v17, %v5341_v44  ;;  %v8023_v17 = vld [vmem:[#allocation2 + $0x24] sm:$0xff]   ;;  %v9520_v44 = vld [vmem:[#allocation2 + $0xbc] sm:$0x1] }
 0x231   : > { %5736 = vmatmul.mubr.bf16.gmra.mrb[32].mxu0 %v7072_v1  ;;  %v5359_v1 = vor.u32 %v5358_v54, %v9481_v60  ;;  %v5383_v37 = vor.u32 %v5382_v61, %v9501_v48  ;;  %v8105_v54 = vld [vmem:[#allocation6 + $0x220] ss:$8 sps:$4 sm:$0xff]   ;;  %v9518_v27 = vrot.slane %v5400_v24, 5  ;;  %v5410_v61 = vshll.u32 %v9520_v44, 16 }
 0x232   : > { %5745 = vmatprep.mubr.bf16.mxu0 %v8301_v0 }
 0x233   : > { %2547 = vmatmul.mubr.bf16.gmra.mrb[60].mxu1 %v6903_v9  ;;  %v5349_v9 = vor.u32 %v5348_v53, %v5345_v32  ;;  %v5360_v47 = vrot.slane %v5359_v1, 4  ;;  %v5384_v32 = vrot.slane %v5383_v37, 4  ;;  %v5388_v53 = vrot.slane %v5386_v41, 5  ;;  %v8110_v37 = vld [vmem:[#allocation6 + $0x254] ss:$8 sps:$4 sm:$0xff]  }
 0x234   : > { %2878 = vmatprep.mubr.bf16.mxu1 %v8301_v0  ;;  %v5379_v1 = vsel %vm8553_vm6, %v5374_v51, %v9501_v48  ;;  %v5407_v23 = vor.u32 %v5406_v28, %v9518_v27  ;;  %v5412_v62 = vrot.slane %v5410_v61, 5  ;;  %v8027_v41 = vld [vmem:[#allocation2 + $0x30] sm:$0xff]  }
 0x235   : > { %v5350_v16 = vrot.slane %v5349_v9, 4  ;;  %v5365_v55 = vsel %vm8553_vm6, %v5360_v47, %v5364_v36  ;;  %v9522_v9 = vld [vmem:[#allocation2 + $0xc4] sm:$0xf]  ;;  %v9537_v51 = vld [vmem:[#allocation2 + $0xd0] sm:$0xf] }
 0x236   : > { %v5428_v48 = vshrl.u32 %v9522_v9, 16 }
 0x238   : > { %v5430_v33 = vrot.slane %v5428_v48, 4 }
 0x239   : > { %5746 = vmatmul.mubr.bf16.gmra.mrb[36].mxu0 %v7073_v10  ;;  %v5394_v10 = vshll.u32 %v5069_v21, 16 }
 0x23a   : > { %5755 = vmatprep.mubr.bf16.mxu0 %v8301_v0 }
 0x23b   : > { %2879 = vmatmul.mubr.bf16.vlgmr.msra.gmra.mrb[0].mxu1 %v8018_v40  ;;  %v5355_v40 = vsel %vm8553_vm6, %v5350_v16, %v9481_v60  ;;  %v5396_v38 = vrot.slane %v5394_v10, 5  ;;  %v5072_v60 = vld [vmem:[#allocation2 + $0xc0] sm:$0xf] }
 0x23c   : > { %7195 = vmatpush1.bf16.msra.mxu1 %v8101_v12  ;;  %2888 = vmatprep.mubr.bf16.mxu1 %v8301_v0  ;;  %v7075_v12 = vcombine.low %v5355_v40, %v5365_v55  ;;  %v5418_v21 = vshll.u32 %v5072_v60, 16  ;;  %v8109_v16 = vld [vmem:[#allocation6 + $0x240] ss:$8 sps:$4 sm:$0xff]   ;;  %v9535_v40 = vld [vmem:[#allocation2 + $0xc8] sm:$0x1] }
 0x23d   : > { %7188 = vmatprep.subr.bf16.mxu1 %v8102_v7  ;;  %v5389_v7 = vsel %vm8553_vm6, %v5384_v32, %v5388_v53  ;;  %v5397_v6 = vor.u32 %v5396_v38, %v5393_v18  ;;  %v5075_v55 = vld [vmem:[#allocation2 + $0xcc] sm:$0xf]  ;;  %v8111_v32 = vld [vmem:[#allocation6 + $0x250] ss:$8 sps:$4 sm:$0xff]  }
 0x23e   : > { %v7076_v47 = vcombine.low %v5379_v1, %v5389_v7  ;;  %v5420_v10 = vrot.slane %v5418_v21, 5  ;;  %v8113_v1 = vld [vmem:[#allocation6 + $0x260] ss:$8 sps:$4 sm:$0xff]  }
 0x23f   : > { %v5398_v36 = vrot.slane %v5397_v6, 4  ;;  %v8028_v7 = vld [vmem:[#allocation2 + $0x3c] sm:$0xff]  }
 0x240   : > { %7196 = vmatpush1.bf16.msra.mxu1 %v8103_v29  ;;  %v5424_v29 = vshll.u32 %v9522_v9, 16 }
 0x241   : > { %7189 = vmatprep.subr.bf16.mxu1 %v8104_v22  ;;  %5756 = vmatmul.mubr.bf16.gmra.mrb[40].mxu0 %v7074_v14  ;;  %v5415_v14 = vshrl.u32 %v5072_v60, 16  ;;  %v5408_v22 = vrot.slane %v5407_v23, 4  ;;  %v5403_v53 = vsel %vm8553_vm6, %v5398_v36, %v9518_v27  ;;  %v5448_v60 = vshll.u32 %v9537_v51, 16 }
 0x242   : > { %5765 = vmatprep.mubr.bf16.mxu0 %v8301_v0  ;;  %v5426_v24 = vrot.slane %v5424_v29, 5  ;;  %v5452_v27 = vshrl.u32 %v9537_v51, 16 }
 0x243   : > { %2889 = vmatmul.mubr.bf16.gmra.mrb[4].mxu1 %v8022_v5  ;;  %v8108_v5 = vld [vmem:[#allocation6 + $0x244] ss:$8 sps:$4 sm:$0xff]   ;;  %v5417_v19 = vrot.slane %v5415_v14, 4  ;;  %v5413_v18 = vsel %vm8553_vm6, %v5408_v22, %v5412_v62  ;;  %v5450_v29 = vrot.slane %v5448_v60, 5  ;;  %v8117_v60 = vld [vmem:[#allocation2 + $0x20] sm:$0x1] }
 0x244   : > { %2898 = vmatprep.mubr.bf16.mxu1 %v8301_v0  ;;  %7197 = vmatpush1.bf16.msra.mxu1 %v8105_v54  ;;  %v8112_v54 = vld [vmem:[#allocation6 + $0x264] ss:$8 sps:$4 sm:$0xff]   ;;  %v5431_v28 = vor.u32 %v5430_v33, %v5426_v24  ;;  %v7077_v6 = vcombine.low %v5403_v53, %v5413_v18  ;;  %v5454_v48 = vrot.slane %v5452_v27, 4  ;;  %v5949_v27 = vrot.slane %v8117_v60, 5  ;;  %v5884_v60 = vld [vmem:[#allocation2 + $0x48] sm:$0xe] }
 0x245   : > { %7190 = vmatprep.subr.bf16.mxu1 %v8106_v52  ;;  %v5421_v38 = vor.u32 %v5420_v10, %v5417_v19  ;;  %v5434_v52 = vshll.u32 %v9535_v40, 16  ;;  %v8032_v19 = vld [vmem:[#allocation2 + $0x48] sm:$0xff]  }
 0x246   : > { %v5432_v61 = vrot.slane %v5431_v28, 4  ;;  %v8033_v28 = vld [vmem:[#allocation2 + $0x54] sm:$0xff]  }
 0x247   : > { %v5422_v23 = vrot.slane %v5421_v38, 4  ;;  %v5880_v38 = vld [vmem:[#allocation2 + $0x18] sm:$0xe] }
 0x248   : > { %7198 = vmatpush1.bf16.msra.mxu1 %v8107_v11  ;;  %v8114_v11 = vld [vmem:[#allocation6 + $0x274] ss:$8 sps:$4 sm:$0xff]  }
 0x249   : > { %7191 = vmatprep.subr.bf16.mxu1 %v8108_v5  ;;  %5766 = vmatmul.mubr.bf16.gmra.mrb[44].mxu0 %v7075_v12  ;;  %v5442_v12 = vshll.u32 %v5075_v55, 16  ;;  %v5436_v5 = vrot.slane %v5434_v52, 5  ;;  %v5427_v36 = vsel %vm8553_vm6, %v5422_v23, %v5426_v24  ;;  %v5881_v23 = vld [vmem:[#allocation2 + $0x24] sm:$0xe] }
 0x24a   : > { %5775 = vmatprep.mubr.bf16.mxu0 %v8301_v0 }
 0x24b   : > { %2899 = vmatmul.mubr.bf16.gmra.mrb[8].mxu1 %v8023_v17  ;;  %v5439_v17 = vshrl.u32 %v5075_v55, 16  ;;  %v5444_v21 = vrot.slane %v5442_v12, 5  ;;  %v5437_v22 = vsel %vm8553_vm6, %v5432_v61, %v5436_v5  ;;  %v8037_v61 = vld [vmem:[#allocation2 + $0x60] sm:$0xff]  }
 0x24c   : > { %2908 = vmatprep.mubr.bf16.mxu1 %v8301_v0  ;;  %7199 = vmatpush1.bf16.msra.mxu1 %v8109_v16  ;;  %v9549_v16 = vld [vmem:[#allocation2 + $0xd4] sm:$0x1]  ;;  %v7078_v10 = vcombine.low %v5427_v36, %v5437_v22 }
 0x24d   : > { %7192 = vmatprep.subr.bf16.mxu1 %v8110_v37  ;;  %v5441_v14 = vrot.slane %v5439_v17, 4  ;;  %v5455_v37 = vor.u32 %v5454_v48, %v5450_v29  ;;  %v7096_v17 = vrot.slane %v5880_v38, 9  ;;  %v8120_v22 = vld [vmem:[#allocation2 + $0x34] sm:$0xf] }
 0x24f   : > { %v5445_v62 = vor.u32 %v5444_v21, %v5441_v14  ;;  %v5456_v55 = vrot.slane %v5455_v37, 4  ;;  %v7097_v14 = vrot.slane %v5881_v23, 9  ;;  %v5882_v37 = vld [vmem:[#allocation2 + $0x30] sm:$0xe] }
 0x250   : > { %7200 = vmatpush1.bf16.msra.mxu1 %v8111_v32 }
 0x251   : > { %7193 = vmatprep.subr.bf16.mxu1 %v8112_v54  ;;  %5776 = vmatmul.mubr.bf16.gmra.mrb[48].mxu0 %v7076_v47  ;;  %v8115_v47 = vld [vmem:[#allocation6 + $0x270] ss:$8 sps:$4 sm:$0xff]   ;;  %v5446_v33 = vrot.slane %v5445_v62, 4  ;;  %v8116_v54 = vld [vmem:[#allocation2 + $0x1c] sm:$0xf]  ;;  %v5960_v62 = vrot.slane %v8120_v22, 5 }
 0x252   : > { %5785 = vmatprep.mubr.bf16.mxu0 %v8301_v0  ;;  %v5946_v18 = vrot.slane %v8116_v54, 5  ;;  %v5883_v54 = vld [vmem:[#allocation2 + $0x3c] sm:$0xe] }
 0x253   : > { %2909 = vmatmul.mubr.bf16.gmra.mrb[12].mxu1 %v8027_v41  ;;  %v5458_v41 = vshll.u32 %v9549_v16, 16  ;;  %v5451_v24 = vsel %vm8553_vm6, %v5446_v33, %v5450_v29  ;;  %v8119_v29 = vld [vmem:[#allocation2 + $0x2c] sm:$0x1]  ;;  %v5962_v33 = vrot.slane %v5960_v62, 4  ;;  %v8042_v22 = vld [vmem:[#allocation2 + $0x9c] sm:$0xff]  }
 0x254   : > { %2918 = vmatprep.mubr.bf16.mxu1 %v8301_v0  ;;  %7201 = vmatpush1.bf16.msra.mxu1 %v8113_v1  ;;  %v5948_v12 = vrot.slane %v5946_v18, 4  ;;  %v5947_v1 = vsel %vm8763_vm13, %v7096_v17, %v5946_v18  ;;  %v5956_v48 = vrot.slane %v8119_v29, 5  ;;  %v8039_v18 = vld [vmem:[#allocation2 + $0x78] sm:$0xff]  }
 0x255   : > { %7194 = vmatprep.subr.bf16.mxu1 %v8114_v11  ;;  %v5460_v32 = vrot.slane %v5458_v41, 5  ;;  %v8038_v41 = vld [vmem:[#allocation2 + $0x6c] sm:$0xff]  }
 0x256   : > { %v5950_v11 = vsel %vm8763_vm13, %v5948_v12, %v5949_v27  ;;  %v8040_v27 = vld [vmem:[#allocation2 + $0x84] sm:$0xff]  }
 0x257   : > { %v5461_v53 = vsel %vm8553_vm6, %v5456_v55, %v5460_v32  ;;  %v7112_v5 = vcombine.low %v5947_v1, %v5950_v11  ;;  %v5963_v55 = vrot.slane %v9288_v31, 5  ;;  %v5970_v31 = vrot.slane %v9311_v57, 5 }
 0x258   : > { %7202 = vmatpush1.bf16.msra.mxu1 %v8115_v47  ;;  %v7079_v52 = vcombine.low %v5451_v24, %v5461_v53  ;;  %v5967_v53 = vrot.slane %v9290_v56, 5  ;;  %v5974_v56 = vrot.slane %v9313_v50, 5  ;;  %v7100_v11 = vrot.slane %v5884_v60, 9 }
 0x259   : > { %5786 = vmatmul.mubr.bf16.gmra.mrb[52].mxu0 %v7077_v6  ;;  %v5964_v24 = vsel %vm8763_vm13, %v5962_v33, %v5963_v55  ;;  %v5977_v57 = vrot.slane %v9332_v63, 5  ;;  %v5981_v50 = vrot.slane %v9330_v13, 5  ;;  %v5984_v63 = vrot.slane %v9354_v58, 5  ;;  %v5887_v33 = vld [vmem:[#allocation2 + $0x6c] sm:$0xe] }
 0x25a   : > { %5795 = vmatprep.mubr.bf16.mxu0 %v8301_v0  ;;  %v5988_v13 = vrot.slane %v9356_v2, 5  ;;  %v5991_v58 = vrot.slane %v9375_v43, 5  ;;  %v5995_v2 = vrot.slane %v9377_v39, 5  ;;  %v8043_v55 = vld [vmem:[#allocation2 + $0xa8] sm:$0xff]   ;;  %v5998_v43 = vrot.slane %v9396_v15, 5 }
 0x25b   : > { %2919 = vmatmul.mubr.bf16.gmra.mrb[16].mxu1 %v8028_v7  ;;  %v8118_v7 = vld [vmem:[#allocation2 + $0x28] sm:$0xf]  ;;  %v5983_v29 = vrot.slane %v5981_v50, 4  ;;  %v6002_v39 = vrot.slane %v9398_v8, 5 }
 0x25c   : > { %2928 = vmatprep.mubr.bf16.mxu1 %v8301_v0  ;;  %v5953_v6 = vrot.slane %v8118_v7, 5  ;;  %v5976_v7 = vrot.slane %v5974_v56, 4 }
 0x25d   : > { %v6004_v15 = vrot.slane %v6002_v39, 4 }
 0x25e   : > { %v5955_v21 = vrot.slane %v5953_v6, 4  ;;  %v5954_v47 = vsel %vm8763_vm13, %v7097_v14, %v5953_v6  ;;  %v5975_v6 = vsel %vm8763_vm13, %v7100_v11, %v5974_v56  ;;  %v5978_v23 = vsel %vm8763_vm13, %v5976_v7, %v5977_v57 }
 0x25f   : > { %v7116_v14 = vcombine.low %v5975_v6, %v5978_v23  ;;  %v6009_v57 = vrot.slane %v9415_v20, 5  ;;  %v8123_v20 = vld [vmem:[#allocation2 + $0x88] sm:$0xf] }
 0x260   : > { %v5957_v36 = vsel %vm8763_vm13, %v5955_v21, %v5956_v48 }
 0x261   : > { %5796 = vmatmul.mubr.bf16.gmra.mrb[56].mxu0 %v7078_v10  ;;  %v7098_v10 = vrot.slane %v5882_v37, 9 }
 0x262   : > { %5805 = vmatprep.mubr.bf16.mxu0 %v8301_v0 }
 0x263   : > { %2929 = vmatmul.mubr.bf16.gmra.mrb[20].mxu1 %v8032_v19  ;;  %v7113_v19 = vcombine.low %v5954_v47, %v5957_v36  ;;  %v5961_v32 = vsel %vm8763_vm13, %v7098_v10, %v5960_v62  ;;  %v5985_v47 = vsel %vm8763_vm13, %v5983_v29, %v5984_v63  ;;  %v5886_v36 = vld [vmem:[#allocation2 + $0x60] sm:$0xe]  ;;  %v6011_v63 = vrot.slane %v6009_v57, 4 }
 0x264   : > { %2938 = vmatprep.mubr.bf16.mxu1 %v8301_v0  ;;  %v7114_v38 = vcombine.low %v5961_v32, %v5964_v24  ;;  %v7102_v37 = vrot.slane %v5886_v36, 9  ;;  %v7103_v24 = vrot.slane %v5887_v33, 9  ;;  %v8122_v36 = vld [vmem:[#allocation2 + $0x80] sm:$0x1] }
 0x269   : > { %5806 = vmatmul.mubr.bf16.gmra.mrb[60].mxu0 %v7079_v52  ;;  %v5969_v52 = vrot.slane %v5967_v53, 4 }
 0x26a   : > { %6249 = vmatprep.mubr.bf16.mxu0 %v8301_v0 }
 0x26b   : > { %2939 = vmatmul.mubr.bf16.gmra.mrb[24].mxu1 %v8033_v28  ;;  %v7099_v28 = vrot.slane %v5883_v54, 9  ;;  %v5971_v12 = vsel %vm8763_vm13, %v5969_v52, %v5970_v31  ;;  %v5996_v54 = vsel %vm8763_vm13, %v7103_v24, %v5995_v2  ;;  %v8044_v52 = vld [vmem:[#allocation2 + $0xb4] sm:$0xff]  }
 0x26c   : > { %2948 = vmatprep.mubr.bf16.mxu1 %v8301_v0 }
 0x26d   : > { %v5968_v17 = vsel %vm8763_vm13, %v7099_v28, %v5967_v53  ;;  %v5997_v53 = vrot.slane %v5995_v2, 4  ;;  %v3130_v28 = vld [vmem:[#allocation2 + $0x78] sm:$0xf] }
 0x26e   : > { %v7115_v1 = vcombine.low %v5968_v17, %v5971_v12  ;;  %v6005_v12 = vrot.slane %v9419_v34, 5  ;;  %v3368_v56 = vshrl.u32 %v3130_v28, 16  ;;  %v3371_v60 = vshll.u32 %v3130_v28, 16 }
 0x270   : > { %v6006_v7 = vsel %vm8763_vm13, %v6004_v15, %v6005_v12  ;;  %v3370_v34 = vrot.slane %v3368_v56, 4  ;;  %v3373_v6 = vrot.slane %v3371_v60, 5  ;;  %v8124_v15 = vld [vmem:[#allocation2 + $0x8c] sm:$0x1] }
 0x271   : > { %6250 = vmatmul.mubr.bf16.vlgmr.msra.gmra.mrb[0].mxu0 %v7112_v5  ;;  %v8041_v5 = vld [vmem:[#allocation2 + $0x90] sm:$0xff]   ;;  %v3411_v12 = vshll.u32 %v8124_v15, 16 }
 0x272   : > { %6259 = vmatprep.mubr.bf16.mxu0 %v8301_v0 }
 0x273   : > { %2949 = vmatmul.mubr.bf16.gmra.mrb[28].mxu1 %v8037_v61  ;;  %v5885_v61 = vld [vmem:[#allocation2 + $0x54] sm:$0xe] }
 0x274   : > { %2958 = vmatprep.mubr.bf16.mxu1 %v8301_v0  ;;  %v7101_v21 = vrot.slane %v5885_v61, 9  ;;  %v5889_v61 = vld [vmem:[#allocation2 + $0x84] sm:$0xe] }
 0x275   : > { %v7105_v29 = vrot.slane %v5889_v61, 9 }
 0x276   : > { %v5982_v48 = vsel %vm8763_vm13, %v7101_v21, %v5981_v50  ;;  %v3133_v21 = vld [vmem:[#allocation2 + $0x84] sm:$0xf] }
 0x277   : > { %v7117_v62 = vcombine.low %v5982_v48, %v5985_v47  ;;  %v6012_v48 = vrot.slane %v9440_v59, 5  ;;  %v3374_v47 = vor.u32 %v3373_v6, %v3370_v34  ;;  %v5891_v6 = vld [vmem:[#allocation2 + $0x9c] sm:$0xe] }
 0x279   : > { %6260 = vmatmul.mubr.bf16.gmra.mrb[4].mxu0 %v7113_v19  ;;  %v5989_v19 = vsel %vm8763_vm13, %v7102_v37, %v5988_v13  ;;  %v3395_v37 = vshll.u32 %v3133_v21, 16  ;;  %v6013_v59 = vsel %vm8763_vm13, %v6011_v63, %v6012_v48  ;;  %v3375_v2 = vrot.slane %v3374_v47, 4  ;;  %v3139_v63 = vld [vmem:[#allocation2 + $0x9c] sm:$0xf] }
 0x27a   : > { %6269 = vmatprep.mubr.bf16.mxu0 %v8301_v0  ;;  %v7107_v48 = vrot.slane %v5891_v6, 9 }
 0x27b   : > { %2959 = vmatmul.mubr.bf16.gmra.mrb[32].mxu1 %v8038_v41  ;;  %v5990_v41 = vrot.slane %v5988_v13, 4 }
 0x27c   : > { %2968 = vmatprep.mubr.bf16.mxu1 %v8301_v0 }
 0x27d   : > { %v5992_v10 = vsel %vm8763_vm13, %v5990_v41, %v5991_v58  ;;  %v3401_v41 = vshll.u32 %v8123_v20, 16  ;;  %v3405_v58 = vshrl.u32 %v8123_v20, 16 }
 0x27e   : > { %v7118_v32 = vcombine.low %v5989_v19, %v5992_v10  ;;  %v6010_v19 = vsel %vm8763_vm13, %v7105_v29, %v6009_v57  ;;  %v6016_v10 = vrot.slane %v9442_v35, 5  ;;  %v6023_v57 = vrot.slane %v9467_v26, 5 }
 0x27f   : > { %v3440_v26 = vshrl.u32 %v3139_v63, 16 }
 0x280   : > { %v6018_v28 = vrot.slane %v6016_v10, 4  ;;  %v6025_v47 = vrot.slane %v6023_v57, 4 }
 0x281   : > { %6270 = vmatmul.mubr.bf16.gmra.mrb[8].mxu0 %v7114_v38  ;;  %v5888_v38 = vld [vmem:[#allocation2 + $0x78] sm:$0xe] }
 0x282   : > { %6279 = vmatprep.mubr.bf16.mxu0 %v8301_v0  ;;  %v7104_v17 = vrot.slane %v5888_v38, 9 }
 0x283   : > { %2969 = vmatmul.mubr.bf16.gmra.mrb[36].mxu1 %v8039_v18  ;;  %v5999_v18 = vsel %vm8763_vm13, %v5997_v53, %v5998_v43  ;;  %v3397_v53 = vrot.slane %v3395_v37, 5  ;;  %v7121_v43 = vcombine.low %v6010_v19, %v6013_v59  ;;  %v8127_v19 = vld [vmem:[#allocation2 + $0xa0] sm:$0xf] }
 0x284   : > { %2978 = vmatprep.mubr.bf16.mxu1 %v8301_v0  ;;  %v7119_v31 = vcombine.low %v5996_v54, %v5999_v18  ;;  %v6003_v8 = vsel %vm8763_vm13, %v7104_v17, %v6002_v39  ;;  %v3403_v54 = vrot.slane %v3401_v41, 5  ;;  %v3407_v18 = vrot.slane %v3405_v58, 4  ;;  %v3136_v39 = vld [vmem:[#allocation2 + $0x90] sm:$0xf]  ;;  %v8126_v41 = vld [vmem:[#allocation2 + $0x98] sm:$0x1] }
 0x285   : > { %v3416_v56 = vshrl.u32 %v3136_v39, 16  ;;  %v3419_v60 = vshll.u32 %v3136_v39, 16  ;;  %v3435_v58 = vshll.u32 %v8126_v41, 16  ;;  %v3449_v59 = vshll.u32 %v8127_v19, 16 }
 0x287   : > { %v3421_v61 = vrot.slane %v3419_v60, 5  ;;  %v3437_v39 = vrot.slane %v3435_v58, 5 }
 0x289   : > { %6280 = vmatmul.mubr.bf16.gmra.mrb[12].mxu0 %v7115_v1 }
 0x28a   : > { %6289 = vmatprep.mubr.bf16.mxu0 %v8301_v0 }
 0x28b   : > { %2979 = vmatmul.mubr.bf16.gmra.mrb[40].mxu1 %v8040_v27  ;;  %v8121_v27 = vld [vmem:[#allocation2 + $0x7c] sm:$0xf] }
 0x28c   : > { %2988 = vmatprep.mubr.bf16.mxu1 %v8301_v0  ;;  %v3377_v1 = vshll.u32 %v8121_v27, 16  ;;  %v3381_v11 = vshrl.u32 %v8121_v27, 16  ;;  %v3408_v27 = vor.u32 %v3407_v18, %v3403_v54 }
 0x28e   : > { %v3379_v23 = vrot.slane %v3377_v1, 5  ;;  %v3383_v50 = vrot.slane %v3381_v11, 4  ;;  %v8125_v1 = vld [vmem:[#allocation2 + $0x94] sm:$0xf] }
 0x28f   : > { %v3425_v11 = vshll.u32 %v8125_v1, 16 }
 0x290   : > { %v3384_v13 = vor.u32 %v3383_v50, %v3379_v23  ;;  %v3418_v50 = vrot.slane %v3416_v56, 4 }
 0x291   : > { %6290 = vmatmul.mubr.bf16.gmra.mrb[16].mxu0 %v7116_v14  ;;  %v7120_v14 = vcombine.low %v6003_v8, %v6006_v7  ;;  %v3429_v8 = vshrl.u32 %v8125_v1, 16 }
 0x292   : > { %6299 = vmatprep.mubr.bf16.mxu0 %v8301_v0  ;;  %v3385_v33 = vrot.slane %v3384_v13, 4  ;;  %v6026_v13 = vrot.slane %v9486_v49, 5  ;;  %v6024_v49 = vsel %vm8763_vm13, %v7107_v48, %v6023_v57 }
 0x293   : > { %2989 = vmatmul.mubr.bf16.gmra.mrb[44].mxu1 %v8041_v5  ;;  %v8045_v5 = vld [vmem:[#allocation2 + $0xc0] sm:$0xff]   ;;  %v3431_v29 = vrot.slane %v3429_v8, 4 }
 0x294   : > { %2998 = vmatprep.mubr.bf16.mxu1 %v8301_v0 }
 0x299   : > { %6300 = vmatmul.mubr.bf16.gmra.mrb[20].mxu0 %v7117_v62  ;;  %v3392_v62 = vshrl.u32 %v3133_v21, 16  ;;  %v3427_v21 = vrot.slane %v3425_v11, 5  ;;  %v8129_v11 = vld [vmem:[#allocation2 + $0xac] sm:$0xf] }
 0x29a   : > { %6309 = vmatprep.mubr.bf16.mxu0 %v8301_v0  ;;  %v3473_v8 = vshll.u32 %v8129_v11, 16 }
 0x29b   : > { %2999 = vmatmul.mubr.bf16.gmra.mrb[48].mxu1 %v8042_v22  ;;  %v3387_v22 = vshll.u32 %v8122_v36, 16  ;;  %v3394_v24 = vrot.slane %v3392_v62, 4  ;;  %v3443_v62 = vshll.u32 %v3139_v63, 16  ;;  %v3432_v20 = vor.u32 %v3431_v29, %v3427_v21  ;;  %v3145_v63 = vld [vmem:[#allocation2 + $0xb4] sm:$0xf] }
 0x29c   : > { %3008 = vmatprep.mubr.bf16.mxu1 %v8301_v0 }
 0x29d   : > { %v3398_v17 = vor.u32 %v3397_v53, %v3394_v24  ;;  %v3442_v53 = vrot.slane %v3440_v26, 4  ;;  %v3433_v18 = vrot.slane %v3432_v20, 4  ;;  %v3488_v26 = vshrl.u32 %v3145_v63, 16 }
 0x29f   : > { %v3438_v60 = vsel %vm8553_vm6, %v3433_v18, %v3437_v39 }
 0x2a1   : > { %6310 = vmatmul.mubr.bf16.gmra.mrb[24].mxu0 %v7118_v32  ;;  %v5890_v32 = vld [vmem:[#allocation2 + $0x90] sm:$0xe] }
 0x2a2   : > { %6319 = vmatprep.mubr.bf16.mxu0 %v8301_v0  ;;  %v7106_v38 = vrot.slane %v5890_v32, 9 }
 0x2a3   : > { %3009 = vmatmul.mubr.bf16.gmra.mrb[52].mxu1 %v8043_v55  ;;  %v3389_v55 = vrot.slane %v3387_v22, 5  ;;  %v3422_v22 = vor.u32 %v3421_v61, %v3418_v50 }
 0x2a4   : > { %3018 = vmatprep.mubr.bf16.mxu1 %v8301_v0 }
 0x2a5   : > { %v3390_v35 = vsel %vm8553_vm6, %v3385_v33, %v3389_v55  ;;  %v6030_v33 = vrot.slane %v9479_v25, 5  ;;  %v5892_v55 = vld [vmem:[#allocation2 + $0xa8] sm:$0xe]  ;;  %v3423_v24 = vrot.slane %v3422_v22, 4 }
 0x2a7   : > { %v3428_v25 = vsel %vm8553_vm6, %v3423_v24, %v3427_v21  ;;  %v3475_v21 = vrot.slane %v3473_v8, 5 }
 0x2a8   : > { %v6963_v50 = vcombine.low %v3428_v25, %v3438_v60 }
 0x2a9   : > { %6320 = vmatmul.mubr.bf16.gmra.mrb[28].mxu0 %v7119_v31  ;;  %v3380_v31 = vsel %vm8553_vm6, %v3375_v2, %v3379_v23  ;;  %v3413_v23 = vrot.slane %v3411_v12, 5  ;;  %v3453_v2 = vshrl.u32 %v8127_v19, 16  ;;  %v8131_v19 = vld [vmem:[#allocation2 + $0xb0] sm:$0x1] }
 0x2aa   : > { %6329 = vmatprep.mubr.bf16.mxu0 %v8301_v0  ;;  %v6961_v34 = vcombine.low %v3380_v31, %v3390_v35  ;;  %v7108_v31 = vrot.slane %v5892_v55, 9  ;;  %v6032_v35 = vrot.slane %v6030_v33, 4  ;;  %v5894_v55 = vld [vmem:[#allocation2 + $0xc0] sm:$0xe] }
 0x2ab   : > { %3019 = vmatmul.mubr.bf16.gmra.mrb[56].mxu1 %v8044_v52  ;;  %v6019_v52 = vrot.slane %v9462_v3, 5  ;;  %v6017_v3 = vsel %vm8763_vm13, %v7106_v38, %v6016_v10  ;;  %v6027_v10 = vsel %vm8763_vm13, %v6025_v47, %v6026_v13 }
 0x2ac   : > { %3028 = vmatprep.mubr.bf16.mxu1 %v8301_v0  ;;  %v7123_v38 = vcombine.low %v6024_v49, %v6027_v10 }
 0x2ad   : > { %v6020_v7 = vsel %vm8763_vm13, %v6018_v28, %v6019_v52  ;;  %v3451_v28 = vrot.slane %v3449_v59, 5  ;;  %v3455_v52 = vrot.slane %v3453_v2, 4  ;;  %v3483_v59 = vshll.u32 %v8131_v19, 16 }
 0x2ae   : > { %v6044_v2 = vrot.slane %v9522_v9, 5 }
 0x2af   : > { %v3485_v39 = vrot.slane %v3483_v59, 5 }
 0x2b1   : > { %6330 = vmatmul.mubr.bf16.gmra.mrb[32].mxu0 %v7120_v14  ;;  %v7122_v14 = vcombine.low %v6017_v3, %v6020_v7  ;;  %v3477_v3 = vshrl.u32 %v8129_v11, 16  ;;  %v6031_v7 = vsel %vm8763_vm13, %v7108_v31, %v6030_v33  ;;  %v6047_v31 = vrot.slane %v9535_v40, 5 }
 0x2b2   : > { %6339 = vmatprep.mubr.bf16.mxu0 %v8301_v0 }
 0x2b3   : > { %3029 = vmatmul.mubr.bf16.gmra.mrb[60].mxu1 %v8045_v5  ;;  %v3409_v5 = vrot.slane %v3408_v27, 4  ;;  %v8128_v27 = vld [vmem:[#allocation2 + $0xa4] sm:$0x1]  ;;  %v3479_v29 = vrot.slane %v3477_v3, 4 }
 0x2b4   : > { %3808 = vmatprep.mubr.bf16.mxu1 %v8301_v0  ;;  %v3459_v1 = vshll.u32 %v8128_v27, 16 }
 0x2b5   : > { %v3414_v37 = vsel %vm8553_vm6, %v3409_v5, %v3413_v23  ;;  %v5893_v23 = vld [vmem:[#allocation2 + $0xb4] sm:$0xe]  ;;  %v3480_v58 = vor.u32 %v3479_v29, %v3475_v21 }
 0x2b6   : > { %v3461_v5 = vrot.slane %v3459_v1, 5  ;;  %v7109_v47 = vrot.slane %v5893_v23, 9  ;;  %v8133_v1 = vld [vmem:[#allocation2 + $0xc4] sm:$0xf] }
 0x2b7   : > { %v3481_v18 = vrot.slane %v3480_v58, 4  ;;  %v3521_v11 = vshll.u32 %v8133_v1, 16  ;;  %v3525_v3 = vshrl.u32 %v8133_v1, 16 }
 0x2b9   : > { %6340 = vmatmul.mubr.bf16.gmra.mrb[36].mxu0 %v7121_v43  ;;  %v3445_v43 = vrot.slane %v3443_v62, 5  ;;  %v3491_v62 = vshll.u32 %v3145_v63, 16  ;;  %v6054_v63 = vrot.slane %v9549_v16, 5 }
 0x2ba   : > { %6349 = vmatprep.mubr.bf16.mxu0 %v8301_v0 }
 0x2bb   : > { %3809 = vmatmul.mubr.bf16.vlgmr.msra.gmra.mrb[32].mxu1 %v9490_v4  ;;  %v3399_v4 = vrot.slane %v3398_v17, 4  ;;  %v6033_v17 = vrot.slane %v9503_v30, 5  ;;  %v3446_v56 = vor.u32 %v3445_v43, %v3442_v53  ;;  %v3456_v30 = vor.u32 %v3455_v52, %v3451_v28 }
 0x2bc   : > { %3818 = vmatprep.mubr.bf16.mxu1 %v8301_v0  ;;  %v3493_v24 = vrot.slane %v3491_v62, 5  ;;  %v6046_v52 = vrot.slane %v6044_v2, 4 }
 0x2bd   : > { %v3404_v36 = vsel %vm8553_vm6, %v3399_v4, %v3403_v54  ;;  %v3142_v54 = vld [vmem:[#allocation2 + $0xa8] sm:$0xf]  ;;  %v6034_v57 = vsel %vm8763_vm13, %v6032_v35, %v6033_v17  ;;  %v3447_v61 = vrot.slane %v3446_v56, 4  ;;  %v3457_v48 = vrot.slane %v3456_v30, 4  ;;  %v3148_v35 = vld [vmem:[#allocation2 + $0xc0] sm:$0xf] }
 0x2be   : > { %v6962_v32 = vcombine.low %v3404_v36, %v3414_v37  ;;  %v3464_v15 = vshrl.u32 %v3142_v54, 16  ;;  %v3467_v12 = vshll.u32 %v3142_v54, 16  ;;  %v6040_v36 = vrot.slane %v9520_v44, 5  ;;  %v8130_v37 = vld [vmem:[#allocation2 + $0xb8] sm:$0xf] }
 0x2bf   : > { %v3501_v20 = vshrl.u32 %v8130_v37, 16  ;;  %v3452_v41 = vsel %vm8553_vm6, %v3447_v61, %v3451_v28  ;;  %v3462_v49 = vsel %vm8553_vm6, %v3457_v48, %v3461_v5  ;;  %v7110_v28 = vrot.slane %v5894_v55, 9 }
 0x2c0   : > { %v3466_v6 = vrot.slane %v3464_v15, 4  ;;  %v3469_v4 = vrot.slane %v3467_v12, 5  ;;  %v6964_v54 = vcombine.low %v3452_v41, %v3462_v49  ;;  %v8132_v12 = vld [vmem:[#allocation2 + $0xbc] sm:$0x1]  ;;  %v3486_v56 = vsel %vm8553_vm6, %v3481_v18, %v3485_v39 }
 0x2c1   : > { %6350 = vmatmul.mubr.bf16.gmra.mrb[40].mxu0 %v7122_v14  ;;  %v7124_v14 = vcombine.low %v6031_v7, %v6034_v57  ;;  %v3503_v43 = vrot.slane %v3501_v20, 4  ;;  %v3507_v25 = vshll.u32 %v8132_v12, 16  ;;  %v3512_v60 = vshrl.u32 %v3148_v35, 16  ;;  %v5895_v7 = vld [vmem:[#allocation2 + $0xcc] sm:$0xe] }
 0x2c2   : > { %6359 = vmatprep.mubr.bf16.mxu0 %v8301_v0  ;;  %v3470_v22 = vor.u32 %v3469_v4, %v3466_v6  ;;  %v3515_v27 = vshll.u32 %v3148_v35, 16  ;;  %v6045_v40 = vsel %vm8763_vm13, %v7110_v28, %v6044_v2  ;;  %v6048_v8 = vsel %vm8763_vm13, %v6046_v52, %v6047_v31 }
 0x2c3   : > { %3819 = vmatmul.mubr.bf16.gmra.mrb[36].mxu1 %v6961_v34  ;;  %v6037_v34 = vrot.slane %v9505_v45, 5  ;;  %v3497_v45 = vshll.u32 %v8130_v37, 16  ;;  %v6051_v30 = vrot.slane %v9537_v51, 5  ;;  %v3509_v4 = vrot.slane %v3507_v25, 5 }
 0x2c4   : > { %3828 = vmatprep.mubr.bf16.mxu1 %v8301_v0  ;;  %v3471_v33 = vrot.slane %v3470_v22, 4  ;;  %v7126_v23 = vcombine.low %v6045_v40, %v6048_v8  ;;  %v3517_v61 = vrot.slane %v3515_v27, 5  ;;  %v3523_v5 = vrot.slane %v3521_v11, 5  ;;  %v6474_v40 = vld [vmem:[%s10021_s2] sm:$0x3] }
 0x2c5   : > { %v6039_v13 = vrot.slane %v6037_v34, 4  ;;  %v6038_v44 = vsel %vm8763_vm13, %v7109_v47, %v6037_v34  ;;  %v3499_v53 = vrot.slane %v3497_v45, 5  ;;  %v6053_v29 = vrot.slane %v6051_v30, 4 }
 0x2c6   : > { %v3476_v17 = vsel %vm8553_vm6, %v3471_v33, %v3475_v21  ;;  %v7111_v21 = vrot.slane %v5895_v7, 9  ;;  %v6476_v12 = vlaneseq }
 0x2c7   : > { %v6041_v10 = vsel %vm8763_vm13, %v6039_v13, %v6040_v36  ;;  %v3504_v9 = vor.u32 %v3503_v43, %v3499_v53  ;;  %v6965_v57 = vcombine.low %v3476_v17, %v3486_v56  ;;  %v8134_v36 = vld [vmem:[#allocation2 + $0xc8] sm:$0x1]  ;;  %v6055_v16 = vsel %vm8763_vm13, %v6053_v29, %v6054_v63 }
 0x2c8   : > { %v3531_v22 = vshll.u32 %v8134_v36, 16  ;;  %v6477_v25 = vshrl.u32 %v6476_v12, 7 }
 0x2c9   : > { %6360 = vmatmul.mubr.bf16.gmra.mrb[44].mxu0 %v7123_v38  ;;  %v7125_v38 = vcombine.low %v6038_v44, %v6041_v10  ;;  %v3505_v6 = vrot.slane %v3504_v9, 4 }
 0x2ca   : > { %6369 = vmatprep.mubr.bf16.mxu0 %v8301_v0  ;;  %v3533_v41 = vrot.slane %v3531_v22, 5  ;;  %v6478_v11 = vsub.s32 0, %v6477_v25  ;;  %v6482_v8 = vsub.s32 1, %v6477_v25 }
 0x2cb   : > { %3829 = vmatmul.mubr.bf16.gmra.mrb[40].mxu1 %v6962_v32  ;;  %v3490_v32 = vrot.slane %v3488_v26, 4  ;;  %v3510_v51 = vsel %vm8553_vm6, %v3505_v6, %v3509_v4  ;;  %v6052_v26 = vsel %vm8763_vm13, %v7111_v21, %v6051_v30 }
 0x2cc   : > { %3838 = vmatprep.mubr.bf16.mxu1 %v8301_v0  ;;  %v7127_v37 = vcombine.low %v6052_v26, %v6055_v16 }
 0x2cd   : > { %v3494_v15 = vor.u32 %v3493_v24, %v3490_v32 }
 0x2cf   : > { %v3495_v34 = vrot.slane %v3494_v15, 4 }
 0x2d1   : > { %6370 = vmatmul.mubr.bf16.gmra.mrb[48].mxu0 %v7124_v14  ;;  %v3527_v14 = vrot.slane %v3525_v3, 4  ;;  %v3500_v48 = vsel %vm8553_vm6, %v3495_v34, %v3499_v53  ;;  %v9760_v3 = vrot.slane %v6474_v40, %v6478_v11 }
 0x2d2   : > { %6379 = vmatprep.mubr.bf16.mxu0 %v8301_v0  ;;  %v6966_v62 = vcombine.low %v3500_v48, %v3510_v51 }
 0x2d3   : > { %3839 = vmatmul.mubr.bf16.gmra.mrb[44].mxu1 %v6963_v50  ;;  %v3514_v50 = vrot.slane %v3512_v60, 4  ;;  %v3528_v13 = vor.u32 %v3527_v14, %v3523_v5 }
 0x2d4   : > { %3848 = vmatprep.mubr.bf16.mxu1 %v8301_v0 }
 0x2d5   : > { %v3518_v47 = vor.u32 %v3517_v61, %v3514_v50  ;;  %v3529_v20 = vrot.slane %v3528_v13, 4 }
 0x2d7   : > { %v3519_v45 = vrot.slane %v3518_v47, 4  ;;  %v3534_v19 = vsel %vm8553_vm6, %v3529_v20, %v3533_v41 }
 0x2d9   : > { %6380 = vmatmul.mubr.bf16.gmra.mrb[52].mxu0 %v7125_v38  ;;  %v3524_v58 = vsel %vm8553_vm6, %v3519_v45, %v3523_v5 }
 0x2da   : > { %6389 = vmatprep.mubr.bf16.mxu0 %v8301_v0  ;;  %v6967_v59 = vcombine.low %v3524_v58, %v3534_v19 }
 0x2db   : > { %3849 = vmatmul.mubr.bf16.gmra.mrb[48].mxu1 %v6964_v54 }
 0x2dc   : > { %3858 = vmatprep.mubr.bf16.mxu1 %v8301_v0 }
 0x2e1   : > { %6390 = vmatmul.mubr.bf16.gmra.mrb[56].mxu0 %v7126_v23 }
 0x2e2   : > { %6399 = vmatprep.mubr.bf16.mxu0 %v8301_v0 }
 0x2e3   : > { %3859 = vmatmul.mubr.bf16.gmra.mrb[52].mxu1 %v6965_v57  ;;  %v9764_v57 = vrot.slane %v6474_v40, %v6482_v8 }
 0x2e4   : > { %3868 = vmatprep.mubr.bf16.mxu1 %v8301_v0 }
 0x2e9   : > { %6400 = vmatmul.mubr.bf16.gmra.mrb[60].mxu0 %v7127_v37 }
 0x2eb   : > { %3869 = vmatmul.mubr.bf16.gmra.mrb[56].mxu1 %v6966_v62 }
 0x2ec   : > { %3878 = vmatprep.mubr.bf16.mxu1 %v8301_v0 }
 0x2f3   : > { %3879 = vmatmul.mubr.bf16.gmra.mrb[60].mxu1 %v6967_v59 }
 0x30e   : > { %v2880_v49 = vpop.f32.mrb[0].mxu1 }
 0x30f   : > { %v2882_v42 = vpop.f32.mrb[1].mxu1 }
 0x310   : > { %v2884_v44 = vpop.f32.mrb[2].mxu1 }
 0x311   : > { %v2886_v10 = vpop.f32.mrb[3].mxu1 }
 0x316   : > { %v2890_v2 = vpop.f32.mrb[4].mxu1 }
 0x317   : > { %v2892_v33 = vpop.f32.mrb[5].mxu1 }
 0x318   : > { %v2894_v55 = vpop.f32.mrb[6].mxu1 }
 0x319   : > { %v2896_v32 = vpop.f32.mrb[7].mxu1 }
 0x31e   : > { %v9717_v24 = vpop.f32.mrb[8].mxu1 }
 0x31f   : > { %v9719_v53 = vpop.f32.mrb[9].mxu1 }
 0x320   : > { %v9721_v0 = vpop.f32.mrb[10].mxu1 }
 0x321   : > { %v9723_v43 = vpop.f32.mrb[11].mxu1 }
 0x326   : > { %v9725_v46 = vpop.f32.mrb[12].mxu1 }
 0x327   : > { %v9727_v54 = vpop.f32.mrb[13].mxu1 }
 0x328   : > { %v9729_v18 = vpop.f32.mrb[14].mxu1 }
 0x329   : > { %v9731_v39 = vpop.f32.mrb[15].mxu1 }
 0x32e   : > { %v9733_v38 = vpop.f32.mrb[16].mxu1 }
 0x32f   : > { %v9735_v28 = vpop.f32.mrb[17].mxu1 }
 0x330   : > { %v9737_v52 = vpop.f32.mrb[18].mxu1 }
 0x331   : > { %v9739_v31 = vpop.f32.mrb[19].mxu1 }
 0x336   : > { %v9741_v35 = vpop.f32.mrb[20].mxu1 }
 0x337   : > { %v9743_v17 = vpop.f32.mrb[21].mxu1 }
 0x338   : > { %v9745_v15 = vpop.f32.mrb[22].mxu1 }
 0x339   : > { %v9747_v9 = vpop.f32.mrb[23].mxu1 }
 0x33e   : > { %v9749_v56 = vpop.f32.mrb[24].mxu1 }
 0x33f   : > { %v9751_v60 = vpop.f32.mrb[25].mxu1 }
 0x340   : > { %v9753_v27 = vpop.f32.mrb[26].mxu1 }
 0x341   : > { %v9755_v1 = vpop.f32.mrb[27].mxu1 }
 0x344   : > { %v6251_v7 = vpop.f32.mrb[0].mxu0 }
 0x345   : > { %v7203_v6 = vadd.f32 %v6251_v7, %v2880_v49  ;;  %v6253_v4 = vpop.f32.mrb[1].mxu0 }
 0x346   : > { %v9762_v30 = vpop.f32.mrb[28].mxu1  ;;  %v7204_v50 = vadd.f32 %v6253_v4, %v2882_v42  ;;  %v6255_v61 = vpop.f32.mrb[2].mxu0 }
 0x347   : > { %v9766_v34 = vpop.f32.mrb[29].mxu1  ;;  %v6486_v14 = vadd.f32 %v7203_v6, %v9760_v3  ;;  %v7205_v21 = vadd.f32 %v6255_v61, %v2884_v44  ;;  %v6257_v29 = vpop.f32.mrb[3].mxu0 }
 0x348   : > { %v9768_v23 = vpop.f32.mrb[30].mxu1  ;;  %v6487_v63 = vadd.f32 %v7204_v50, %v9764_v57  ;;  %v7206_v48 = vadd.f32 %v6257_v29, %v2886_v10 }
 0x349   : > { %v9770_v5 = vpop.f32.mrb[31].mxu1  ;;  %6550 = vst [vmem:[%s9775_s12] sm:$0xff] %v6486_v14  ;;  %v6488_v51 = vadd.f32 %v7205_v21, %v9760_v3 }
 0x34a   : > { %6582 = vst [vmem:[%s9780_s13] sm:$0xff] %v6487_v63  ;;  %v6489_v47 = vadd.f32 %v7206_v48, %v9764_v57 }
 0x34b   : > { %6551 = vst [vmem:[%s9775_s12 + $0x8] sm:$0xff] %v6488_v51 }
 0x34c   : > { %6583 = vst [vmem:[%s9780_s13 + $0x8] sm:$0xff] %v6489_v47  ;;  %v6261_v13 = vpop.f32.mrb[4].mxu0 }
 0x34d   : > { %v7207_v36 = vadd.f32 %v6261_v13, %v2890_v2  ;;  %v6263_v22 = vpop.f32.mrb[5].mxu0 }
 0x34e   : > { %v7208_v26 = vadd.f32 %v6263_v22, %v2892_v33  ;;  %v6265_v16 = vpop.f32.mrb[6].mxu0 }
 0x34f   : > { %v6490_v62 = vadd.f32 %v7207_v36, %v9760_v3  ;;  %v7209_v37 = vadd.f32 %v6265_v16, %v2894_v55  ;;  %v6267_v45 = vpop.f32.mrb[7].mxu0 }
 0x350   : > { %v6491_v20 = vadd.f32 %v7208_v26, %v9764_v57  ;;  %v7210_v41 = vadd.f32 %v6267_v45, %v2896_v32 }
 0x351   : > { %6552 = vst [vmem:[%s9775_s12 + $0x10] sm:$0xff] %v6490_v62  ;;  %v6492_v58 = vadd.f32 %v7209_v37, %v9760_v3 }
 0x352   : > { %6584 = vst [vmem:[%s9780_s13 + $0x10] sm:$0xff] %v6491_v20  ;;  %v6493_v19 = vadd.f32 %v7210_v41, %v9764_v57 }
 0x353   : > { %6553 = vst [vmem:[%s9775_s12 + $0x18] sm:$0xff] %v6492_v58 }
 0x354   : > { %6585 = vst [vmem:[%s9780_s13 + $0x18] sm:$0xff] %v6493_v19  ;;  %v6271_v59 = vpop.f32.mrb[8].mxu0 }
 0x355   : > { %v7211_v49 = vadd.f32 %v6271_v59, %v9717_v24  ;;  %v6273_v42 = vpop.f32.mrb[9].mxu0 }
 0x356   : > { %v7212_v44 = vadd.f32 %v6273_v42, %v9719_v53  ;;  %v6275_v10 = vpop.f32.mrb[10].mxu0 }
 0x357   : > { %v6494_v2 = vadd.f32 %v7211_v49, %v9760_v3  ;;  %v7213_v33 = vadd.f32 %v6275_v10, %v9721_v0  ;;  %v6277_v55 = vpop.f32.mrb[11].mxu0 }
 0x358   : > { %v6495_v32 = vadd.f32 %v7212_v44, %v9764_v57  ;;  %v7214_v12 = vadd.f32 %v6277_v55, %v9723_v43 }
 0x359   : > { %6554 = vst [vmem:[%s9775_s12 + $0x20] sm:$0xff] %v6494_v2  ;;  %v6496_v25 = vadd.f32 %v7213_v33, %v9760_v3 }
 0x35a   : > { %6586 = vst [vmem:[%s9780_s13 + $0x20] sm:$0xff] %v6495_v32  ;;  %v6497_v24 = vadd.f32 %v7214_v12, %v9764_v57 }
 0x35b   : > { %6555 = vst [vmem:[%s9775_s12 + $0x28] sm:$0xff] %v6496_v25 }
 0x35c   : > { %6587 = vst [vmem:[%s9780_s13 + $0x28] sm:$0xff] %v6497_v24  ;;  %v6281_v53 = vpop.f32.mrb[12].mxu0 }
 0x35d   : > { %v7215_v0 = vadd.f32 %v6281_v53, %v9725_v46  ;;  %v6283_v11 = vpop.f32.mrb[13].mxu0 }
 0x35e   : > { %v7216_v40 = vadd.f32 %v6283_v11, %v9727_v54  ;;  %v6285_v8 = vpop.f32.mrb[14].mxu0 }
 0x35f   : > { %v6498_v43 = vadd.f32 %v7215_v0, %v9760_v3  ;;  %v7217_v7 = vadd.f32 %v6285_v8, %v9729_v18  ;;  %v6287_v6 = vpop.f32.mrb[15].mxu0 }
 0x360   : > { %v6499_v4 = vadd.f32 %v7216_v40, %v9764_v57  ;;  %v7218_v50 = vadd.f32 %v6287_v6, %v9731_v39 }
 0x361   : > { %6556 = vst [vmem:[%s9775_s12 + $0x30] sm:$0xff] %v6498_v43  ;;  %v6500_v61 = vadd.f32 %v7217_v7, %v9760_v3 }
 0x362   : > { %6588 = vst [vmem:[%s9780_s13 + $0x30] sm:$0xff] %v6499_v4  ;;  %v6501_v46 = vadd.f32 %v7218_v50, %v9764_v57 }
 0x363   : > { %6557 = vst [vmem:[%s9775_s12 + $0x38] sm:$0xff] %v6500_v61 }
 0x364   : > { %6589 = vst [vmem:[%s9780_s13 + $0x38] sm:$0xff] %v6501_v46  ;;  %v6291_v54 = vpop.f32.mrb[16].mxu0 }
 0x365   : > { %v7219_v18 = vadd.f32 %v6291_v54, %v9733_v38  ;;  %v6293_v14 = vpop.f32.mrb[17].mxu0 }
 0x366   : > { %v7220_v21 = vadd.f32 %v6293_v14, %v9735_v28  ;;  %v6295_v29 = vpop.f32.mrb[18].mxu0 }
 0x367   : > { %v6502_v39 = vadd.f32 %v7219_v18, %v9760_v3  ;;  %v7221_v63 = vadd.f32 %v6295_v29, %v9737_v52  ;;  %v6297_v48 = vpop.f32.mrb[19].mxu0 }
 0x368   : > { %v6503_v51 = vadd.f32 %v7220_v21, %v9764_v57  ;;  %v7222_v47 = vadd.f32 %v6297_v48, %v9739_v31 }
 0x369   : > { %6558 = vst [vmem:[%s9775_s12 + $0x40] sm:$0xff] %v6502_v39  ;;  %v6504_v13 = vadd.f32 %v7221_v63, %v9760_v3 }
 0x36a   : > { %6590 = vst [vmem:[%s9780_s13 + $0x40] sm:$0xff] %v6503_v51  ;;  %v6505_v38 = vadd.f32 %v7222_v47, %v9764_v57 }
 0x36b   : > { %6559 = vst [vmem:[%s9775_s12 + $0x48] sm:$0xff] %v6504_v13 }
 0x36c   : > { %6591 = vst [vmem:[%s9780_s13 + $0x48] sm:$0xff] %v6505_v38  ;;  %v6301_v28 = vpop.f32.mrb[20].mxu0 }
 0x36d   : > { %v7223_v52 = vadd.f32 %v6301_v28, %v9741_v35  ;;  %v6303_v36 = vpop.f32.mrb[21].mxu0 }
 0x36e   : > { %v7224_v22 = vadd.f32 %v6303_v36, %v9743_v17  ;;  %v6305_v26 = vpop.f32.mrb[22].mxu0 }
 0x36f   : > { %v6506_v31 = vadd.f32 %v7223_v52, %v9760_v3  ;;  %v7225_v16 = vadd.f32 %v6305_v26, %v9745_v15  ;;  %v6307_v62 = vpop.f32.mrb[23].mxu0 }
 0x370   : > { %v6507_v37 = vadd.f32 %v7224_v22, %v9764_v57  ;;  %v7226_v45 = vadd.f32 %v6307_v62, %v9747_v9 }
 0x371   : > { %6560 = vst [vmem:[%s9775_s12 + $0x50] sm:$0xff] %v6506_v31  ;;  %v6508_v20 = vadd.f32 %v7225_v16, %v9760_v3 }
 0x372   : > { %6592 = vst [vmem:[%s9780_s13 + $0x50] sm:$0xff] %v6507_v37  ;;  %v6509_v35 = vadd.f32 %v7226_v45, %v9764_v57 }
 0x373   : > { %6561 = vst [vmem:[%s9775_s12 + $0x58] sm:$0xff] %v6508_v20 }
 0x374   : > { %6593 = vst [vmem:[%s9780_s13 + $0x58] sm:$0xff] %v6509_v35  ;;  %v6311_v17 = vpop.f32.mrb[24].mxu0 }
 0x375   : > { %v7227_v15 = vadd.f32 %v6311_v17, %v9749_v56  ;;  %v6313_v41 = vpop.f32.mrb[25].mxu0 }
 0x376   : > { %v7228_v58 = vadd.f32 %v6313_v41, %v9751_v60  ;;  %v6315_v19 = vpop.f32.mrb[26].mxu0 }
 0x377   : > { %v6510_v9 = vadd.f32 %v7227_v15, %v9760_v3  ;;  %v7229_v59 = vadd.f32 %v6315_v19, %v9753_v27  ;;  %v6317_v49 = vpop.f32.mrb[27].mxu0 }
 0x378   : > { %v6511_v42 = vadd.f32 %v7228_v58, %v9764_v57  ;;  %v7230_v44 = vadd.f32 %v6317_v49, %v9755_v1 }
 0x379   : > { %6562 = vst [vmem:[%s9775_s12 + $0x60] sm:$0xff] %v6510_v9  ;;  %v6512_v10 = vadd.f32 %v7229_v59, %v9760_v3 }
 0x37a   : > { %6594 = vst [vmem:[%s9780_s13 + $0x60] sm:$0xff] %v6511_v42  ;;  %v6513_v56 = vadd.f32 %v7230_v44, %v9764_v57 }
 0x37b   : > { %6563 = vst [vmem:[%s9775_s12 + $0x68] sm:$0xff] %v6512_v10 }
 0x37c   : > { %6595 = vst [vmem:[%s9780_s13 + $0x68] sm:$0xff] %v6513_v56  ;;  %v6321_v60 = vpop.f32.mrb[28].mxu0 }
 0x37d   : > { %v7231_v27 = vadd.f32 %v6321_v60, %v9762_v30  ;;  %v6323_v2 = vpop.f32.mrb[29].mxu0 }
 0x37e   : > { %v7232_v33 = vadd.f32 %v6323_v2, %v9766_v34  ;;  %v6325_v55 = vpop.f32.mrb[30].mxu0 }
 0x37f   : > { %v6514_v1 = vadd.f32 %v7231_v27, %v9760_v3  ;;  %v7233_v32 = vadd.f32 %v6325_v55, %v9768_v23  ;;  %v6327_v12 = vpop.f32.mrb[31].mxu0 }
 0x380   : > { %v6515_v25 = vadd.f32 %v7232_v33, %v9764_v57  ;;  %v7234_v24 = vadd.f32 %v6327_v12, %v9770_v5 }
 0x381   : > { %6564 = vst [vmem:[%s9775_s12 + $0x70] sm:$0xff] %v6514_v1  ;;  %v6516_v53 = vadd.f32 %v7233_v32, %v9760_v3 }
 0x382   : > { %6596 = vst [vmem:[%s9780_s13 + $0x70] sm:$0xff] %v6515_v25  ;;  %v6517_v0 = vadd.f32 %v7234_v24, %v9764_v57 }
 0x383   : > { %6565 = vst [vmem:[%s9775_s12 + $0x78] sm:$0xff] %v6516_v53 }
 0x384   : > { %6597 = vst [vmem:[%s9780_s13 + $0x78] sm:$0xff] %v6517_v0  ;;  %v6331_v30 = vpop.f32.mrb[32].mxu0 }
 0x385   : > { %v6333_v34 = vpop.f32.mrb[33].mxu0 }
 0x386   : > { %v6335_v11 = vpop.f32.mrb[34].mxu0 }
 0x387   : > { %v6337_v40 = vpop.f32.mrb[35].mxu0 }
 0x38c   : > { %v6341_v23 = vpop.f32.mrb[36].mxu0 }
 0x38d   : > { %v6343_v5 = vpop.f32.mrb[37].mxu0 }
 0x38e   : > { %v3810_v8 = vpop.f32.mrb[32].mxu1  ;;  %v6345_v50 = vpop.f32.mrb[38].mxu0 }
 0x38f   : > { %v7235_v43 = vadd.f32 %v6331_v30, %v3810_v8  ;;  %v3812_v7 = vpop.f32.mrb[33].mxu1  ;;  %v6347_v18 = vpop.f32.mrb[39].mxu0 }
 0x390   : > { %v7236_v6 = vadd.f32 %v6333_v34, %v3812_v7  ;;  %v3814_v4 = vpop.f32.mrb[34].mxu1 }
 0x391   : > { %v6518_v61 = vadd.f32 %v7235_v43, %v9760_v3  ;;  %v7237_v46 = vadd.f32 %v6335_v11, %v3814_v4  ;;  %v3816_v54 = vpop.f32.mrb[35].mxu1 }
 0x392   : > { %v6519_v14 = vadd.f32 %v7236_v6, %v9764_v57  ;;  %v7238_v21 = vadd.f32 %v6337_v40, %v3816_v54 }
 0x393   : > { %6566 = vst [vmem:[%s9775_s12 + $0x80] sm:$0xff] %v6518_v61  ;;  %v6520_v29 = vadd.f32 %v7237_v46, %v9760_v3 }
 0x394   : > { %6598 = vst [vmem:[%s9780_s13 + $0x80] sm:$0xff] %v6519_v14  ;;  %v6521_v39 = vadd.f32 %v7238_v21, %v9764_v57  ;;  %v6351_v48 = vpop.f32.mrb[40].mxu0 }
 0x395   : > { %6567 = vst [vmem:[%s9775_s12 + $0x88] sm:$0xff] %v6520_v29  ;;  %v6353_v13 = vpop.f32.mrb[41].mxu0 }
 0x396   : > { %6599 = vst [vmem:[%s9780_s13 + $0x88] sm:$0xff] %v6521_v39  ;;  %v3820_v63 = vpop.f32.mrb[36].mxu1  ;;  %v6355_v52 = vpop.f32.mrb[42].mxu0 }
 0x397   : > { %v7239_v51 = vadd.f32 %v6341_v23, %v3820_v63  ;;  %v3822_v47 = vpop.f32.mrb[37].mxu1  ;;  %v6357_v31 = vpop.f32.mrb[43].mxu0 }
 0x398   : > { %v7240_v38 = vadd.f32 %v6343_v5, %v3822_v47  ;;  %v3824_v28 = vpop.f32.mrb[38].mxu1 }
 0x399   : > { %v6522_v36 = vadd.f32 %v7239_v51, %v9760_v3  ;;  %v7241_v22 = vadd.f32 %v6345_v50, %v3824_v28  ;;  %v3826_v26 = vpop.f32.mrb[39].mxu1 }
 0x39a   : > { %v6523_v16 = vadd.f32 %v7240_v38, %v9764_v57  ;;  %v7242_v62 = vadd.f32 %v6347_v18, %v3826_v26 }
 0x39b   : > { %6568 = vst [vmem:[%s9775_s12 + $0x90] sm:$0xff] %v6522_v36  ;;  %v6524_v37 = vadd.f32 %v7241_v22, %v9760_v3 }
 0x39c   : > { %6600 = vst [vmem:[%s9780_s13 + $0x90] sm:$0xff] %v6523_v16  ;;  %v6525_v45 = vadd.f32 %v7242_v62, %v9764_v57  ;;  %v6361_v35 = vpop.f32.mrb[44].mxu0 }
 0x39d   : > { %6569 = vst [vmem:[%s9775_s12 + $0x98] sm:$0xff] %v6524_v37  ;;  %v6363_v41 = vpop.f32.mrb[45].mxu0 }
 0x39e   : > { %6601 = vst [vmem:[%s9780_s13 + $0x98] sm:$0xff] %v6525_v45  ;;  %v3830_v20 = vpop.f32.mrb[40].mxu1  ;;  %v6365_v9 = vpop.f32.mrb[46].mxu0 }
 0x39f   : > { %v7243_v17 = vadd.f32 %v6351_v48, %v3830_v20  ;;  %v3832_v15 = vpop.f32.mrb[41].mxu1  ;;  %v6367_v44 = vpop.f32.mrb[47].mxu0 }
 0x3a0   : > { %v7244_v58 = vadd.f32 %v6353_v13, %v3832_v15  ;;  %v3834_v19 = vpop.f32.mrb[42].mxu1 }
 0x3a1   : > { %v6526_v59 = vadd.f32 %v7243_v17, %v9760_v3  ;;  %v7245_v49 = vadd.f32 %v6355_v52, %v3834_v19  ;;  %v3836_v42 = vpop.f32.mrb[43].mxu1 }
 0x3a2   : > { %v6527_v10 = vadd.f32 %v7244_v58, %v9764_v57  ;;  %v7246_v56 = vadd.f32 %v6357_v31, %v3836_v42 }
 0x3a3   : > { %6570 = vst [vmem:[%s9775_s12 + $0xa0] sm:$0xff] %v6526_v59  ;;  %v6528_v60 = vadd.f32 %v7245_v49, %v9760_v3 }
 0x3a4   : > { %6602 = vst [vmem:[%s9780_s13 + $0xa0] sm:$0xff] %v6527_v10  ;;  %v6529_v27 = vadd.f32 %v7246_v56, %v9764_v57  ;;  %v6371_v33 = vpop.f32.mrb[48].mxu0 }
 0x3a5   : > { %6571 = vst [vmem:[%s9775_s12 + $0xa8] sm:$0xff] %v6528_v60  ;;  %v6373_v32 = vpop.f32.mrb[49].mxu0 }
 0x3a6   : > { %6603 = vst [vmem:[%s9780_s13 + $0xa8] sm:$0xff] %v6529_v27  ;;  %v3840_v2 = vpop.f32.mrb[44].mxu1  ;;  %v6375_v24 = vpop.f32.mrb[50].mxu0 }
 0x3a7   : > { %v7247_v55 = vadd.f32 %v6361_v35, %v3840_v2  ;;  %v3842_v1 = vpop.f32.mrb[45].mxu1  ;;  %v6377_v34 = vpop.f32.mrb[51].mxu0 }
 0x3a8   : > { %v7248_v12 = vadd.f32 %v6363_v41, %v3842_v1  ;;  %v3844_v25 = vpop.f32.mrb[46].mxu1 }
 0x3a9   : > { %v6530_v53 = vadd.f32 %v7247_v55, %v9760_v3  ;;  %v7249_v0 = vadd.f32 %v6365_v9, %v3844_v25  ;;  %v3846_v30 = vpop.f32.mrb[47].mxu1 }
 0x3aa   : > { %v6531_v11 = vadd.f32 %v7248_v12, %v9764_v57  ;;  %v7250_v40 = vadd.f32 %v6367_v44, %v3846_v30 }
 0x3ab   : > { %6572 = vst [vmem:[%s9775_s12 + $0xb0] sm:$0xff] %v6530_v53  ;;  %v6532_v8 = vadd.f32 %v7249_v0, %v9760_v3 }
 0x3ac   : > { %6604 = vst [vmem:[%s9780_s13 + $0xb0] sm:$0xff] %v6531_v11  ;;  %v6533_v23 = vadd.f32 %v7250_v40, %v9764_v57  ;;  %v6381_v7 = vpop.f32.mrb[52].mxu0 }
 0x3ad   : > { %6573 = vst [vmem:[%s9775_s12 + $0xb8] sm:$0xff] %v6532_v8  ;;  %v6383_v4 = vpop.f32.mrb[53].mxu0 }
 0x3ae   : > { %6605 = vst [vmem:[%s9780_s13 + $0xb8] sm:$0xff] %v6533_v23  ;;  %v3850_v43 = vpop.f32.mrb[48].mxu1  ;;  %v6385_v46 = vpop.f32.mrb[54].mxu0 }
 0x3af   : > { %v7251_v5 = vadd.f32 %v6371_v33, %v3850_v43  ;;  %v3852_v6 = vpop.f32.mrb[49].mxu1  ;;  %v6387_v21 = vpop.f32.mrb[55].mxu0 }
 0x3b0   : > { %v7252_v50 = vadd.f32 %v6373_v32, %v3852_v6  ;;  %v3854_v61 = vpop.f32.mrb[50].mxu1 }
 0x3b1   : > { %v6534_v54 = vadd.f32 %v7251_v5, %v9760_v3  ;;  %v7253_v18 = vadd.f32 %v6375_v24, %v3854_v61  ;;  %v3856_v14 = vpop.f32.mrb[51].mxu1 }
 0x3b2   : > { %v6535_v29 = vadd.f32 %v7252_v50, %v9764_v57  ;;  %v7254_v39 = vadd.f32 %v6377_v34, %v3856_v14 }
 0x3b3   : > { %6574 = vst [vmem:[%s9775_s12 + $0xc0] sm:$0xff] %v6534_v54  ;;  %v6536_v63 = vadd.f32 %v7253_v18, %v9760_v3 }
 0x3b4   : > { %6606 = vst [vmem:[%s9780_s13 + $0xc0] sm:$0xff] %v6535_v29  ;;  %v6537_v48 = vadd.f32 %v7254_v39, %v9764_v57  ;;  %v6391_v47 = vpop.f32.mrb[56].mxu0 }
 0x3b5   : > { %6575 = vst [vmem:[%s9775_s12 + $0xc8] sm:$0xff] %v6536_v63  ;;  %v6393_v28 = vpop.f32.mrb[57].mxu0 }
 0x3b6   : > { %6607 = vst [vmem:[%s9780_s13 + $0xc8] sm:$0xff] %v6537_v48  ;;  %v3860_v51 = vpop.f32.mrb[52].mxu1  ;;  %v6395_v22 = vpop.f32.mrb[58].mxu0 }
 0x3b7   : > { %v7255_v13 = vadd.f32 %v6381_v7, %v3860_v51  ;;  %v3862_v38 = vpop.f32.mrb[53].mxu1  ;;  %v6397_v62 = vpop.f32.mrb[59].mxu0 }
 0x3b8   : > { %v7256_v52 = vadd.f32 %v6383_v4, %v3862_v38  ;;  %v3864_v36 = vpop.f32.mrb[54].mxu1 }
 0x3b9   : > { %v6538_v26 = vadd.f32 %v7255_v13, %v9760_v3  ;;  %v7257_v31 = vadd.f32 %v6385_v46, %v3864_v36  ;;  %v3866_v16 = vpop.f32.mrb[55].mxu1 }
 0x3ba   : > { %v6539_v37 = vadd.f32 %v7256_v52, %v9764_v57  ;;  %v7258_v45 = vadd.f32 %v6387_v21, %v3866_v16 }
 0x3bb   : > { %6576 = vst [vmem:[%s9775_s12 + $0xd0] sm:$0xff] %v6538_v26  ;;  %v6540_v20 = vadd.f32 %v7257_v31, %v9760_v3 }
 0x3bc   : > { %6608 = vst [vmem:[%s9780_s13 + $0xd0] sm:$0xff] %v6539_v37  ;;  %v6541_v35 = vadd.f32 %v7258_v45, %v9764_v57  ;;  %v6401_v15 = vpop.f32.mrb[60].mxu0 }
 0x3bd   : > { %6577 = vst [vmem:[%s9775_s12 + $0xd8] sm:$0xff] %v6540_v20  ;;  %v6403_v19 = vpop.f32.mrb[61].mxu0 }
 0x3be   : > { %6609 = vst [vmem:[%s9780_s13 + $0xd8] sm:$0xff] %v6541_v35  ;;  %v3870_v17 = vpop.f32.mrb[56].mxu1  ;;  %v6405_v49 = vpop.f32.mrb[62].mxu0 }
 0x3bf   : > { %v7259_v41 = vadd.f32 %v6391_v47, %v3870_v17  ;;  %v3872_v58 = vpop.f32.mrb[57].mxu1  ;;  %v6407_v56 = vpop.f32.mrb[63].mxu0 }
 0x3c0   : > { %v7260_v9 = vadd.f32 %v6393_v28, %v3872_v58  ;;  %v3874_v59 = vpop.f32.mrb[58].mxu1 }
 0x3c1   : > { %v6542_v42 = vadd.f32 %v7259_v41, %v9760_v3  ;;  %v7261_v44 = vadd.f32 %v6395_v22, %v3874_v59  ;;  %v3876_v10 = vpop.f32.mrb[59].mxu1 }
 0x3c2   : > { %v6543_v60 = vadd.f32 %v7260_v9, %v9764_v57  ;;  %v7262_v27 = vadd.f32 %v6397_v62, %v3876_v10 }
 0x3c3   : > { %6578 = vst [vmem:[%s9775_s12 + $0xe0] sm:$0xff] %v6542_v42  ;;  %v6544_v2 = vadd.f32 %v7261_v44, %v9760_v3 }
 0x3c4   : > { %6610 = vst [vmem:[%s9780_s13 + $0xe0] sm:$0xff] %v6543_v60  ;;  %v6545_v33 = vadd.f32 %v7262_v27, %v9764_v57 }
 0x3c5   : > { %6579 = vst [vmem:[%s9775_s12 + $0xe8] sm:$0xff] %v6544_v2 }
 0x3c6   : > { %6611 = vst [vmem:[%s9780_s13 + $0xe8] sm:$0xff] %v6545_v33  ;;  %v3880_v55 = vpop.f32.mrb[60].mxu1 }
 0x3c7   : > { %v7263_v1 = vadd.f32 %v6401_v15, %v3880_v55  ;;  %v3882_v32 = vpop.f32.mrb[61].mxu1 }
 0x3c8   : > { %v7264_v12 = vadd.f32 %v6403_v19, %v3882_v32  ;;  %v3884_v25 = vpop.f32.mrb[62].mxu1 }
 0x3c9   : > { %v6546_v24 = vadd.f32 %v7263_v1, %v9760_v3  ;;  %v7265_v53 = vadd.f32 %v6405_v49, %v3884_v25  ;;  %v3886_v0 = vpop.f32.mrb[63].mxu1 }
 0x3ca   : > { %v6547_v30 = vadd.f32 %v7264_v12, %v9764_v57  ;;  %v7266_v34 = vadd.f32 %v6407_v56, %v3886_v0 }
 0x3cb   : > { %6580 = vst [vmem:[%s9775_s12 + $0xf0] sm:$0xff] %v6546_v24  ;;  %v6548_v11 = vadd.f32 %v7265_v53, %v9760_v3 }
 0x3cc   : > { %6612 = vst [vmem:[%s9780_s13 + $0xf0] sm:$0xff] %v6547_v30  ;;  %v6549_v40 = vadd.f32 %v7266_v34, %v9764_v57 }
 0x3cd   : > { %6581 = vst [vmem:[%s9775_s12 + $0xf8] sm:$0xff] %v6548_v11 }
 0x3ce   : > { %6613 = vst [vmem:[%s9780_s13 + $0xf8] sm:$0xff] %v6549_v40 }
 0x3cf   : > { %8206 = shalt.err (!%p8203_p7)
}
 0x3d0   : > { %s8207_s23 = scalar_lea.hbm %s9928_s7, 4096  ;;  %s8211_s9 = scalar_lea.hbm %s10022_s3, 8192 }
 0x3d1   : > { %p8208_p9 = scmp.ne.s32.totalorder %s9928_s7, %s8207_s23  ;;  %p8212_p5 = scmp.lt.u32.totalorder %s9928_s7, %s10022_s3 }
 0x3d2   : > { %p8213_p11 = scmp.lt.u32.totalorder %s8211_s9, %s8207_s23  ;;  %p8215_p4 = scmp.lt.u32.totalorder %s8207_s23, %s9928_s7 }
 0x3d3   : > { %p8209_p1 = pnand %p8208_p9, %p8425_p12 }
 0x3d4   : > { %p8214_p2 = por %p8213_p11, %p8212_p5 }
 0x3d5   : > { %p8210_p0 = pneg %p8209_p1 }
 0x3d6   : > { %p8216_p6 = por %p8215_p4, %p8214_p2 }
 0x3d8   : > { %p8217_p8 = pnand %p8216_p6, %p8210_p0 }
 0x3da   : > { %8220 = shalt.err (!%p8217_p8)
}
 0x3db   : > { %s8303_s26 = smov 128   ;;  %s8304_s8 = smov 8  }
 0x3dc   : > { %7721 = dma.vmem_to_hbm [thread:$0]  (%p8425_p12), %s9932_s28, 4096, %s9928_s7, %s6615_s14, %s8303_s26, %s8303_s26, %s8304_s8  }
 0x3dd   : > { %s6620_s20 = scalar_lea.sflag [#allocation10], %s8476_s11  ;;  %s8221_s29 = scalar_lea.vmem %s9943_s19, 4096 }
 0x3de   : > { %p8222_p10 = scmp.ne.s32.totalorder %s9943_s19, %s8221_s29  ;;  %s8305_s5 = smov [#allocation9]  }
 0x3df   : > { %s8225_s21 = sshll.u32 %s8305_s5, 4  ;;  %s8226_s21 = int_to_ptr.vmem [resolvable:$false] %s8225_s21 }
 0x3e0   : > { %p8223_p13 = pnand %p8222_p10, %p8425_p12  ;;  %s8227_s23 = scalar_lea.vmem %s8226_s21, 8192 }
 0x3e1   : > { %p8228_p7 = scmp.lt.s32.totalorder %s9943_s19, %s8226_s21  ;;  %p8229_p9 = scmp.lt.s32.totalorder %s8227_s23, %s8221_s29 }
 0x3e2   : > { %p8224_p3 = pneg %p8223_p13 }
 0x3e3   : > { %p8230_p1 = por %p8229_p9, %p8228_p7 }
 0x3e5   : > { %p8231_p0 = pnand %p8230_p1, %p8224_p3 }
 0x3e7   : > { %8234 = shalt.err (!%p8231_p0)
}
 0x3e8   : > { %s8235_s28 = scalar_lea.hbm %s9941_s25, 4096  ;;  %s8239_s12 = scalar_lea.hbm %s10023_s4, 8192 }
 0x3e9   : > { %p8236_p5 = scmp.ne.s32.totalorder %s9941_s25, %s8235_s28  ;;  %p8240_p4 = scmp.lt.u32.totalorder %s9941_s25, %s10023_s4 }
 0x3ea   : > { %p8241_p6 = scmp.lt.u32.totalorder %s8239_s12, %s8235_s28  ;;  %p8243_p10 = scmp.lt.u32.totalorder %s8235_s28, %s9941_s25 }
 0x3eb   : > { %p8237_p11 = pnand %p8236_p5, %p8425_p12 }
 0x3ec   : > { %p8242_p8 = por %p8241_p6, %p8240_p4 }
 0x3ed   : > { %p8238_p2 = pneg %p8237_p11 }
 0x3ee   : > { %p8244_p13 = por %p8243_p10, %p8242_p8 }
 0x3f0   : > { %p8245_p3 = pnand %p8244_p13, %p8238_p2 }
 0x3f2   : > { %8248 = shalt.err (!%p8245_p3)
}
 0x3f3   : > { %7722 = dma.vmem_to_hbm [thread:$0]  (%p8425_p12), %s9943_s19, 4096, %s9941_s25, %s6620_s20, %s8303_s26, %s8303_s26, %s8304_s8  }
 0x3f4 PF: > { %s6664_s10 = sand.u32 1, %s8283_s15   ;;  %p10048_p7 = scmp.ne.s32.totalorder %s10028_s22, 0 }
 0x3f5   : > { %p10049_p9 = scmp.ge.s32.totalorder %s8295_s18, 2  ;;  %s6665_s6 = scalar_lea.sflag [#allocation5], %s6664_s10 }
 0x3f7   : > { %p7734_p1 = pnand %p10049_p9, %p10048_p7 }
 0x3f9   : > { %8274 = dma.done.wait (!%p7734_p1), %s6665_s6, 4096  }
 0x3fa   : > { %8276 = vsyncadd (!%p7734_p1), %s6665_s6, 4294963200  ;;  %s6674_s30 = scalar_lea.sflag [#allocation10], %s6664_s10 }
 0x3fb   : > { %8278 = dma.done.wait (!%p7734_p1), %s6674_s30, 4096  }
 0x3fc   : > { %8280 = vsyncadd (!%p7734_p1), %s6674_s30, 4294963200  ;;  %p22_p12 = scmp.ge.s32.totalorder %s8387_s27, 4   ;;  %s10050_s15 = smov %s8287_s16 }
 0x3fd   : > { %s10051_s16 = smov %s8291_s17  ;;  %s10052_s17 = smov %s8421_s24 }
 0x3fe   : > { %s10053_s18 = smov %s8387_s27  ;;  %24 = sbr.rel (!%p22_p12) target bundleno = 8 (0x8), region = 108 }
 0x405   :  { %6679 = vsyncpa [#allocation4], 1 }
 0x406   :  { %6681 = vsyncpa [#allocation4 + $0x1], 1 }
 0x407   :  { %6682 = vsyncpa [#allocation7], 1 }
 0x408   :  { %6683 = vsyncpa [#allocation5], 1 }
 0x409   :  { %6685 = vsyncpa [#allocation5 + $0x1], 1 }
 0x40a   :  { %6686 = vsyncpa [#allocation10], 1 }
 0x40b   :  { %6688 = vsyncpa [#allocation10 + $0x1], 1 }

</bundles_post_ra>
